<compile_context>
chip_gen: v7x
topology: tpu7x:2x2x1
jax: 0.10.0
libtpu: 0.0.40
codegen_flags: <defaults>
</compile_context>

<pallas_src>
import functools

import jax
import jax.numpy as jnp
from jax import lax
from jax.experimental import pallas as pl
from jax.experimental.pallas import tpu as pltpu


def _round_up(x, m):
    return ((x + m - 1) // m) * m


# ----------------------------------------------------------------------------
# Fused Pallas kernel (all layers + both directions interleaved + FC)
# ----------------------------------------------------------------------------
def _make_fused_kernel(num_layers, num_dirs, T, B_p, H_p):
    n_rnn = 3 * num_layers * num_dirs  # (w_ih_t, w_hh_t, bias) per layer/dir

    def kernel(*refs):
        x_ref = refs[0]                               # (T*B_p, E)
        rnn_refs = refs[1:1 + n_rnn]
        w_fc_ref = refs[1 + n_rnn]                    # (num_dirs*H_p, O_p)
        b_fc_ref = refs[2 + n_rnn]                    # (1, O_p)
        out_ref = refs[3 + n_rnn]                     # (B_p, O_p)
        u_scr = refs[4 + n_rnn]                       # (T*B_p, num_dirs*H_p)
        seq_scr = refs[5 + n_rnn] if num_layers > 1 else None

        in_ref = x_ref
        finals = None
        for layer in range(num_layers):
            is_last = layer == num_layers - 1
            out_scr = None if is_last else seq_scr

            # Hoisted input projection: one big MXU matmul per direction for
            # all T steps; bias fused once. Result parked in VMEM scratch so
            # the recurrence reads cheap (8,128) tiles instead of holding a
            # (T*B_p, H_p) value live in vregs.
            for d in range(num_dirs):
                base = 3 * (layer * num_dirs + d)
                u = jnp.dot(in_ref[...], rnn_refs[base][...],
                            preferred_element_type=jnp.float32) + rnn_refs[base + 2][...]
                u_scr[:, d * H_p:(d + 1) * H_p] = u

            w_hh_refs = [rnn_refs[3 * (layer * num_dirs + d) + 1]
                         for d in range(num_dirs)]

            def step_fn(row_f, row_b, hs, _w_hh=w_hh_refs, _out=out_scr):
                # Forward and backward chains are independent -> interleave
                # them in the same step so MXU/EUP latency overlaps.
                h_f = jnp.tanh(
                    u_scr[pl.ds(row_f, B_p), 0:H_p]
                    + jnp.dot(hs[0], _w_hh[0][...],
                              preferred_element_type=jnp.float32))
                new = [h_f]
                if num_dirs == 2:
                    h_b = jnp.tanh(
                        u_scr[pl.ds(row_b, B_p), H_p:2 * H_p]
                        + jnp.dot(hs[1], _w_hh[1][...],
                                  preferred_element_type=jnp.float32))
                    new.append(h_b)
                if _out is not None:
                    # lane-dense (8,128) stores at 128-aligned lane offsets
                    _out[pl.ds(row_f, B_p), 0:H_p] = new[0]
                    if num_dirs == 2:
                        _out[pl.ds(row_b, B_p), H_p:2 * H_p] = new[1]
                return tuple(new)

            init = tuple(jnp.zeros((B_p, H_p), jnp.float32)
                         for _ in range(num_dirs))
            if T <= 16:
                # Small static T: full unroll, static row offsets.
                hs = init
                for s in range(T):
                    hs = step_fn(s * B_p, (T - 1 - s) * B_p, hs)
            else:
                # Realistic T: bounded-unroll loop keeps vreg live ranges small.
                def body(s, hs):
                    row_f = pl.multiple_of(s * B_p, B_p)
                    row_b = pl.multiple_of((T - 1 - s) * B_p, B_p)
                    return step_fn(row_f, row_b, hs)
                hs = lax.fori_loop(0, T, body, init, unroll=8)
            finals = hs

            if not is_last:
                in_ref = seq_scr   # next layer reads the VMEM-resident sequence

        # Dropout: eval mode -> identity.  FC as block dots (no concat needed).
        logits = jnp.dot(finals[0], w_fc_ref[0:H_p, :],
                         preferred_element_type=jnp.float32)
        if num_dirs == 2:
            logits = logits + jnp.dot(finals[1], w_fc_ref[H_p:2 * H_p, :],
                                      preferred_element_type=jnp.float32)
        logits = logits + b_fc_ref[...]
        out_ref[...] = logits.astype(out_ref.dtype)

    return kernel


# ----------------------------------------------------------------------------
# Parameter initialization (PyTorch-convention shapes)
# ----------------------------------------------------------------------------
def init_params(key, vocab_size, embedding_dim, hidden_dim, num_layers,
                is_bidirectional, output_size):
    num_dirs = 2 if is_bidirectional else 1
    keys = jax.random.split(key, 4 + num_layers * num_dirs * 4)
    ki = iter(range(len(keys)))

    # nn.Embedding: N(0,1), padding_idx=0 row zeroed.
    emb = jax.random.normal(keys[next(ki)], (vocab_size, embedding_dim),
                            jnp.float32)
    emb = emb.at[0].set(0.0)

    bound = 1.0 / jnp.sqrt(hidden_dim)
    rnn = []  # rnn[layer][direction] = dict(w_ih, w_hh, b_ih, b_hh)
    for layer in range(num_layers):
        d_in = embedding_dim if layer == 0 else hidden_dim * num_dirs
        dirs = []
        for _ in range(num_dirs):
            w_ih = jax.random.uniform(keys[next(ki)], (hidden_dim, d_in),
                                      jnp.float32, -bound, bound)
            w_hh = jax.random.uniform(keys[next(ki)], (hidden_dim, hidden_dim),
                                      jnp.float32, -bound, bound)
            b_ih = jax.random.uniform(keys[next(ki)], (1, hidden_dim),
                                      jnp.float32, -bound, bound)
            b_hh = jax.random.uniform(keys[next(ki)], (1, hidden_dim),
                                      jnp.float32, -bound, bound)
            dirs.append(dict(w_ih=w_ih, w_hh=w_hh, b_ih=b_ih, b_hh=b_hh))
        rnn.append(dirs)

    fc_in = hidden_dim * num_dirs
    fc_bound = 1.0 / jnp.sqrt(fc_in)
    w_fc = jax.random.uniform(keys[next(ki)], (output_size, fc_in),
                              jnp.float32, -fc_bound, fc_bound)
    b_fc = jax.random.uniform(keys[next(ki)], (1, output_size),
                              jnp.float32, -fc_bound, fc_bound)

    return dict(embedding=emb, rnn=rnn, w_fc=w_fc, b_fc=b_fc)


# ----------------------------------------------------------------------------
# One-time packing: pre-transpose + zero-pad weights to lane-dense shapes
# ----------------------------------------------------------------------------
def pack_params(params, hidden_dim, is_bidirectional, output_size):
    num_dirs = 2 if is_bidirectional else 1
    H = hidden_dim
    H_p = _round_up(H, 128)
    O_p = _round_up(output_size, 128)   # lane-dense FC output

    rnn_flat = []
    for layer, dirs in enumerate(params["rnn"]):
        for p in dirs:
            w_ih_t_raw = p["w_ih"].T          # (D_in, H)
            w_hh_t_raw = p["w_hh"].T          # (H, H)
            if layer == 0:
                d_in = w_ih_t_raw.shape[0]    # true embedding_dim, no lane pad
                w_ih_t = jnp.zeros((d_in, H_p), jnp.float32)
                w_ih_t = w_ih_t.at[:, :H].set(w_ih_t_raw)
            else:
                # layer>0 input is [fwd block | bwd block], each padded to H_p
                w_ih_t = jnp.zeros((num_dirs * H_p, H_p), jnp.float32)
                for dd in range(num_dirs):
                    w_ih_t = w_ih_t.at[dd * H_p:dd * H_p + H, :H].set(
                        w_ih_t_raw[dd * H:(dd + 1) * H, :])
            w_hh_t = jnp.zeros((H_p, H_p), jnp.float32).at[:H, :H].set(w_hh_t_raw)
            bias = jnp.zeros((1, H_p), jnp.float32).at[:, :H].set(
                p["b_ih"] + p["b_hh"])
            rnn_flat.extend([w_ih_t, w_hh_t, bias])

    w_fc_t_raw = params["w_fc"].T             # (num_dirs*H, O)
    O = output_size
    w_fc_t = jnp.zeros((num_dirs * H_p, O_p), jnp.float32)
    for dd in range(num_dirs):
        w_fc_t = w_fc_t.at[dd * H_p:dd * H_p + H, :O].set(
            w_fc_t_raw[dd * H:(dd + 1) * H, :])
    b_fc = jnp.zeros((1, O_p), jnp.float32).at[:, :O].set(params["b_fc"])

    return dict(embedding=params["embedding"], rnn_flat=rnn_flat,
                w_fc_t=w_fc_t, b_fc=b_fc)


# ----------------------------------------------------------------------------
# Forward pass (matches SentimentRNN.forward, eval-mode dropout)
# ----------------------------------------------------------------------------
def sentiment_rnn_forward(tokens, packed, *, is_bidirectional, output_size):
    """tokens: (B, T) int32 token ids. Returns (B, output_size) float32."""
    num_dirs = 2 if is_bidirectional else 1
    rnn_flat = packed["rnn_flat"]
    num_layers = len(rnn_flat) // (3 * num_dirs)
    H_p = rnn_flat[1].shape[0]                 # w_hh_t is (H_p, H_p)
    O_p = packed["w_fc_t"].shape[1]

    B, T = tokens.shape
    B_p = _round_up(max(B, 8), 8)
    E = packed["embedding"].shape[1]

    # TODO(synk): move the embedding gather in-kernel (scalar-prefetched token
    # ids + per-row DMA from the HBM table) to remove this wrapper copy.
    emb = jnp.take(packed["embedding"], tokens, axis=0)        # (B, T, E)
    x = jnp.transpose(emb, (1, 0, 2))                          # (T, B, E)
    x = jnp.pad(x, ((0, 0), (0, B_p - B), (0, 0)))             # (T, B_p, E)
    x = x.reshape(T * B_p, E)                                  # time-major flat

    kernel = _make_fused_kernel(num_layers, num_dirs, T, B_p, H_p)
    n_in = 1 + 3 * num_layers * num_dirs + 2
    vmem = pl.BlockSpec(memory_space=pltpu.MemorySpace.VMEM)

    scratch_shapes = [pltpu.VMEM((T * B_p, num_dirs * H_p), jnp.float32)]  # u
    if num_layers > 1:
        scratch_shapes.append(
            pltpu.VMEM((T * B_p, num_dirs * H_p), jnp.float32))           # seq

    # Size the scoped VMEM limit from the actual buffers (v5e default is 16 MiB).
    def _nbytes(a):
        return int(a.size) * a.dtype.itemsize
    total_bytes = (_nbytes(x) + sum(_nbytes(w) for w in rnn_flat)
                   + _nbytes(packed["w_fc_t"]) + _nbytes(packed["b_fc"])
                   + B_p * O_p * 4
                   + len(scratch_shapes) * (T * B_p) * (num_dirs * H_p) * 4)
    vmem_limit = int(total_bytes * 2) + (4 << 20)

    out = pl.pallas_call(
        kernel,
        out_shape=jax.ShapeDtypeStruct((B_p, O_p), jnp.float32),
        in_specs=[vmem] * n_in,
        out_specs=vmem,
        scratch_shapes=scratch_shapes,
        compiler_params=pltpu.CompilerParams(vmem_limit_bytes=vmem_limit),
    )(x, *rnn_flat, packed["w_fc_t"], packed["b_fc"])

    return out[:B, :output_size]


# ----------------------------------------------------------------------------
if __name__ == "__main__":
    VOCAB_SIZE = 50
    EMBEDDING_DIM = 32
    HIDDEN_DIM = 32
    NUM_LAYERS = 2
    IS_BIDIRECTIONAL = True
    OUTPUT_SIZE = 1
    BATCH = 2
    SEQ_LEN = 8

    key = jax.random.PRNGKey(0)
    pkey, dkey = jax.random.split(key)
    params = init_params(pkey, VOCAB_SIZE, EMBEDDING_DIM, HIDDEN_DIM,
                         NUM_LAYERS, IS_BIDIRECTIONAL, OUTPUT_SIZE)
    packed = pack_params(params, HIDDEN_DIM, IS_BIDIRECTIONAL, OUTPUT_SIZE)

    tokens = jax.random.randint(dkey, (BATCH, SEQ_LEN), 0, VOCAB_SIZE,
                                dtype=jnp.int32)

    fwd = jax.jit(functools.partial(sentiment_rnn_forward,
                                    is_bidirectional=IS_BIDIRECTIONAL,
                                    output_size=OUTPUT_SIZE))
    out = fwd(tokens, packed)
    jax.block_until_ready(out)

    assert out.shape == (BATCH, OUTPUT_SIZE), out.shape
    assert out.dtype == jnp.float32
    print("KERNEL_OK")
</pallas_src>

<mosaic_0001>
module attributes {stable_mosaic.version = 11 : i64} {
  func.func @kernel(%arg0: memref<64x32xf32, #tpu.memory_space<vmem>>, %arg1: memref<32x128xf32, #tpu.memory_space<vmem>>, %arg2: memref<128x128xf32, #tpu.memory_space<vmem>>, %arg3: memref<1x128xf32, #tpu.memory_space<vmem>>, %arg4: memref<32x128xf32, #tpu.memory_space<vmem>>, %arg5: memref<128x128xf32, #tpu.memory_space<vmem>>, %arg6: memref<1x128xf32, #tpu.memory_space<vmem>>, %arg7: memref<256x128xf32, #tpu.memory_space<vmem>>, %arg8: memref<128x128xf32, #tpu.memory_space<vmem>>, %arg9: memref<1x128xf32, #tpu.memory_space<vmem>>, %arg10: memref<256x128xf32, #tpu.memory_space<vmem>>, %arg11: memref<128x128xf32, #tpu.memory_space<vmem>>, %arg12: memref<1x128xf32, #tpu.memory_space<vmem>>, %arg13: memref<256x128xf32, #tpu.memory_space<vmem>>, %arg14: memref<1x128xf32, #tpu.memory_space<vmem>>, %arg15: memref<8x128xf32, #tpu.memory_space<vmem>>, %arg16: memref<64x256xf32, #tpu.memory_space<vmem>>, %arg17: memref<64x256xf32, #tpu.memory_space<vmem>>) attributes {dimension_semantics = [], scalar_prefetch = 0 : i64, scratch_operands = 2 : i64, tpu.core_type = #tpu.core_type<tc>} {
    %c0 = arith.constant 0 : index
    %c0_0 = arith.constant 0 : index
    %0 = vector.load %arg0[%c0, %c0_0] : memref<64x32xf32, #tpu.memory_space<vmem>>, vector<64x32xf32>
    %c0_1 = arith.constant 0 : index
    %c0_2 = arith.constant 0 : index
    %1 = vector.load %arg1[%c0_1, %c0_2] : memref<32x128xf32, #tpu.memory_space<vmem>>, vector<32x128xf32>
    %cst = arith.constant dense<0.000000e+00> : vector<64x128xf32>
    %2 = tpu.matmul %0, %1, %cst {dimension_numbers = #tpu.dot_dimension_numbers<[1], [0], [0], [1], [0, 0, 1, 1], [], []>} : vector<64x32xf32>, vector<32x128xf32>, vector<64x128xf32> -> vector<64x128xf32>
    %c0_3 = arith.constant 0 : index
    %c0_4 = arith.constant 0 : index
    %3 = vector.load %arg3[%c0_3, %c0_4] : memref<1x128xf32, #tpu.memory_space<vmem>>, vector<1x128xf32>
    %4 = vector.broadcast %3 : vector<1x128xf32> to vector<64x128xf32>
    %5 = arith.addf %2, %4 : vector<64x128xf32>
    %c0_5 = arith.constant 0 : index
    %c0_6 = arith.constant 0 : index
    %6 = vector.load %arg16[%c0_5, %c0_6] : memref<64x256xf32, #tpu.memory_space<vmem>>, vector<64x128xf32>
    tpu.vector_store %arg16[%c0_5, %c0_6], %5 {strides = array<i32>} : memref<64x256xf32, #tpu.memory_space<vmem>>, vector<64x128xf32>,
    %c0_7 = arith.constant 0 : index
    %c0_8 = arith.constant 0 : index
    %7 = vector.load %arg0[%c0_7, %c0_8] : memref<64x32xf32, #tpu.memory_space<vmem>>, vector<64x32xf32>
    %c0_9 = arith.constant 0 : index
    %c0_10 = arith.constant 0 : index
    %8 = vector.load %arg4[%c0_9, %c0_10] : memref<32x128xf32, #tpu.memory_space<vmem>>, vector<32x128xf32>
    %cst_11 = arith.constant dense<0.000000e+00> : vector<64x128xf32>
    %9 = tpu.matmul %7, %8, %cst_11 {dimension_numbers = #tpu.dot_dimension_numbers<[1], [0], [0], [1], [0, 0, 1, 1], [], []>} : vector<64x32xf32>, vector<32x128xf32>, vector<64x128xf32> -> vector<64x128xf32>
    %c0_12 = arith.constant 0 : index
    %c0_13 = arith.constant 0 : index
    %10 = vector.load %arg6[%c0_12, %c0_13] : memref<1x128xf32, #tpu.memory_space<vmem>>, vector<1x128xf32>
    %11 = vector.broadcast %10 : vector<1x128xf32> to vector<64x128xf32>
    %12 = arith.addf %9, %11 : vector<64x128xf32>
    %c0_14 = arith.constant 0 : index
    %c128 = arith.constant 128 : index
    %13 = vector.load %arg16[%c0_14, %c128] : memref<64x256xf32, #tpu.memory_space<vmem>>, vector<64x128xf32>
    tpu.vector_store %arg16[%c0_14, %c128], %12 {strides = array<i32>} : memref<64x256xf32, #tpu.memory_space<vmem>>, vector<64x128xf32>,
    %cst_15 = arith.constant 0.000000e+00 : f32
    %14 = vector.broadcast %cst_15 : f32 to vector<8x128xf32>
    %cst_16 = arith.constant 0.000000e+00 : f32
    %15 = vector.broadcast %cst_16 : f32 to vector<8x128xf32>
    %c0_17 = arith.constant 0 : index
    %c0_18 = arith.constant 0 : index
    %16 = vector.load %arg16[%c0_17, %c0_18] : memref<64x256xf32, #tpu.memory_space<vmem>>, vector<8x128xf32>
    %c0_19 = arith.constant 0 : index
    %c0_20 = arith.constant 0 : index
    %17 = vector.load %arg2[%c0_19, %c0_20] : memref<128x128xf32, #tpu.memory_space<vmem>>, vector<128x128xf32>
    %cst_21 = arith.constant dense<0.000000e+00> : vector<8x128xf32>
    %18 = tpu.matmul %14, %17, %cst_21 {dimension_numbers = #tpu.dot_dimension_numbers<[1], [0], [0], [1], [0, 0, 1, 1], [], []>} : vector<8x128xf32>, vector<128x128xf32>, vector<8x128xf32> -> vector<8x128xf32>
    %19 = arith.addf %16, %18 : vector<8x128xf32>
    %20 = math.tanh %19 : vector<8x128xf32>
    %c56 = arith.constant 56 : index
    %c128_22 = arith.constant 128 : index
    %21 = vector.load %arg16[%c56, %c128_22] : memref<64x256xf32, #tpu.memory_space<vmem>>, vector<8x128xf32>
    %c0_23 = arith.constant 0 : index
    %c0_24 = arith.constant 0 : index
    %22 = vector.load %arg5[%c0_23, %c0_24] : memref<128x128xf32, #tpu.memory_space<vmem>>, vector<128x128xf32>
    %cst_25 = arith.constant dense<0.000000e+00> : vector<8x128xf32>
    %23 = tpu.matmul %15, %22, %cst_25 {dimension_numbers = #tpu.dot_dimension_numbers<[1], [0], [0], [1], [0, 0, 1, 1], [], []>} : vector<8x128xf32>, vector<128x128xf32>, vector<8x128xf32> -> vector<8x128xf32>
    %24 = arith.addf %21, %23 : vector<8x128xf32>
    %25 = math.tanh %24 : vector<8x128xf32>
    %c0_26 = arith.constant 0 : index
    %c0_27 = arith.constant 0 : index
    %26 = vector.load %arg17[%c0_26, %c0_27] : memref<64x256xf32, #tpu.memory_space<vmem>>, vector<8x128xf32>
    tpu.vector_store %arg17[%c0_26, %c0_27], %20 {strides = array<i32>} : memref<64x256xf32, #tpu.memory_space<vmem>>, vector<8x128xf32>,
    %c56_28 = arith.constant 56 : index
    %c128_29 = arith.constant 128 : index
    %27 = vector.load %arg17[%c56_28, %c128_29] : memref<64x256xf32, #tpu.memory_space<vmem>>, vector<8x128xf32>
    tpu.vector_store %arg17[%c56_28, %c128_29], %25 {strides = array<i32>} : memref<64x256xf32, #tpu.memory_space<vmem>>, vector<8x128xf32>,
    %c8 = arith.constant 8 : index
    %c0_30 = arith.constant 0 : index
    %28 = vector.load %arg16[%c8, %c0_30] : memref<64x256xf32, #tpu.memory_space<vmem>>, vector<8x128xf32>
    %c0_31 = arith.constant 0 : index
    %c0_32 = arith.constant 0 : index
    %29 = vector.load %arg2[%c0_31, %c0_32] : memref<128x128xf32, #tpu.memory_space<vmem>>, vector<128x128xf32>
    %cst_33 = arith.constant dense<0.000000e+00> : vector<8x128xf32>
    %30 = tpu.matmul %20, %29, %cst_33 {dimension_numbers = #tpu.dot_dimension_numbers<[1], [0], [0], [1], [0, 0, 1, 1], [], []>} : vector<8x128xf32>, vector<128x128xf32>, vector<8x128xf32> -> vector<8x128xf32>
    %31 = arith.addf %28, %30 : vector<8x128xf32>
    %32 = math.tanh %31 : vector<8x128xf32>
    %c48 = arith.constant 48 : index
    %c128_34 = arith.constant 128 : index
    %33 = vector.load %arg16[%c48, %c128_34] : memref<64x256xf32, #tpu.memory_space<vmem>>, vector<8x128xf32>
    %c0_35 = arith.constant 0 : index
    %c0_36 = arith.constant 0 : index
    %34 = vector.load %arg5[%c0_35, %c0_36] : memref<128x128xf32, #tpu.memory_space<vmem>>, vector<128x128xf32>
    %cst_37 = arith.constant dense<0.000000e+00> : vector<8x128xf32>
    %35 = tpu.matmul %25, %34, %cst_37 {dimension_numbers = #tpu.dot_dimension_numbers<[1], [0], [0], [1], [0, 0, 1, 1], [], []>} : vector<8x128xf32>, vector<128x128xf32>, vector<8x128xf32> -> vector<8x128xf32>
    %36 = arith.addf %33, %35 : vector<8x128xf32>
    %37 = math.tanh %36 : vector<8x128xf32>
    %c8_38 = arith.constant 8 : index
    %c0_39 = arith.constant 0 : index
    %38 = vector.load %arg17[%c8_38, %c0_39] : memref<64x256xf32, #tpu.memory_space<vmem>>, vector<8x128xf32>
    tpu.vector_store %arg17[%c8_38, %c0_39], %32 {strides = array<i32>} : memref<64x256xf32, #tpu.memory_space<vmem>>, vector<8x128xf32>,
    %c48_40 = arith.constant 48 : index
    %c128_41 = arith.constant 128 : index
    %39 = vector.load %arg17[%c48_40, %c128_41] : memref<64x256xf32, #tpu.memory_space<vmem>>, vector<8x128xf32>
    tpu.vector_store %arg17[%c48_40, %c128_41], %37 {strides = array<i32>} : memref<64x256xf32, #tpu.memory_space<vmem>>, vector<8x128xf32>,
    %c16 = arith.constant 16 : index
    %c0_42 = arith.constant 0 : index
    %40 = vector.load %arg16[%c16, %c0_42] : memref<64x256xf32, #tpu.memory_space<vmem>>, vector<8x128xf32>
    %c0_43 = arith.constant 0 : index
    %c0_44 = arith.constant 0 : index
    %41 = vector.load %arg2[%c0_43, %c0_44] : memref<128x128xf32, #tpu.memory_space<vmem>>, vector<128x128xf32>
    %cst_45 = arith.constant dense<0.000000e+00> : vector<8x128xf32>
    %42 = tpu.matmul %32, %41, %cst_45 {dimension_numbers = #tpu.dot_dimension_numbers<[1], [0], [0], [1], [0, 0, 1, 1], [], []>} : vector<8x128xf32>, vector<128x128xf32>, vector<8x128xf32> -> vector<8x128xf32>
    %43 = arith.addf %40, %42 : vector<8x128xf32>
    %44 = math.tanh %43 : vector<8x128xf32>
    %c40 = arith.constant 40 : index
    %c128_46 = arith.constant 128 : index
    %45 = vector.load %arg16[%c40, %c128_46] : memref<64x256xf32, #tpu.memory_space<vmem>>, vector<8x128xf32>
    %c0_47 = arith.constant 0 : index
    %c0_48 = arith.constant 0 : index
    %46 = vector.load %arg5[%c0_47, %c0_48] : memref<128x128xf32, #tpu.memory_space<vmem>>, vector<128x128xf32>
    %cst_49 = arith.constant dense<0.000000e+00> : vector<8x128xf32>
    %47 = tpu.matmul %37, %46, %cst_49 {dimension_numbers = #tpu.dot_dimension_numbers<[1], [0], [0], [1], [0, 0, 1, 1], [], []>} : vector<8x128xf32>, vector<128x128xf32>, vector<8x128xf32> -> vector<8x128xf32>
    %48 = arith.addf %45, %47 : vector<8x128xf32>
    %49 = math.tanh %48 : vector<8x128xf32>
    %c16_50 = arith.constant 16 : index
    %c0_51 = arith.constant 0 : index
    %50 = vector.load %arg17[%c16_50, %c0_51] : memref<64x256xf32, #tpu.memory_space<vmem>>, vector<8x128xf32>
    tpu.vector_store %arg17[%c16_50, %c0_51], %44 {strides = array<i32>} : memref<64x256xf32, #tpu.memory_space<vmem>>, vector<8x128xf32>,
    %c40_52 = arith.constant 40 : index
    %c128_53 = arith.constant 128 : index
    %51 = vector.load %arg17[%c40_52, %c128_53] : memref<64x256xf32, #tpu.memory_space<vmem>>, vector<8x128xf32>
    tpu.vector_store %arg17[%c40_52, %c128_53], %49 {strides = array<i32>} : memref<64x256xf32, #tpu.memory_space<vmem>>, vector<8x128xf32>,
    %c24 = arith.constant 24 : index
    %c0_54 = arith.constant 0 : index
    %52 = vector.load %arg16[%c24, %c0_54] : memref<64x256xf32, #tpu.memory_space<vmem>>, vector<8x128xf32>
    %c0_55 = arith.constant 0 : index
    %c0_56 = arith.constant 0 : index
    %53 = vector.load %arg2[%c0_55, %c0_56] : memref<128x128xf32, #tpu.memory_space<vmem>>, vector<128x128xf32>
    %cst_57 = arith.constant dense<0.000000e+00> : vector<8x128xf32>
    %54 = tpu.matmul %44, %53, %cst_57 {dimension_numbers = #tpu.dot_dimension_numbers<[1], [0], [0], [1], [0, 0, 1, 1], [], []>} : vector<8x128xf32>, vector<128x128xf32>, vector<8x128xf32> -> vector<8x128xf32>
    %55 = arith.addf %52, %54 : vector<8x128xf32>
    %56 = math.tanh %55 : vector<8x128xf32>
    %c32 = arith.constant 32 : index
    %c128_58 = arith.constant 128 : index
    %57 = vector.load %arg16[%c32, %c128_58] : memref<64x256xf32, #tpu.memory_space<vmem>>, vector<8x128xf32>
    %c0_59 = arith.constant 0 : index
    %c0_60 = arith.constant 0 : index
    %58 = vector.load %arg5[%c0_59, %c0_60] : memref<128x128xf32, #tpu.memory_space<vmem>>, vector<128x128xf32>
    %cst_61 = arith.constant dense<0.000000e+00> : vector<8x128xf32>
    %59 = tpu.matmul %49, %58, %cst_61 {dimension_numbers = #tpu.dot_dimension_numbers<[1], [0], [0], [1], [0, 0, 1, 1], [], []>} : vector<8x128xf32>, vector<128x128xf32>, vector<8x128xf32> -> vector<8x128xf32>
    %60 = arith.addf %57, %59 : vector<8x128xf32>
    %61 = math.tanh %60 : vector<8x128xf32>
    %c24_62 = arith.constant 24 : index
    %c0_63 = arith.constant 0 : index
    %62 = vector.load %arg17[%c24_62, %c0_63] : memref<64x256xf32, #tpu.memory_space<vmem>>, vector<8x128xf32>
    tpu.vector_store %arg17[%c24_62, %c0_63], %56 {strides = array<i32>} : memref<64x256xf32, #tpu.memory_space<vmem>>, vector<8x128xf32>,
    %c32_64 = arith.constant 32 : index
    %c128_65 = arith.constant 128 : index
    %63 = vector.load %arg17[%c32_64, %c128_65] : memref<64x256xf32, #tpu.memory_space<vmem>>, vector<8x128xf32>
    tpu.vector_store %arg17[%c32_64, %c128_65], %61 {strides = array<i32>} : memref<64x256xf32, #tpu.memory_space<vmem>>, vector<8x128xf32>,
    %c32_66 = arith.constant 32 : index
    %c0_67 = arith.constant 0 : index
    %64 = vector.load %arg16[%c32_66, %c0_67] : memref<64x256xf32, #tpu.memory_space<vmem>>, vector<8x128xf32>
    %c0_68 = arith.constant 0 : index
    %c0_69 = arith.constant 0 : index
    %65 = vector.load %arg2[%c0_68, %c0_69] : memref<128x128xf32, #tpu.memory_space<vmem>>, vector<128x128xf32>
    %cst_70 = arith.constant dense<0.000000e+00> : vector<8x128xf32>
    %66 = tpu.matmul %56, %65, %cst_70 {dimension_numbers = #tpu.dot_dimension_numbers<[1], [0], [0], [1], [0, 0, 1, 1], [], []>} : vector<8x128xf32>, vector<128x128xf32>, vector<8x128xf32> -> vector<8x128xf32>
    %67 = arith.addf %64, %66 : vector<8x128xf32>
    %68 = math.tanh %67 : vector<8x128xf32>
    %c24_71 = arith.constant 24 : index
    %c128_72 = arith.constant 128 : index
    %69 = vector.load %arg16[%c24_71, %c128_72] : memref<64x256xf32, #tpu.memory_space<vmem>>, vector<8x128xf32>
    %c0_73 = arith.constant 0 : index
    %c0_74 = arith.constant 0 : index
    %70 = vector.load %arg5[%c0_73, %c0_74] : memref<128x128xf32, #tpu.memory_space<vmem>>, vector<128x128xf32>
    %cst_75 = arith.constant dense<0.000000e+00> : vector<8x128xf32>
    %71 = tpu.matmul %61, %70, %cst_75 {dimension_numbers = #tpu.dot_dimension_numbers<[1], [0], [0], [1], [0, 0, 1, 1], [], []>} : vector<8x128xf32>, vector<128x128xf32>, vector<8x128xf32> -> vector<8x128xf32>
    %72 = arith.addf %69, %71 : vector<8x128xf32>
    %73 = math.tanh %72 : vector<8x128xf32>
    %c32_76 = arith.constant 32 : index
    %c0_77 = arith.constant 0 : index
    %74 = vector.load %arg17[%c32_76, %c0_77] : memref<64x256xf32, #tpu.memory_space<vmem>>, vector<8x128xf32>
    tpu.vector_store %arg17[%c32_76, %c0_77], %68 {strides = array<i32>} : memref<64x256xf32, #tpu.memory_space<vmem>>, vector<8x128xf32>,
    %c24_78 = arith.constant 24 : index
    %c128_79 = arith.constant 128 : index
    %75 = vector.load %arg17[%c24_78, %c128_79] : memref<64x256xf32, #tpu.memory_space<vmem>>, vector<8x128xf32>
    tpu.vector_store %arg17[%c24_78, %c128_79], %73 {strides = array<i32>} : memref<64x256xf32, #tpu.memory_space<vmem>>, vector<8x128xf32>,
    %c40_80 = arith.constant 40 : index
    %c0_81 = arith.constant 0 : index
    %76 = vector.load %arg16[%c40_80, %c0_81] : memref<64x256xf32, #tpu.memory_space<vmem>>, vector<8x128xf32>
    %c0_82 = arith.constant 0 : index
    %c0_83 = arith.constant 0 : index
    %77 = vector.load %arg2[%c0_82, %c0_83] : memref<128x128xf32, #tpu.memory_space<vmem>>, vector<128x128xf32>
    %cst_84 = arith.constant dense<0.000000e+00> : vector<8x128xf32>
    %78 = tpu.matmul %68, %77, %cst_84 {dimension_numbers = #tpu.dot_dimension_numbers<[1], [0], [0], [1], [0, 0, 1, 1], [], []>} : vector<8x128xf32>, vector<128x128xf32>, vector<8x128xf32> -> vector<8x128xf32>
    %79 = arith.addf %76, %78 : vector<8x128xf32>
    %80 = math.tanh %79 : vector<8x128xf32>
    %c16_85 = arith.constant 16 : index
    %c128_86 = arith.constant 128 : index
    %81 = vector.load %arg16[%c16_85, %c128_86] : memref<64x256xf32, #tpu.memory_space<vmem>>, vector<8x128xf32>
    %c0_87 = arith.constant 0 : index
    %c0_88 = arith.constant 0 : index
    %82 = vector.load %arg5[%c0_87, %c0_88] : memref<128x128xf32, #tpu.memory_space<vmem>>, vector<128x128xf32>
    %cst_89 = arith.constant dense<0.000000e+00> : vector<8x128xf32>
    %83 = tpu.matmul %73, %82, %cst_89 {dimension_numbers = #tpu.dot_dimension_numbers<[1], [0], [0], [1], [0, 0, 1, 1], [], []>} : vector<8x128xf32>, vector<128x128xf32>, vector<8x128xf32> -> vector<8x128xf32>
    %84 = arith.addf %81, %83 : vector<8x128xf32>
    %85 = math.tanh %84 : vector<8x128xf32>
    %c40_90 = arith.constant 40 : index
    %c0_91 = arith.constant 0 : index
    %86 = vector.load %arg17[%c40_90, %c0_91] : memref<64x256xf32, #tpu.memory_space<vmem>>, vector<8x128xf32>
    tpu.vector_store %arg17[%c40_90, %c0_91], %80 {strides = array<i32>} : memref<64x256xf32, #tpu.memory_space<vmem>>, vector<8x128xf32>,
    %c16_92 = arith.constant 16 : index
    %c128_93 = arith.constant 128 : index
    %87 = vector.load %arg17[%c16_92, %c128_93] : memref<64x256xf32, #tpu.memory_space<vmem>>, vector<8x128xf32>
    tpu.vector_store %arg17[%c16_92, %c128_93], %85 {strides = array<i32>} : memref<64x256xf32, #tpu.memory_space<vmem>>, vector<8x128xf32>,
    %c48_94 = arith.constant 48 : index
    %c0_95 = arith.constant 0 : index
    %88 = vector.load %arg16[%c48_94, %c0_95] : memref<64x256xf32, #tpu.memory_space<vmem>>, vector<8x128xf32>
    %c0_96 = arith.constant 0 : index
    %c0_97 = arith.constant 0 : index
    %89 = vector.load %arg2[%c0_96, %c0_97] : memref<128x128xf32, #tpu.memory_space<vmem>>, vector<128x128xf32>
    %cst_98 = arith.constant dense<0.000000e+00> : vector<8x128xf32>
    %90 = tpu.matmul %80, %89, %cst_98 {dimension_numbers = #tpu.dot_dimension_numbers<[1], [0], [0], [1], [0, 0, 1, 1], [], []>} : vector<8x128xf32>, vector<128x128xf32>, vector<8x128xf32> -> vector<8x128xf32>
    %91 = arith.addf %88, %90 : vector<8x128xf32>
    %92 = math.tanh %91 : vector<8x128xf32>
    %c8_99 = arith.constant 8 : index
    %c128_100 = arith.constant 128 : index
    %93 = vector.load %arg16[%c8_99, %c128_100] : memref<64x256xf32, #tpu.memory_space<vmem>>, vector<8x128xf32>
    %c0_101 = arith.constant 0 : index
    %c0_102 = arith.constant 0 : index
    %94 = vector.load %arg5[%c0_101, %c0_102] : memref<128x128xf32, #tpu.memory_space<vmem>>, vector<128x128xf32>
    %cst_103 = arith.constant dense<0.000000e+00> : vector<8x128xf32>
    %95 = tpu.matmul %85, %94, %cst_103 {dimension_numbers = #tpu.dot_dimension_numbers<[1], [0], [0], [1], [0, 0, 1, 1], [], []>} : vector<8x128xf32>, vector<128x128xf32>, vector<8x128xf32> -> vector<8x128xf32>
    %96 = arith.addf %93, %95 : vector<8x128xf32>
    %97 = math.tanh %96 : vector<8x128xf32>
    %c48_104 = arith.constant 48 : index
    %c0_105 = arith.constant 0 : index
    %98 = vector.load %arg17[%c48_104, %c0_105] : memref<64x256xf32, #tpu.memory_space<vmem>>, vector<8x128xf32>
    tpu.vector_store %arg17[%c48_104, %c0_105], %92 {strides = array<i32>} : memref<64x256xf32, #tpu.memory_space<vmem>>, vector<8x128xf32>,
    %c8_106 = arith.constant 8 : index
    %c128_107 = arith.constant 128 : index
    %99 = vector.load %arg17[%c8_106, %c128_107] : memref<64x256xf32, #tpu.memory_space<vmem>>, vector<8x128xf32>
    tpu.vector_store %arg17[%c8_106, %c128_107], %97 {strides = array<i32>} : memref<64x256xf32, #tpu.memory_space<vmem>>, vector<8x128xf32>,
    %c56_108 = arith.constant 56 : index
    %c0_109 = arith.constant 0 : index
    %100 = vector.load %arg16[%c56_108, %c0_109] : memref<64x256xf32, #tpu.memory_space<vmem>>, vector<8x128xf32>
    %c0_110 = arith.constant 0 : index
    %c0_111 = arith.constant 0 : index
    %101 = vector.load %arg2[%c0_110, %c0_111] : memref<128x128xf32, #tpu.memory_space<vmem>>, vector<128x128xf32>
    %cst_112 = arith.constant dense<0.000000e+00> : vector<8x128xf32>
    %102 = tpu.matmul %92, %101, %cst_112 {dimension_numbers = #tpu.dot_dimension_numbers<[1], [0], [0], [1], [0, 0, 1, 1], [], []>} : vector<8x128xf32>, vector<128x128xf32>, vector<8x128xf32> -> vector<8x128xf32>
    %103 = arith.addf %100, %102 : vector<8x128xf32>
    %104 = math.tanh %103 : vector<8x128xf32>
    %c0_113 = arith.constant 0 : index
    %c128_114 = arith.constant 128 : index
    %105 = vector.load %arg16[%c0_113, %c128_114] : memref<64x256xf32, #tpu.memory_space<vmem>>, vector<8x128xf32>
    %c0_115 = arith.constant 0 : index
    %c0_116 = arith.constant 0 : index
    %106 = vector.load %arg5[%c0_115, %c0_116] : memref<128x128xf32, #tpu.memory_space<vmem>>, vector<128x128xf32>
    %cst_117 = arith.constant dense<0.000000e+00> : vector<8x128xf32>
    %107 = tpu.matmul %97, %106, %cst_117 {dimension_numbers = #tpu.dot_dimension_numbers<[1], [0], [0], [1], [0, 0, 1, 1], [], []>} : vector<8x128xf32>, vector<128x128xf32>, vector<8x128xf32> -> vector<8x128xf32>
    %108 = arith.addf %105, %107 : vector<8x128xf32>
    %109 = math.tanh %108 : vector<8x128xf32>
    %c56_118 = arith.constant 56 : index
    %c0_119 = arith.constant 0 : index
    %110 = vector.load %arg17[%c56_118, %c0_119] : memref<64x256xf32, #tpu.memory_space<vmem>>, vector<8x128xf32>
    tpu.vector_store %arg17[%c56_118, %c0_119], %104 {strides = array<i32>} : memref<64x256xf32, #tpu.memory_space<vmem>>, vector<8x128xf32>,
    %c0_120 = arith.constant 0 : index
    %c128_121 = arith.constant 128 : index
    %111 = vector.load %arg17[%c0_120, %c128_121] : memref<64x256xf32, #tpu.memory_space<vmem>>, vector<8x128xf32>
    tpu.vector_store %arg17[%c0_120, %c128_121], %109 {strides = array<i32>} : memref<64x256xf32, #tpu.memory_space<vmem>>, vector<8x128xf32>,
    %c0_122 = arith.constant 0 : index
    %c0_123 = arith.constant 0 : index
    %112 = vector.load %arg17[%c0_122, %c0_123] : memref<64x256xf32, #tpu.memory_space<vmem>>, vector<64x256xf32>
    %c0_124 = arith.constant 0 : index
    %c0_125 = arith.constant 0 : index
    %113 = vector.load %arg7[%c0_124, %c0_125] : memref<256x128xf32, #tpu.memory_space<vmem>>, vector<256x128xf32>
    %cst_126 = arith.constant dense<0.000000e+00> : vector<64x128xf32>
    %114 = tpu.matmul %112, %113, %cst_126 {dimension_numbers = #tpu.dot_dimension_numbers<[1], [0], [0], [1], [0, 0, 1, 1], [], []>} : vector<64x256xf32>, vector<256x128xf32>, vector<64x128xf32> -> vector<64x128xf32>
    %c0_127 = arith.constant 0 : index
    %c0_128 = arith.constant 0 : index
    %115 = vector.load %arg9[%c0_127, %c0_128] : memref<1x128xf32, #tpu.memory_space<vmem>>, vector<1x128xf32>
    %116 = vector.broadcast %115 : vector<1x128xf32> to vector<64x128xf32>
    %117 = arith.addf %114, %116 : vector<64x128xf32>
    %c0_129 = arith.constant 0 : index
    %c0_130 = arith.constant 0 : index
    %118 = vector.load %arg16[%c0_129, %c0_130] : memref<64x256xf32, #tpu.memory_space<vmem>>, vector<64x128xf32>
    tpu.vector_store %arg16[%c0_129, %c0_130], %117 {strides = array<i32>} : memref<64x256xf32, #tpu.memory_space<vmem>>, vector<64x128xf32>,
    %c0_131 = arith.constant 0 : index
    %c0_132 = arith.constant 0 : index
    %119 = vector.load %arg17[%c0_131, %c0_132] : memref<64x256xf32, #tpu.memory_space<vmem>>, vector<64x256xf32>
    %c0_133 = arith.constant 0 : index
    %c0_134 = arith.constant 0 : index
    %120 = vector.load %arg10[%c0_133, %c0_134] : memref<256x128xf32, #tpu.memory_space<vmem>>, vector<256x128xf32>
    %cst_135 = arith.constant dense<0.000000e+00> : vector<64x128xf32>
    %121 = tpu.matmul %119, %120, %cst_135 {dimension_numbers = #tpu.dot_dimension_numbers<[1], [0], [0], [1], [0, 0, 1, 1], [], []>} : vector<64x256xf32>, vector<256x128xf32>, vector<64x128xf32> -> vector<64x128xf32>
    %c0_136 = arith.constant 0 : index
    %c0_137 = arith.constant 0 : index
    %122 = vector.load %arg12[%c0_136, %c0_137] : memref<1x128xf32, #tpu.memory_space<vmem>>, vector<1x128xf32>
    %123 = vector.broadcast %122 : vector<1x128xf32> to vector<64x128xf32>
    %124 = arith.addf %121, %123 : vector<64x128xf32>
    %c0_138 = arith.constant 0 : index
    %c128_139 = arith.constant 128 : index
    %125 = vector.load %arg16[%c0_138, %c128_139] : memref<64x256xf32, #tpu.memory_space<vmem>>, vector<64x128xf32>
    tpu.vector_store %arg16[%c0_138, %c128_139], %124 {strides = array<i32>} : memref<64x256xf32, #tpu.memory_space<vmem>>, vector<64x128xf32>,
    %cst_140 = arith.constant 0.000000e+00 : f32
    %126 = vector.broadcast %cst_140 : f32 to vector<8x128xf32>
    %cst_141 = arith.constant 0.000000e+00 : f32
    %127 = vector.broadcast %cst_141 : f32 to vector<8x128xf32>
    %c0_142 = arith.constant 0 : index
    %c0_143 = arith.constant 0 : index
    %128 = vector.load %arg16[%c0_142, %c0_143] : memref<64x256xf32, #tpu.memory_space<vmem>>, vector<8x128xf32>
    %c0_144 = arith.constant 0 : index
    %c0_145 = arith.constant 0 : index
    %129 = vector.load %arg8[%c0_144, %c0_145] : memref<128x128xf32, #tpu.memory_space<vmem>>, vector<128x128xf32>
    %cst_146 = arith.constant dense<0.000000e+00> : vector<8x128xf32>
    %130 = tpu.matmul %126, %129, %cst_146 {dimension_numbers = #tpu.dot_dimension_numbers<[1], [0], [0], [1], [0, 0, 1, 1], [], []>} : vector<8x128xf32>, vector<128x128xf32>, vector<8x128xf32> -> vector<8x128xf32>
    %131 = arith.addf %128, %130 : vector<8x128xf32>
    %132 = math.tanh %131 : vector<8x128xf32>
    %c56_147 = arith.constant 56 : index
    %c128_148 = arith.constant 128 : index
    %133 = vector.load %arg16[%c56_147, %c128_148] : memref<64x256xf32, #tpu.memory_space<vmem>>, vector<8x128xf32>
    %c0_149 = arith.constant 0 : index
    %c0_150 = arith.constant 0 : index
    %134 = vector.load %arg11[%c0_149, %c0_150] : memref<128x128xf32, #tpu.memory_space<vmem>>, vector<128x128xf32>
    %cst_151 = arith.constant dense<0.000000e+00> : vector<8x128xf32>
    %135 = tpu.matmul %127, %134, %cst_151 {dimension_numbers = #tpu.dot_dimension_numbers<[1], [0], [0], [1], [0, 0, 1, 1], [], []>} : vector<8x128xf32>, vector<128x128xf32>, vector<8x128xf32> -> vector<8x128xf32>
    %136 = arith.addf %133, %135 : vector<8x128xf32>
    %137 = math.tanh %136 : vector<8x128xf32>
    %c8_152 = arith.constant 8 : index
    %c0_153 = arith.constant 0 : index
    %138 = vector.load %arg16[%c8_152, %c0_153] : memref<64x256xf32, #tpu.memory_space<vmem>>, vector<8x128xf32>
    %c0_154 = arith.constant 0 : index
    %c0_155 = arith.constant 0 : index
    %139 = vector.load %arg8[%c0_154, %c0_155] : memref<128x128xf32, #tpu.memory_space<vmem>>, vector<128x128xf32>
    %cst_156 = arith.constant dense<0.000000e+00> : vector<8x128xf32>
    %140 = tpu.matmul %132, %139, %cst_156 {dimension_numbers = #tpu.dot_dimension_numbers<[1], [0], [0], [1], [0, 0, 1, 1], [], []>} : vector<8x128xf32>, vector<128x128xf32>, vector<8x128xf32> -> vector<8x128xf32>
    %141 = arith.addf %138, %140 : vector<8x128xf32>
    %142 = math.tanh %141 : vector<8x128xf32>
    %c48_157 = arith.constant 48 : index
    %c128_158 = arith.constant 128 : index
    %143 = vector.load %arg16[%c48_157, %c128_158] : memref<64x256xf32, #tpu.memory_space<vmem>>, vector<8x128xf32>
    %c0_159 = arith.constant 0 : index
    %c0_160 = arith.constant 0 : index
    %144 = vector.load %arg11[%c0_159, %c0_160] : memref<128x128xf32, #tpu.memory_space<vmem>>, vector<128x128xf32>
    %cst_161 = arith.constant dense<0.000000e+00> : vector<8x128xf32>
    %145 = tpu.matmul %137, %144, %cst_161 {dimension_numbers = #tpu.dot_dimension_numbers<[1], [0], [0], [1], [0, 0, 1, 1], [], []>} : vector<8x128xf32>, vector<128x128xf32>, vector<8x128xf32> -> vector<8x128xf32>
    %146 = arith.addf %143, %145 : vector<8x128xf32>
    %147 = math.tanh %146 : vector<8x128xf32>
    %c16_162 = arith.constant 16 : index
    %c0_163 = arith.constant 0 : index
    %148 = vector.load %arg16[%c16_162, %c0_163] : memref<64x256xf32, #tpu.memory_space<vmem>>, vector<8x128xf32>
    %c0_164 = arith.constant 0 : index
    %c0_165 = arith.constant 0 : index
    %149 = vector.load %arg8[%c0_164, %c0_165] : memref<128x128xf32, #tpu.memory_space<vmem>>, vector<128x128xf32>
    %cst_166 = arith.constant dense<0.000000e+00> : vector<8x128xf32>
    %150 = tpu.matmul %142, %149, %cst_166 {dimension_numbers = #tpu.dot_dimension_numbers<[1], [0], [0], [1], [0, 0, 1, 1], [], []>} : vector<8x128xf32>, vector<128x128xf32>, vector<8x128xf32> -> vector<8x128xf32>
    %151 = arith.addf %148, %150 : vector<8x128xf32>
    %152 = math.tanh %151 : vector<8x128xf32>
    %c40_167 = arith.constant 40 : index
    %c128_168 = arith.constant 128 : index
    %153 = vector.load %arg16[%c40_167, %c128_168] : memref<64x256xf32, #tpu.memory_space<vmem>>, vector<8x128xf32>
    %c0_169 = arith.constant 0 : index
    %c0_170 = arith.constant 0 : index
    %154 = vector.load %arg11[%c0_169, %c0_170] : memref<128x128xf32, #tpu.memory_space<vmem>>, vector<128x128xf32>
    %cst_171 = arith.constant dense<0.000000e+00> : vector<8x128xf32>
    %155 = tpu.matmul %147, %154, %cst_171 {dimension_numbers = #tpu.dot_dimension_numbers<[1], [0], [0], [1], [0, 0, 1, 1], [], []>} : vector<8x128xf32>, vector<128x128xf32>, vector<8x128xf32> -> vector<8x128xf32>
    %156 = arith.addf %153, %155 : vector<8x128xf32>
    %157 = math.tanh %156 : vector<8x128xf32>
    %c24_172 = arith.constant 24 : index
    %c0_173 = arith.constant 0 : index
    %158 = vector.load %arg16[%c24_172, %c0_173] : memref<64x256xf32, #tpu.memory_space<vmem>>, vector<8x128xf32>
    %c0_174 = arith.constant 0 : index
    %c0_175 = arith.constant 0 : index
    %159 = vector.load %arg8[%c0_174, %c0_175] : memref<128x128xf32, #tpu.memory_space<vmem>>, vector<128x128xf32>
    %cst_176 = arith.constant dense<0.000000e+00> : vector<8x128xf32>
    %160 = tpu.matmul %152, %159, %cst_176 {dimension_numbers = #tpu.dot_dimension_numbers<[1], [0], [0], [1], [0, 0, 1, 1], [], []>} : vector<8x128xf32>, vector<128x128xf32>, vector<8x128xf32> -> vector<8x128xf32>
    %161 = arith.addf %158, %160 : vector<8x128xf32>
    %162 = math.tanh %161 : vector<8x128xf32>
    %c32_177 = arith.constant 32 : index
    %c128_178 = arith.constant 128 : index
    %163 = vector.load %arg16[%c32_177, %c128_178] : memref<64x256xf32, #tpu.memory_space<vmem>>, vector<8x128xf32>
    %c0_179 = arith.constant 0 : index
    %c0_180 = arith.constant 0 : index
    %164 = vector.load %arg11[%c0_179, %c0_180] : memref<128x128xf32, #tpu.memory_space<vmem>>, vector<128x128xf32>
    %cst_181 = arith.constant dense<0.000000e+00> : vector<8x128xf32>
    %165 = tpu.matmul %157, %164, %cst_181 {dimension_numbers = #tpu.dot_dimension_numbers<[1], [0], [0], [1], [0, 0, 1, 1], [], []>} : vector<8x128xf32>, vector<128x128xf32>, vector<8x128xf32> -> vector<8x128xf32>
    %166 = arith.addf %163, %165 : vector<8x128xf32>
    %167 = math.tanh %166 : vector<8x128xf32>
    %c32_182 = arith.constant 32 : index
    %c0_183 = arith.constant 0 : index
    %168 = vector.load %arg16[%c32_182, %c0_183] : memref<64x256xf32, #tpu.memory_space<vmem>>, vector<8x128xf32>
    %c0_184 = arith.constant 0 : index
    %c0_185 = arith.constant 0 : index
    %169 = vector.load %arg8[%c0_184, %c0_185] : memref<128x128xf32, #tpu.memory_space<vmem>>, vector<128x128xf32>
    %cst_186 = arith.constant dense<0.000000e+00> : vector<8x128xf32>
    %170 = tpu.matmul %162, %169, %cst_186 {dimension_numbers = #tpu.dot_dimension_numbers<[1], [0], [0], [1], [0, 0, 1, 1], [], []>} : vector<8x128xf32>, vector<128x128xf32>, vector<8x128xf32> -> vector<8x128xf32>
    %171 = arith.addf %168, %170 : vector<8x128xf32>
    %172 = math.tanh %171 : vector<8x128xf32>
    %c24_187 = arith.constant 24 : index
    %c128_188 = arith.constant 128 : index
    %173 = vector.load %arg16[%c24_187, %c128_188] : memref<64x256xf32, #tpu.memory_space<vmem>>, vector<8x128xf32>
    %c0_189 = arith.constant 0 : index
    %c0_190 = arith.constant 0 : index
    %174 = vector.load %arg11[%c0_189, %c0_190] : memref<128x128xf32, #tpu.memory_space<vmem>>, vector<128x128xf32>
    %cst_191 = arith.constant dense<0.000000e+00> : vector<8x128xf32>
    %175 = tpu.matmul %167, %174, %cst_191 {dimension_numbers = #tpu.dot_dimension_numbers<[1], [0], [0], [1], [0, 0, 1, 1], [], []>} : vector<8x128xf32>, vector<128x128xf32>, vector<8x128xf32> -> vector<8x128xf32>
    %176 = arith.addf %173, %175 : vector<8x128xf32>
    %177 = math.tanh %176 : vector<8x128xf32>
    %c40_192 = arith.constant 40 : index
    %c0_193 = arith.constant 0 : index
    %178 = vector.load %arg16[%c40_192, %c0_193] : memref<64x256xf32, #tpu.memory_space<vmem>>, vector<8x128xf32>
    %c0_194 = arith.constant 0 : index
    %c0_195 = arith.constant 0 : index
    %179 = vector.load %arg8[%c0_194, %c0_195] : memref<128x128xf32, #tpu.memory_space<vmem>>, vector<128x128xf32>
    %cst_196 = arith.constant dense<0.000000e+00> : vector<8x128xf32>
    %180 = tpu.matmul %172, %179, %cst_196 {dimension_numbers = #tpu.dot_dimension_numbers<[1], [0], [0], [1], [0, 0, 1, 1], [], []>} : vector<8x128xf32>, vector<128x128xf32>, vector<8x128xf32> -> vector<8x128xf32>
    %181 = arith.addf %178, %180 : vector<8x128xf32>
    %182 = math.tanh %181 : vector<8x128xf32>
    %c16_197 = arith.constant 16 : index
    %c128_198 = arith.constant 128 : index
    %183 = vector.load %arg16[%c16_197, %c128_198] : memref<64x256xf32, #tpu.memory_space<vmem>>, vector<8x128xf32>
    %c0_199 = arith.constant 0 : index
    %c0_200 = arith.constant 0 : index
    %184 = vector.load %arg11[%c0_199, %c0_200] : memref<128x128xf32, #tpu.memory_space<vmem>>, vector<128x128xf32>
    %cst_201 = arith.constant dense<0.000000e+00> : vector<8x128xf32>
    %185 = tpu.matmul %177, %184, %cst_201 {dimension_numbers = #tpu.dot_dimension_numbers<[1], [0], [0], [1], [0, 0, 1, 1], [], []>} : vector<8x128xf32>, vector<128x128xf32>, vector<8x128xf32> -> vector<8x128xf32>
    %186 = arith.addf %183, %185 : vector<8x128xf32>
    %187 = math.tanh %186 : vector<8x128xf32>
    %c48_202 = arith.constant 48 : index
    %c0_203 = arith.constant 0 : index
    %188 = vector.load %arg16[%c48_202, %c0_203] : memref<64x256xf32, #tpu.memory_space<vmem>>, vector<8x128xf32>
    %c0_204 = arith.constant 0 : index
    %c0_205 = arith.constant 0 : index
    %189 = vector.load %arg8[%c0_204, %c0_205] : memref<128x128xf32, #tpu.memory_space<vmem>>, vector<128x128xf32>
    %cst_206 = arith.constant dense<0.000000e+00> : vector<8x128xf32>
    %190 = tpu.matmul %182, %189, %cst_206 {dimension_numbers = #tpu.dot_dimension_numbers<[1], [0], [0], [1], [0, 0, 1, 1], [], []>} : vector<8x128xf32>, vector<128x128xf32>, vector<8x128xf32> -> vector<8x128xf32>
    %191 = arith.addf %188, %190 : vector<8x128xf32>
    %192 = math.tanh %191 : vector<8x128xf32>
    %c8_207 = arith.constant 8 : index
    %c128_208 = arith.constant 128 : index
    %193 = vector.load %arg16[%c8_207, %c128_208] : memref<64x256xf32, #tpu.memory_space<vmem>>, vector<8x128xf32>
    %c0_209 = arith.constant 0 : index
    %c0_210 = arith.constant 0 : index
    %194 = vector.load %arg11[%c0_209, %c0_210] : memref<128x128xf32, #tpu.memory_space<vmem>>, vector<128x128xf32>
    %cst_211 = arith.constant dense<0.000000e+00> : vector<8x128xf32>
    %195 = tpu.matmul %187, %194, %cst_211 {dimension_numbers = #tpu.dot_dimension_numbers<[1], [0], [0], [1], [0, 0, 1, 1], [], []>} : vector<8x128xf32>, vector<128x128xf32>, vector<8x128xf32> -> vector<8x128xf32>
    %196 = arith.addf %193, %195 : vector<8x128xf32>
    %197 = math.tanh %196 : vector<8x128xf32>
    %c56_212 = arith.constant 56 : index
    %c0_213 = arith.constant 0 : index
    %198 = vector.load %arg16[%c56_212, %c0_213] : memref<64x256xf32, #tpu.memory_space<vmem>>, vector<8x128xf32>
    %c0_214 = arith.constant 0 : index
    %c0_215 = arith.constant 0 : index
    %199 = vector.load %arg8[%c0_214, %c0_215] : memref<128x128xf32, #tpu.memory_space<vmem>>, vector<128x128xf32>
    %cst_216 = arith.constant dense<0.000000e+00> : vector<8x128xf32>
    %200 = tpu.matmul %192, %199, %cst_216 {dimension_numbers = #tpu.dot_dimension_numbers<[1], [0], [0], [1], [0, 0, 1, 1], [], []>} : vector<8x128xf32>, vector<128x128xf32>, vector<8x128xf32> -> vector<8x128xf32>
    %201 = arith.addf %198, %200 : vector<8x128xf32>
    %202 = math.tanh %201 : vector<8x128xf32>
    %c0_217 = arith.constant 0 : index
    %c128_218 = arith.constant 128 : index
    %203 = vector.load %arg16[%c0_217, %c128_218] : memref<64x256xf32, #tpu.memory_space<vmem>>, vector<8x128xf32>
    %c0_219 = arith.constant 0 : index
    %c0_220 = arith.constant 0 : index
    %204 = vector.load %arg11[%c0_219, %c0_220] : memref<128x128xf32, #tpu.memory_space<vmem>>, vector<128x128xf32>
    %cst_221 = arith.constant dense<0.000000e+00> : vector<8x128xf32>
    %205 = tpu.matmul %197, %204, %cst_221 {dimension_numbers = #tpu.dot_dimension_numbers<[1], [0], [0], [1], [0, 0, 1, 1], [], []>} : vector<8x128xf32>, vector<128x128xf32>, vector<8x128xf32> -> vector<8x128xf32>
    %206 = arith.addf %203, %205 : vector<8x128xf32>
    %207 = math.tanh %206 : vector<8x128xf32>
    %c0_222 = arith.constant 0 : index
    %c0_223 = arith.constant 0 : index
    %208 = vector.load %arg13[%c0_222, %c0_223] : memref<256x128xf32, #tpu.memory_space<vmem>>, vector<128x128xf32>
    %cst_224 = arith.constant dense<0.000000e+00> : vector<8x128xf32>
    %209 = tpu.matmul %202, %208, %cst_224 {dimension_numbers = #tpu.dot_dimension_numbers<[1], [0], [0], [1], [0, 0, 1, 1], [], []>} : vector<8x128xf32>, vector<128x128xf32>, vector<8x128xf32> -> vector<8x128xf32>
    %c128_225 = arith.constant 128 : index
    %c0_226 = arith.constant 0 : index
    %210 = vector.load %arg13[%c128_225, %c0_226] : memref<256x128xf32, #tpu.memory_space<vmem>>, vector<128x128xf32>
    %cst_227 = arith.constant dense<0.000000e+00> : vector<8x128xf32>
    %211 = tpu.matmul %207, %210, %cst_227 {dimension_numbers = #tpu.dot_dimension_numbers<[1], [0], [0], [1], [0, 0, 1, 1], [], []>} : vector<8x128xf32>, vector<128x128xf32>, vector<8x128xf32> -> vector<8x128xf32>
    %212 = arith.addf %209, %211 : vector<8x128xf32>
    %c0_228 = arith.constant 0 : index
    %c0_229 = arith.constant 0 : index
    %213 = vector.load %arg14[%c0_228, %c0_229] : memref<1x128xf32, #tpu.memory_space<vmem>>, vector<1x128xf32>
    %214 = vector.broadcast %213 : vector<1x128xf32> to vector<8x128xf32>
    %215 = arith.addf %212, %214 : vector<8x128xf32>
    %c0_230 = arith.constant 0 : index
    %c0_231 = arith.constant 0 : index
    %216 = vector.load %arg15[%c0_230, %c0_231] : memref<8x128xf32, #tpu.memory_space<vmem>>, vector<8x128xf32>
    tpu.vector_store %arg15[%c0_230, %c0_231], %215 {strides = array<i32>} : memref<8x128xf32, #tpu.memory_space<vmem>>, vector<8x128xf32>,
    return
  }
}

</mosaic_0001>

<bundles_post_ra>
// kernel: sentiment_rnn_forward.1
= control target key start
LH: loop header
LB: loop body
LE: loop exit
PB: predicated region body
PF: predicated region fallthrough
CT: control target
= control target key end

     0   :  { %20 = vsyncpa [#allocation5], 0  ;;  %s8065_s0 = inlined_call_operand.vmem [shape: f32[64,32], index: 0, kind: input, shape index: {}]   ;;  %s8066_s1 = inlined_call_operand.vmem [shape: f32[32,128], index: 1, kind: input, shape index: {}]   ;;  %s8067_s2 = inlined_call_operand.vmem [shape: f32[128,128], index: 2, kind: input, shape index: {}]   ;;  %s8068_s3 = inlined_call_operand.vmem [shape: f32[1,128], index: 3, kind: input, shape index: {}]   ;;  %s8069_s4 = inlined_call_operand.hbm [shape: f32[32,128], index: 4, kind: input, shape index: {}]   ;;  %s8070_s5 = inlined_call_operand.hbm [shape: f32[128,128], index: 5, kind: input, shape index: {}]   ;;  %s8071_s6 = inlined_call_operand.vmem [shape: f32[1,128], index: 6, kind: input, shape index: {}]   ;;  %s8072_s7 = inlined_call_operand.vmem [shape: f32[256,128], index: 7, kind: input, shape index: {}]   ;;  %s8073_s8 = inlined_call_operand.hbm [shape: f32[128,128], index: 8, kind: input, shape index: {}]   ;;  %s8074_s9 = inlined_call_operand.vmem [shape: f32[1,128], index: 9, kind: input, shape index: {}]   ;;  %s8075_s10 = inlined_call_operand.hbm [shape: f32[256,128], index: 10, kind: input, shape index: {}]   ;;  %s8076_s11 = inlined_call_operand.hbm [shape: f32[128,128], index: 11, kind: input, shape index: {}]   ;;  %s8077_s12 = inlined_call_operand.hbm [shape: f32[1,128], index: 12, kind: input, shape index: {}]   ;;  %s8078_s13 = inlined_call_operand.hbm [shape: f32[256,128], index: 13, kind: input, shape index: {}]   ;;  %s8079_s14 = inlined_call_operand.hbm [shape: f32[1,128], index: 14, kind: input, shape index: {}]   ;;  %s8080_s15 = inlined_call_operand.vmem [shape: f32[8,128], index: 15, kind: output, shape index: {}]  }
   0x1   :  { %21 = vsyncpa [#allocation7], 0 }
   0x2   :  { %22 = vsyncpa [#allocation10], 0 }
   0x3   :  { %23 = vsyncpa [#allocation13], 0 }
   0x4   :  { %24 = vsyncpa [#allocation16], 0  ;;  %s6758_s18 = smov [#allocation6]   ;;  %s6759_s20 = smov [#allocation9]  }
   0x5   :  { %s50_s19 = sshll.u32 %s6758_s18, 4  ;;  %s80_s21 = sshll.u32 %s6759_s20, 4  ;;  %s51_s19 = int_to_ptr.vmem [resolvable:$true] %s50_s19  ;;  %s6851_s21 = int_to_ptr.vmem [resolvable:$true] %s80_s21 }
   0x6   :  { %s6572_s24 = scalar_lea.hbm %s8070_s5, 2048 }
   0x7   :  { %p6573_p0 = scmp.ne.s32.totalorder %s8070_s5, %s6572_s24  ;;  %p6576_p1 = scmp.lt.u32.totalorder %s6572_s24, %s8070_s5 }
   0x9   :  { %p6578_p2 = pnand %p6576_p1, %p6573_p0 }
   0xb   :  { %6581 = shalt.err (!%p6578_p2)
}
   0xc   :  { %s6582_s29 = scalar_lea.vmem %s51_s19, 2048  ;;  %p6587_p4 = scmp.lt.s32.totalorder %s51_s19, %s51_s19 }
   0xd   :  { %p6583_p3 = scmp.ne.s32.totalorder %s51_s19, %s6582_s29  ;;  %p6588_p5 = scmp.lt.s32.totalorder %s6582_s29, %s6582_s29 }
   0xf   :  { %p6589_p6 = por %p6588_p5, %p6587_p4 }
  0x11   :  { %p6590_p7 = pnand %p6589_p6, %p6583_p3 }
  0x13   :  { %6593 = shalt.err (!%p6590_p7)
}
  0x14   :  { %s6760_s30 = smov 128   ;;  %s6761_s16 = smov 8  }
  0x15   :  { %56 = dma.hbm_to_vmem [thread:$0]  %s8070_s5, 2048, %s51_s19, [#allocation7], %s6760_s30, %s6760_s30, %s6761_s16  }
  0x16   :  { %s6594_s23 = scalar_lea.hbm %s8075_s10, 4096 }
  0x17   :  { %p6595_p8 = scmp.ne.s32.totalorder %s8075_s10, %s6594_s23  ;;  %p6598_p9 = scmp.lt.u32.totalorder %s6594_s23, %s8075_s10 }
  0x19   :  { %p6600_p10 = pnand %p6598_p9, %p6595_p8 }
  0x1b   :  { %6603 = shalt.err (!%p6600_p10)
}
  0x1c   :  { %s6604_s28 = scalar_lea.vmem %s6851_s21, 4096  ;;  %p6609_p12 = scmp.lt.s32.totalorder %s6851_s21, %s6851_s21 }
  0x1d   :  { %p6605_p11 = scmp.ne.s32.totalorder %s6851_s21, %s6604_s28  ;;  %p6610_p13 = scmp.lt.s32.totalorder %s6604_s28, %s6604_s28 }
  0x1f   :  { %p6611_p0 = por %p6610_p13, %p6609_p12 }
  0x21   :  { %p6612_p1 = pnand %p6611_p0, %p6605_p11 }
  0x23   :  { %6615 = shalt.err (!%p6612_p1)
}
  0x24   :  { %86 = dma.hbm_to_vmem [thread:$0]  %s8075_s10, 4096, %s6851_s21, [#allocation10], %s6760_s30, %s6760_s30, %s6761_s16  }
  0x25   :  { %s6762_s29 = smov [#allocation12]   ;;  %s6763_s18 = smov [#allocation4]  }
  0x26   :  { %s105_s17 = sshll.u32 %s6762_s29, 4  ;;  %s38_s20 = sshll.u32 %s6763_s18, 4  ;;  %s106_s17 = int_to_ptr.vmem [resolvable:$true] %s105_s17  ;;  %s6888_s20 = int_to_ptr.vmem [resolvable:$true] %s38_s20 }
  0x27   :  { %s6616_s24 = scalar_lea.hbm %s8077_s12, 16 }
  0x28   :  { %p6617_p2 = scmp.ne.s32.totalorder %s8077_s12, %s6616_s24  ;;  %p6620_p3 = scmp.lt.u32.totalorder %s6616_s24, %s8077_s12 }
  0x2a   :  { %p6622_p4 = pnand %p6620_p3, %p6617_p2 }
  0x2c   :  { %6625 = shalt.err (!%p6622_p4)
}
  0x2d   :  { %s6626_s10 = scalar_lea.vmem %s106_s17, 16  ;;  %s6630_s21 = scalar_lea.vmem %s106_s17, 32 }
  0x2e   :  { %p6627_p5 = scmp.ne.s32.totalorder %s106_s17, %s6626_s10  ;;  %p6631_p6 = scmp.lt.s32.totalorder %s106_s17, %s106_s17 }
  0x2f   :  { %p6632_p7 = scmp.lt.s32.totalorder %s6630_s21, %s6626_s10 }
  0x31   :  { %p6633_p8 = por %p6632_p7, %p6631_p6 }
  0x33   :  { %p6634_p9 = pnand %p6633_p8, %p6627_p5 }
  0x35   :  { %6637 = shalt.err (!%p6634_p9)
}
  0x36   :  { %108 = dma.hbm_to_vmem [thread:$0]  %s8077_s12, 16, %s106_s17, [#allocation13]  }
  0x37   :  { %s6638_s22 = scalar_lea.hbm %s8069_s4, 512 }
  0x38   :  { %p6639_p10 = scmp.ne.s32.totalorder %s8069_s4, %s6638_s22  ;;  %p6642_p11 = scmp.lt.u32.totalorder %s6638_s22, %s8069_s4 }
  0x3a   :  { %p6644_p12 = pnand %p6642_p11, %p6639_p10 }
  0x3c   :  { %6647 = shalt.err (!%p6644_p12)
}
  0x3d   :  { %s6648_s27 = scalar_lea.vmem %s6888_s20, 512  ;;  %p6653_p0 = scmp.lt.s32.totalorder %s6888_s20, %s6888_s20 }
  0x3e   :  { %p6649_p13 = scmp.ne.s32.totalorder %s6888_s20, %s6648_s27  ;;  %p6654_p1 = scmp.lt.s32.totalorder %s6648_s27, %s6648_s27 }
  0x40   :  { %p6655_p2 = por %p6654_p1, %p6653_p0 }
  0x42   :  { %p6656_p3 = pnand %p6655_p2, %p6649_p13 }
  0x44   :  { %6659 = shalt.err (!%p6656_p3)
}
  0x45   :  { %44 = dma.hbm_to_vmem [thread:$0]  %s8069_s4, 512, %s6888_s20, [#allocation5], %s6760_s30, %s6760_s30, %s6761_s16  }
  0x46   :  { %s6764_s28 = smov [#allocation8]   ;;  %s6765_s21 = smov [#allocation11]  }
  0x47   :  { %s66_s10 = sshll.u32 %s6764_s28, 4  ;;  %s92_s5 = sshll.u32 %s6765_s21, 4  ;;  %s67_s10 = int_to_ptr.vmem [resolvable:$true] %s66_s10  ;;  %s6922_s5 = int_to_ptr.vmem [resolvable:$true] %s92_s5 }
  0x48   :  { %s6660_s18 = scalar_lea.hbm %s8073_s8, 2048 }
  0x49   :  { %p6661_p4 = scmp.ne.s32.totalorder %s8073_s8, %s6660_s18  ;;  %p6664_p5 = scmp.lt.u32.totalorder %s6660_s18, %s8073_s8 }
  0x4b   :  { %p6666_p6 = pnand %p6664_p5, %p6661_p4 }
  0x4d   :  { %6669 = shalt.err (!%p6666_p6)
}
  0x4e   :  { %s6670_s4 = scalar_lea.vmem %s67_s10, 2048  ;;  %p6675_p8 = scmp.lt.s32.totalorder %s67_s10, %s67_s10 }
  0x4f   :  { %p6671_p7 = scmp.ne.s32.totalorder %s67_s10, %s6670_s4  ;;  %p6676_p9 = scmp.lt.s32.totalorder %s6670_s4, %s6670_s4 }
  0x51   :  { %p6677_p10 = por %p6676_p9, %p6675_p8 }
  0x53   :  { %p6678_p11 = pnand %p6677_p10, %p6671_p7 }
  0x55   :  { %6681 = shalt.err (!%p6678_p11)
}
  0x56   :  { %72 = dma.hbm_to_vmem [thread:$0]  %s8073_s8, 2048, %s67_s10, [#allocation7], %s6760_s30, %s6760_s30, %s6761_s16  }
  0x57   :  { %s6682_s17 = scalar_lea.hbm %s8076_s11, 2048 }
  0x58   :  { %p6683_p12 = scmp.ne.s32.totalorder %s8076_s11, %s6682_s17  ;;  %p6686_p13 = scmp.lt.u32.totalorder %s6682_s17, %s8076_s11 }
  0x5a   :  { %p6688_p0 = pnand %p6686_p13, %p6683_p12 }
  0x5c   :  { %6691 = shalt.err (!%p6688_p0)
}
  0x5d   :  { %s6692_s18 = scalar_lea.vmem %s6922_s5, 2048  ;;  %p6697_p2 = scmp.lt.s32.totalorder %s6922_s5, %s6922_s5 }
  0x5e   :  { %p6693_p1 = scmp.ne.s32.totalorder %s6922_s5, %s6692_s18  ;;  %p6698_p3 = scmp.lt.s32.totalorder %s6692_s18, %s6692_s18 }
  0x60   :  { %p6699_p4 = por %p6698_p3, %p6697_p2 }
  0x62   :  { %p6700_p5 = pnand %p6699_p4, %p6693_p1 }
  0x64   :  { %6703 = shalt.err (!%p6700_p5)
}
  0x65   :  { %98 = dma.hbm_to_vmem [thread:$0]  %s8076_s11, 2048, %s6922_s5, [#allocation10], %s6760_s30, %s6760_s30, %s6761_s16  }
  0x66   :  { %s6766_s22 = smov [#allocation14]   ;;  %s6767_s24 = smov [#allocation15]  }
  0x67   :  { %s114_s23 = sshll.u32 %s6766_s22, 4  ;;  %s127_s25 = sshll.u32 %s6767_s24, 4  ;;  %s115_s23 = int_to_ptr.vmem [resolvable:$true] %s114_s23  ;;  %s128_s25 = int_to_ptr.vmem [resolvable:$true] %s127_s25 }
  0x68   :  { %s6704_s26 = scalar_lea.hbm %s8078_s13, 4096 }
  0x69   :  { %p6705_p6 = scmp.ne.s32.totalorder %s8078_s13, %s6704_s26  ;;  %p6708_p7 = scmp.lt.u32.totalorder %s6704_s26, %s8078_s13 }
  0x6b   :  { %p6710_p8 = pnand %p6708_p7, %p6705_p6 }
  0x6d   :  { %6713 = shalt.err (!%p6710_p8)
}
  0x6e   :  { %s6714_s11 = scalar_lea.vmem %s115_s23, 4096  ;;  %p6719_p10 = scmp.lt.s32.totalorder %s115_s23, %s115_s23 }
  0x6f   :  { %p6715_p9 = scmp.ne.s32.totalorder %s115_s23, %s6714_s11  ;;  %p6720_p11 = scmp.lt.s32.totalorder %s6714_s11, %s6714_s11 }
  0x71   :  { %p6721_p12 = por %p6720_p11, %p6719_p10 }
  0x73   :  { %p6722_p13 = pnand %p6721_p12, %p6715_p9 }
  0x75   :  { %6725 = shalt.err (!%p6722_p13)
}
  0x76   :  { %120 = dma.hbm_to_vmem [thread:$0]  %s8078_s13, 4096, %s115_s23, [#allocation13], %s6760_s30, %s6760_s30, %s6761_s16  }
  0x77   :  { %s6726_s18 = scalar_lea.hbm %s8079_s14, 16 }
  0x78   :  { %p6727_p0 = scmp.ne.s32.totalorder %s8079_s14, %s6726_s18  ;;  %p6730_p1 = scmp.lt.u32.totalorder %s6726_s18, %s8079_s14 }
  0x7a   :  { %p6732_p2 = pnand %p6730_p1, %p6727_p0 }
  0x7c   :  { %6735 = shalt.err (!%p6732_p2)
}
  0x7d   :  { %s6736_s4 = scalar_lea.vmem %s128_s25, 16  ;;  %s6740_s20 = scalar_lea.vmem %s128_s25, 32 }
  0x7e   :  { %p6737_p3 = scmp.ne.s32.totalorder %s128_s25, %s6736_s4  ;;  %p6741_p4 = scmp.lt.s32.totalorder %s128_s25, %s128_s25 }
  0x7f   :  { %p6742_p5 = scmp.lt.s32.totalorder %s6740_s20, %s6736_s4 }
  0x81   :  { %p6743_p6 = por %p6742_p5, %p6741_p4 }
  0x83   :  { %p6744_p7 = pnand %p6743_p6, %p6737_p3 }
  0x85   :  { %6747 = shalt.err (!%p6744_p7)
}
  0x86   :  { %130 = dma.hbm_to_vmem [thread:$0]  %s8079_s14, 16, %s128_s25, [#allocation16]  }
  0x87   :  { %6748 = dma.done.wait [#allocation5], 512  }
  0x88   :  { %6749 = vsyncadd [#allocation5], 4294966784 }
  0x89   :  { %6750 = dma.done.wait [#allocation7], 4096  }
  0x8a   :  { %6751 = vsyncadd [#allocation7], 4294963200 }
  0x8b   :  { %6752 = dma.done.wait [#allocation10], 6144  }
  0x8c   :  { %6753 = vsyncadd [#allocation10], 4294961152 }
  0x8d   :  { %6754 = dma.done.wait [#allocation13], 4112  }
  0x8e   :  { %6755 = vsyncadd [#allocation13], 4294963184 }
  0x8f   :  { %6756 = dma.done.wait [#allocation16], 16  }
  0x90   :  { %6757 = vsyncadd [#allocation16], 4294967280  ;;  %v163_v0 = vld [vmem:[%s8066_s1] sm:$0xff]  ;;  %v164_v1 = vld [vmem:[%s8066_s1 + $0x8] sm:$0xff]  ;;  %vm174_vm0 = vcmask 261120   ;;  %v6768_v19 = vmov 0.0|0.0  }
  0x91   :  { %v320_v2 = vld [vmem:[#allocation4] sm:$0xff]  ;;  %v5599_v3 = vpack.c.bf16 %v164_v1, %v163_v0  ;;  %v321_v4 = vld [vmem:[#allocation4 + $0x8] sm:$0xff]  ;;  %v165_v5 = vld [vmem:[%s8066_s1 + $0x10] sm:$0xff]  ;;  %vm6769_vm1 = vmmov 0   ;;  %v6770_v55 = vmov 0.0  }
  0x92   :  { %v166_v6 = vld [vmem:[%s8066_s1 + $0x18] sm:$0xff]  ;;  %v5607_v7 = vpack.c.bf16 %v321_v4, %v320_v2  ;;  %v322_v9 = vld [vmem:[#allocation4 + $0x10] sm:$0xff]  ;;  %v312_v11 = vld [vmem:[%s8065_s0] sm:$0xff] }
  0x93   :  { %v5603_v8 = vpack.c.bf16 %v166_v6, %v165_v5  ;;  %v323_v10 = vld [vmem:[#allocation4 + $0x18] sm:$0xff]  ;;  %5600 = vmatprep.subr.bf16.mxu0 %v5599_v3  ;;  %4397 = vmatprep.mubr.msk.f32.mxu1 %vm174_vm0, %v312_v11  ;;  %v469_v13 = vld [vmem:[%s8067_s2] sm:$0xff]  ;;  %v470_v14 = vld [vmem:[%s8067_s2 + $0x8] sm:$0xff] }
  0x94   :  { %v5611_v12 = vpack.c.bf16 %v323_v10, %v322_v9  ;;  %5608 = vmatprep.subr.bf16.mxu1 %v5607_v7  ;;  %5602 = vmatpush3.bf16.msra.mxu0 %v5599_v3  ;;  %v558_v15 = vld [vmem:[#allocation6] sm:$0xff]  ;;  %v559_v16 = vld [vmem:[#allocation6 + $0x8] sm:$0xff]  ;;  %v7012_v18 = vpack.c.bf16 %v470_v14, %v469_v13  ;;  %v471_v21 = vld [vmem:[%s8067_s2 + $0x10] sm:$0xff] }
  0x95   :  { %5610 = vmatpush3.bf16.msra.mxu1 %v5607_v7  ;;  %5604 = vmatprep.subr.bf16.mxu0 %v5603_v8  ;;  %v313_v17 = vld [vmem:[%s8065_s0 + $0x8] sm:$0xff]  ;;  %v7015_v20 = vpack.c.bf16 %v559_v16, %v558_v15  ;;  %v472_v22 = vld [vmem:[%s8067_s2 + $0x18] sm:$0xff]  ;;  %v560_v23 = vld [vmem:[#allocation6 + $0x10] sm:$0xff] }
  0x96   :  { %5612 = vmatprep.subr.bf16.mxu1 %v5611_v12  ;;  %4377 = vmatprep.mubr.msk.f32.mxu0 %vm174_vm0, %v312_v11  ;;  %v561_v24 = vld [vmem:[#allocation6 + $0x18] sm:$0xff]  ;;  %v314_v25 = vld [vmem:[%s8065_s0 + $0x10] sm:$0xff]  ;;  %v7030_v26 = vpack.c.bf16 %v472_v22, %v471_v21  ;;  %v473_v28 = vld [vmem:[%s8067_s2 + $0x20] sm:$0xff] }
  0x97   :  { %v7034_v27 = vpack.c.bf16 %v561_v24, %v560_v23  ;;  %v474_v29 = vld [vmem:[%s8067_s2 + $0x28] sm:$0xff]  ;;  %v315_v30 = vld [vmem:[%s8065_s0 + $0x18] sm:$0xff]  ;;  %v562_v31 = vld [vmem:[#allocation6 + $0x20] sm:$0xff] }
  0x98   :  { %5606 = vmatpush3.bf16.msra.mxu0 %v5603_v8  ;;  %v563_v32 = vld [vmem:[#allocation6 + $0x28] sm:$0xff]  ;;  %v7049_v33 = vpack.c.bf16 %v474_v29, %v473_v28  ;;  %v316_v34 = vld [vmem:[%s8065_s0 + $0x20] sm:$0xff]  ;;  %v475_v36 = vld [vmem:[%s8067_s2 + $0x30] sm:$0xff] }
  0x99   :  { %5614 = vmatpush3.bf16.msra.mxu1 %v5611_v12  ;;  %5615 = vmatprep.subr.bf16.mxu0 %v6768_v19  ;;  %v7057_v35 = vpack.c.bf16 %v563_v32, %v562_v31  ;;  %v476_v37 = vld [vmem:[%s8067_s2 + $0x38] sm:$0xff]  ;;  %v317_v38 = vld [vmem:[%s8065_s0 + $0x28] sm:$0xff]  ;;  %v564_v39 = vld [vmem:[#allocation6 + $0x30] sm:$0xff] }
  0x9a   :  { %5639 = vmatprep.subr.bf16.mxu1 %v6768_v19  ;;  %v565_v40 = vld [vmem:[#allocation6 + $0x38] sm:$0xff]  ;;  %v7073_v41 = vpack.c.bf16 %v476_v37, %v475_v36  ;;  %v318_v42 = vld [vmem:[%s8065_s0 + $0x30] sm:$0xff]  ;;  %v477_v44 = vld [vmem:[%s8067_s2 + $0x40] sm:$0xff] }
  0x9b   :  { %4378 = vmatmul.mubr.msk.f32.vlgmr.msra.gmra.mrb[0].mxu0 %vm174_vm0, %v313_v17  ;;  %v7081_v43 = vpack.c.bf16 %v565_v40, %v564_v39  ;;  %v478_v45 = vld [vmem:[%s8067_s2 + $0x48] sm:$0xff]  ;;  %v319_v46 = vld [vmem:[%s8065_s0 + $0x38] sm:$0xff]  ;;  %v566_v47 = vld [vmem:[#allocation6 + $0x40] sm:$0xff] }
  0x9c   :  { %4398 = vmatmul.mubr.msk.f32.vlgmr.msra.gmra.mrb[0].mxu1 %vm174_vm0, %v313_v17  ;;  %5617 = vmatpush3.bf16.msra.mxu0 %v7012_v18  ;;  %v567_v48 = vld [vmem:[#allocation6 + $0x48] sm:$0xff]  ;;  %v7097_v49 = vpack.c.bf16 %v478_v45, %v477_v44  ;;  %v479_v51 = vld [vmem:[%s8067_s2 + $0x50] sm:$0xff]  ;;  %v480_v52 = vld [vmem:[%s8067_s2 + $0x58] sm:$0xff] }
  0x9d   :  { %5641 = vmatpush3.bf16.msra.mxu1 %v7015_v20  ;;  %5618 = vmatprep.subr.bf16.mxu0 %v6768_v19  ;;  %v7102_v50 = vpack.c.bf16 %v567_v48, %v566_v47  ;;  %v568_v53 = vld [vmem:[#allocation6 + $0x50] sm:$0xff]  ;;  %v569_v54 = vld [vmem:[#allocation6 + $0x58] sm:$0xff]  ;;  %v7117_v56 = vpack.c.bf16 %v480_v52, %v479_v51  ;;  %v481_v58 = vld [vmem:[%s8067_s2 + $0x60] sm:$0xff] }
  0x9e   :  { %5642 = vmatprep.subr.bf16.mxu1 %v6768_v19  ;;  %4400 = vmatprep.mubr.msk.f32.mxu1 %vm174_vm0, %v314_v25  ;;  %v7121_v57 = vpack.c.bf16 %v569_v54, %v568_v53  ;;  %v482_v59 = vld [vmem:[%s8067_s2 + $0x68] sm:$0xff]  ;;  %v570_v60 = vld [vmem:[#allocation6 + $0x60] sm:$0xff]  ;;  %v483_v0 = vld [vmem:[%s8067_s2 + $0x70] sm:$0xff] }
  0x9f   :  { %4380 = vmatprep.mubr.msk.f32.mxu0 %vm174_vm0, %v314_v25  ;;  %v571_v61 = vld [vmem:[#allocation6 + $0x68] sm:$0xff]  ;;  %v7131_v62 = vpack.c.bf16 %v482_v59, %v481_v58  ;;  %v484_v1 = vld [vmem:[%s8067_s2 + $0x78] sm:$0xff]  ;;  %v572_v2 = vld [vmem:[#allocation6 + $0x70] sm:$0xff] }
  0xa0   :  { %5620 = vmatpush3.bf16.msra.mxu0 %v7030_v26  ;;  %4401 = vmatmul.mubr.msk.f32.gmra.mrb[2].mxu1 %vm174_vm0, %v315_v30  ;;  %v7135_v63 = vpack.c.bf16 %v571_v61, %v570_v60  ;;  %v573_v3 = vld [vmem:[#allocation6 + $0x78] sm:$0xff]  ;;  %v7145_v4 = vpack.c.bf16 %v484_v1, %v483_v0  ;;  %v3634_v6 = vld [vmem:[%s8068_s3] ss:$0 sm:$0xff] }
  0xa1   :  { %5644 = vmatpush3.bf16.msra.mxu1 %v7034_v27  ;;  %5621 = vmatprep.subr.bf16.mxu0 %v6768_v19  ;;  %v7149_v5 = vpack.c.bf16 %v573_v3, %v572_v2  ;;  %v3643_v7 = vld [vmem:[%s8071_s6] ss:$0 sm:$0xff] }
  0xa2   :  { %5645 = vmatprep.subr.bf16.mxu1 %v6768_v19  ;;  %4381 = vmatmul.mubr.msk.f32.gmra.mrb[2].mxu0 %vm174_vm0, %v315_v30 }
  0xa3   :  { %4403 = vmatprep.mubr.msk.f32.mxu1 %vm174_vm0, %v316_v34  ;;  %4383 = vmatprep.mubr.msk.f32.mxu0 %vm174_vm0, %v316_v34 }
  0xa4   :  { %5623 = vmatpush3.bf16.msra.mxu0 %v7049_v33  ;;  %4404 = vmatmul.mubr.msk.f32.gmra.mrb[4].mxu1 %vm174_vm0, %v317_v38 }
  0xa5   :  { %5647 = vmatpush3.bf16.msra.mxu1 %v7057_v35  ;;  %5624 = vmatprep.subr.bf16.mxu0 %v6768_v19 }
  0xa6   :  { %5648 = vmatprep.subr.bf16.mxu1 %v6768_v19  ;;  %4384 = vmatmul.mubr.msk.f32.gmra.mrb[4].mxu0 %vm174_vm0, %v317_v38 }
  0xa7   :  { %4406 = vmatprep.mubr.msk.f32.mxu1 %vm174_vm0, %v318_v42  ;;  %4386 = vmatprep.mubr.msk.f32.mxu0 %vm174_vm0, %v318_v42 }
  0xa8   :  { %5626 = vmatpush3.bf16.msra.mxu0 %v7073_v41  ;;  %4407 = vmatmul.mubr.msk.f32.gmra.mrb[6].mxu1 %vm174_vm0, %v319_v46 }
  0xa9   :  { %5650 = vmatpush3.bf16.msra.mxu1 %v7081_v43  ;;  %5627 = vmatprep.subr.bf16.mxu0 %v6768_v19 }
  0xaa   :  { %5651 = vmatprep.subr.bf16.mxu1 %v6768_v19  ;;  %4387 = vmatmul.mubr.msk.f32.gmra.mrb[6].mxu0 %vm174_vm0, %v319_v46 }
  0xab   :  { %4441 = vmatprep.mubr.msk.f32.mxu0 %vm6769_vm1, %v6770_v55  ;;  %4476 = vmatprep.mubr.msk.f32.mxu1 %vm6769_vm1, %v6770_v55 }
  0xac   :  { %5629 = vmatpush3.bf16.msra.mxu0 %v7097_v49 }
  0xad   :  { %5653 = vmatpush3.bf16.msra.mxu1 %v7102_v50  ;;  %5630 = vmatprep.subr.bf16.mxu0 %v6768_v19 }
  0xae   :  { %5654 = vmatprep.subr.bf16.mxu1 %v6768_v19 }
  0xb0   :  { %5632 = vmatpush3.bf16.msra.mxu0 %v7117_v56 }
  0xb1   :  { %5656 = vmatpush3.bf16.msra.mxu1 %v7121_v57  ;;  %5633 = vmatprep.subr.bf16.mxu0 %v6768_v19 }
  0xb2   :  { %5657 = vmatprep.subr.bf16.mxu1 %v6768_v19 }
  0xb4   :  { %5635 = vmatpush3.bf16.msra.mxu0 %v7131_v62 }
  0xb5   :  { %5659 = vmatpush3.bf16.msra.mxu1 %v7135_v63  ;;  %5636 = vmatprep.subr.bf16.mxu0 %v6768_v19 }
  0xb6   :  { %5660 = vmatprep.subr.bf16.mxu1 %v6768_v19 }
  0xb8   :  { %5638 = vmatpush3.bf16.msra.mxu0 %v7145_v4 }
  0xb9   :  { %5662 = vmatpush3.bf16.msra.mxu1 %v7149_v5  ;;  %5663 = vmatprep.subr.bf16.mxu0 %v6768_v19 }
  0xba   :  { %5687 = vmatprep.subr.bf16.mxu1 %v6768_v19 }
  0xbb   :  { %4442 = vmatmul.mubr.f32.vlgmr.msra.gmra.mrb[8].mxu0 %v6770_v55 }
  0xbc   :  { %4477 = vmatmul.mubr.f32.vlgmr.msra.gmra.mrb[8].mxu1 %v6770_v55  ;;  %5665 = vmatpush3.bf16.msra.mxu0 %v7012_v18 }
  0xbd   :  { %5689 = vmatpush3.bf16.msra.mxu1 %v7015_v20  ;;  %5666 = vmatprep.subr.bf16.mxu0 %v6768_v19 }
  0xbe   :  { %5690 = vmatprep.subr.bf16.mxu1 %v6768_v19  ;;  %4511 = vmatprep.mubr.msk.f32.mxu0 %vm6769_vm1, %v6770_v55 }
  0xbf   :  { %4546 = vmatprep.mubr.msk.f32.mxu1 %vm6769_vm1, %v6770_v55 }
  0xc0   :  { %5668 = vmatpush3.bf16.msra.mxu0 %v7030_v26 }
  0xc1   :  { %5692 = vmatpush3.bf16.msra.mxu1 %v7034_v27  ;;  %5669 = vmatprep.subr.bf16.mxu0 %v6768_v19 }
  0xc2   :  { %5693 = vmatprep.subr.bf16.mxu1 %v6768_v19 }
  0xc4   :  { %5671 = vmatpush3.bf16.msra.mxu0 %v7049_v33 }
  0xc5   :  { %5695 = vmatpush3.bf16.msra.mxu1 %v7057_v35  ;;  %5672 = vmatprep.subr.bf16.mxu0 %v6768_v19 }
  0xc6   :  { %5696 = vmatprep.subr.bf16.mxu1 %v6768_v19 }
  0xc8   :  { %5674 = vmatpush3.bf16.msra.mxu0 %v7073_v41 }
  0xc9   :  { %5698 = vmatpush3.bf16.msra.mxu1 %v7081_v43  ;;  %5675 = vmatprep.subr.bf16.mxu0 %v6768_v19 }
  0xca   :  { %5699 = vmatprep.subr.bf16.mxu1 %v6768_v19 }
  0xcc   :  { %5677 = vmatpush3.bf16.msra.mxu0 %v7097_v49 }
  0xcd   :  { %5701 = vmatpush3.bf16.msra.mxu1 %v7102_v50  ;;  %5678 = vmatprep.subr.bf16.mxu0 %v6768_v19 }
  0xce   :  { %5702 = vmatprep.subr.bf16.mxu1 %v6768_v19 }
  0xd0   :  { %5680 = vmatpush3.bf16.msra.mxu0 %v7117_v56 }
  0xd1   :  { %5704 = vmatpush3.bf16.msra.mxu1 %v7121_v57  ;;  %5681 = vmatprep.subr.bf16.mxu0 %v6768_v19 }
  0xd2   :  { %5705 = vmatprep.subr.bf16.mxu1 %v6768_v19 }
  0xd4   :  { %5683 = vmatpush3.bf16.msra.mxu0 %v7131_v62 }
  0xd5   :  { %5707 = vmatpush3.bf16.msra.mxu1 %v7135_v63  ;;  %5684 = vmatprep.subr.bf16.mxu0 %v6768_v19 }
  0xd6   :  { %5708 = vmatprep.subr.bf16.mxu1 %v6768_v19 }
  0xd8   :  { %5686 = vmatpush3.bf16.msra.mxu0 %v7145_v4 }
  0xd9   :  { %5710 = vmatpush3.bf16.msra.mxu1 %v7149_v5  ;;  %5711 = vmatprep.subr.bf16.mxu0 %v6768_v19 }
  0xda   :  { %5735 = vmatprep.subr.bf16.mxu1 %v6768_v19 }
 0x16e   :  { %v4379_v8 = vpop.f32.mrb[0].mxu0 }
 0x16f   :  { %v4399_v9 = vpop.f32.mrb[0].mxu1  ;;  %v7200_v10 = vadd.f32 %v4379_v8, %v3634_v6  ;;  %v265_v11 = vpop.f32.mrb[1].mxu0 }
 0x170   :  { %v7202_v12 = vadd.f32 %v4399_v9, %v3643_v7  ;;  %v421_v13 = vpop.f32.mrb[1].mxu1  ;;  %v266_v47 = vadd.f32 %v3634_v6, %v265_v11 }
 0x171   :  { %v7204_v14 = vadd.f32 %v3643_v7, %v421_v13 }
 0x173   :  { %v4402_v15 = vpop.f32.mrb[2].mxu1 }
 0x174   :  { %v7206_v16 = vadd.f32 %v4402_v15, %v3643_v7  ;;  %v431_v17 = vpop.f32.mrb[3].mxu1 }
 0x175   :  { %v7208_v21 = vadd.f32 %v3643_v7, %v431_v17  ;;  %v4382_v22 = vpop.f32.mrb[2].mxu0 }
 0x176   :  { %v7210_v23 = vadd.f32 %v4382_v22, %v3634_v6  ;;  %v275_v24 = vpop.f32.mrb[3].mxu0 }
 0x177   :  { %v4405_v25 = vpop.f32.mrb[4].mxu1  ;;  %v7212_v28 = vadd.f32 %v3634_v6, %v275_v24 }
 0x178   :  { %v7214_v29 = vadd.f32 %v4405_v25, %v3643_v7  ;;  %v441_v30 = vpop.f32.mrb[5].mxu1 }
 0x179   :  { %v7216_v31 = vadd.f32 %v3643_v7, %v441_v30  ;;  %v4385_v32 = vpop.f32.mrb[4].mxu0 }
 0x17a   :  { %v7218_v34 = vadd.f32 %v4385_v32, %v3634_v6  ;;  %v285_v36 = vpop.f32.mrb[5].mxu0 }
 0x17b   :  { %v4408_v37 = vpop.f32.mrb[6].mxu1  ;;  %v7220_v38 = vadd.f32 %v3634_v6, %v285_v36 }
 0x17c   :  { %v451_v39 = vpop.f32.mrb[7].mxu1  ;;  %v457_v48 = vadd.f32 %v4408_v37, %v3643_v7 }
 0x17d   :  { %v452_v40 = vadd.f32 %v3643_v7, %v451_v39  ;;  %v4388_v42 = vpop.f32.mrb[6].mxu0 }
 0x17e   :  { %v7222_v44 = vadd.f32 %v4388_v42, %v3634_v6  ;;  %v295_v45 = vpop.f32.mrb[7].mxu0  ;;  %v1553_v42 = vld [vmem:[%s8067_s2 + $0x20] sm:$0xff] }
 0x17f   :  { %v7224_v46 = vadd.f32 %v3634_v6, %v295_v45  ;;  %v1554_v45 = vld [vmem:[%s8067_s2 + $0x28] sm:$0xff] }
 0x18e   :  { %v551_v51 = vpop.f32.mrb[8].mxu0 }
 0x18f   :  { %v555_v52 = vadd.f32 %v551_v51, %v266_v47  ;;  %v640_v53 = vpop.f32.mrb[8].mxu1  ;;  %v4443_v54 = vpop.f32.mrb[9].mxu0  ;;  %v1642_v47 = vld [vmem:[#allocation6 + $0x20] sm:$0xff]  ;;  %v7442_v51 = vpack.c.bf16 %v1554_v45, %v1553_v42 }
 0x190   :  { %v644_v58 = vadd.f32 %v640_v53, %v457_v48  ;;  %v4478_v59 = vpop.f32.mrb[9].mxu1  ;;  %v1643_v48 = vld [vmem:[#allocation6 + $0x28] sm:$0xff]  ;;  %v1555_v53 = vld [vmem:[%s8067_s2 + $0x30] sm:$0xff]  ;;  %v1556_v54 = vld [vmem:[%s8067_s2 + $0x38] sm:$0xff] }
 0x191   :  { %6508 = vtanh.f32 %v555_v52  ;;  %v7446_v52 = vpack.c.bf16 %v1643_v48, %v1642_v47  ;;  %v1645_v59 = vld [vmem:[#allocation6 + $0x38] sm:$0xff] }
 0x192   :  { %6510 = vtanh.f32 %v644_v58  ;;  %v1644_v58 = vld [vmem:[#allocation6 + $0x30] sm:$0xff] }
 0x19b   :  { %v7226_v60 = vpop.eup %6508 }
 0x19c   :  { %v7228_v61 = vpop.eup %6510  ;;  %4512 = vmatmul.mubr.f32.vlgmr.msra.gmra.mrb[10].mxu0 %v7226_v60 }
 0x19d   :  { %4547 = vmatmul.mubr.f32.vlgmr.msra.gmra.mrb[10].mxu1 %v7228_v61  ;;  %5713 = vmatpush3.bf16.msra.mxu0 %v7012_v18 }
 0x19e   :  { %5737 = vmatpush3.bf16.msra.mxu1 %v7015_v20  ;;  %5714 = vmatprep.subr.bf16.mxu0 %v6768_v19 }
 0x19f   :  { %5738 = vmatprep.subr.bf16.mxu1 %v6768_v19  ;;  %4581 = vmatprep.mubr.msk.f32.mxu0 %vm6769_vm1, %v6770_v55 }
 0x1a0   :  { %4616 = vmatprep.mubr.msk.f32.mxu1 %vm6769_vm1, %v6770_v55 }
 0x1a1   :  { %5716 = vmatpush3.bf16.msra.mxu0 %v7030_v26 }
 0x1a2   :  { %5740 = vmatpush3.bf16.msra.mxu1 %v7034_v27  ;;  %5717 = vmatprep.subr.bf16.mxu0 %v6768_v19 }
 0x1a3   :  { %5741 = vmatprep.subr.bf16.mxu1 %v6768_v19 }
 0x1a5   :  { %5719 = vmatpush3.bf16.msra.mxu0 %v7049_v33 }
 0x1a6   :  { %5743 = vmatpush3.bf16.msra.mxu1 %v7057_v35  ;;  %5720 = vmatprep.subr.bf16.mxu0 %v6768_v19 }
 0x1a7   :  { %5744 = vmatprep.subr.bf16.mxu1 %v6768_v19 }
 0x1a9   :  { %5722 = vmatpush3.bf16.msra.mxu0 %v7073_v41 }
 0x1aa   :  { %5746 = vmatpush3.bf16.msra.mxu1 %v7081_v43  ;;  %5723 = vmatprep.subr.bf16.mxu0 %v6768_v19 }
 0x1ab   :  { %5747 = vmatprep.subr.bf16.mxu1 %v6768_v19 }
 0x1ad   :  { %5725 = vmatpush3.bf16.msra.mxu0 %v7097_v49 }
 0x1ae   :  { %5749 = vmatpush3.bf16.msra.mxu1 %v7102_v50  ;;  %5726 = vmatprep.subr.bf16.mxu0 %v6768_v19 }
 0x1af   :  { %5750 = vmatprep.subr.bf16.mxu1 %v6768_v19 }
 0x1b1   :  { %5728 = vmatpush3.bf16.msra.mxu0 %v7117_v56 }
 0x1b2   :  { %5752 = vmatpush3.bf16.msra.mxu1 %v7121_v57  ;;  %5729 = vmatprep.subr.bf16.mxu0 %v6768_v19 }
 0x1b3   :  { %5753 = vmatprep.subr.bf16.mxu1 %v6768_v19 }
 0x1b5   :  { %5731 = vmatpush3.bf16.msra.mxu0 %v7131_v62 }
 0x1b6   :  { %5755 = vmatpush3.bf16.msra.mxu1 %v7135_v63  ;;  %5732 = vmatprep.subr.bf16.mxu0 %v6768_v19 }
 0x1b7   :  { %5756 = vmatprep.subr.bf16.mxu1 %v6768_v19 }
 0x1b9   :  { %5734 = vmatpush3.bf16.msra.mxu0 %v7145_v4 }
 0x1ba   :  { %5758 = vmatpush3.bf16.msra.mxu1 %v7149_v5  ;;  %5759 = vmatprep.subr.bf16.mxu0 %v6768_v19 }
 0x1bb   :  { %5783 = vmatprep.subr.bf16.mxu1 %v6768_v19 }
 0x26f   :  { %v731_v0 = vpop.f32.mrb[10].mxu0 }
 0x270   :  { %v735_v1 = vadd.f32 %v731_v0, %v7200_v10  ;;  %v820_v2 = vpop.f32.mrb[10].mxu1  ;;  %v4513_v3 = vpop.f32.mrb[11].mxu0  ;;  %v7456_v0 = vpack.c.bf16 %v1556_v54, %v1555_v53 }
 0x271   :  { %v824_v6 = vadd.f32 %v820_v2, %v452_v40  ;;  %v4548_v7 = vpop.f32.mrb[11].mxu1  ;;  %v1557_v2 = vld [vmem:[%s8067_s2 + $0x40] sm:$0xff]  ;;  %v1558_v3 = vld [vmem:[%s8067_s2 + $0x48] sm:$0xff] }
 0x272   :  { %6512 = vtanh.f32 %v735_v1  ;;  %v7460_v1 = vpack.c.bf16 %v1645_v59, %v1644_v58  ;;  %v1647_v7 = vld [vmem:[#allocation6 + $0x48] sm:$0xff]  ;;  %v1924_v58 = vld [vmem:[%s8072_s7] sm:$0xff] }
 0x273   :  { %6514 = vtanh.f32 %v824_v6  ;;  %v1646_v6 = vld [vmem:[#allocation6 + $0x40] sm:$0xff]  ;;  %v1925_v59 = vld [vmem:[%s8072_s7 + $0x8] sm:$0xff] }
 0x27c   :  { %v7269_v8 = vpop.eup %6512 }
 0x27d   :  { %v7271_v9 = vpop.eup %6514  ;;  %4582 = vmatmul.mubr.f32.vlgmr.msra.gmra.mrb[12].mxu0 %v7269_v8 }
 0x27e   :  { %4617 = vmatmul.mubr.f32.vlgmr.msra.gmra.mrb[12].mxu1 %v7271_v9  ;;  %5761 = vmatpush3.bf16.msra.mxu0 %v7012_v18 }
 0x27f   :  { %5785 = vmatpush3.bf16.msra.mxu1 %v7015_v20  ;;  %5762 = vmatprep.subr.bf16.mxu0 %v6768_v19 }
 0x280   :  { %5786 = vmatprep.subr.bf16.mxu1 %v6768_v19  ;;  %4651 = vmatprep.mubr.msk.f32.mxu0 %vm6769_vm1, %v6770_v55 }
 0x281   :  { %4686 = vmatprep.mubr.msk.f32.mxu1 %vm6769_vm1, %v6770_v55 }
 0x282   :  { %5764 = vmatpush3.bf16.msra.mxu0 %v7030_v26 }
 0x283   :  { %5788 = vmatpush3.bf16.msra.mxu1 %v7034_v27  ;;  %5765 = vmatprep.subr.bf16.mxu0 %v6768_v19 }
 0x284   :  { %5789 = vmatprep.subr.bf16.mxu1 %v6768_v19 }
 0x286   :  { %5767 = vmatpush3.bf16.msra.mxu0 %v7049_v33 }
 0x287   :  { %5791 = vmatpush3.bf16.msra.mxu1 %v7057_v35  ;;  %5768 = vmatprep.subr.bf16.mxu0 %v6768_v19 }
 0x288   :  { %5792 = vmatprep.subr.bf16.mxu1 %v6768_v19 }
 0x28a   :  { %5770 = vmatpush3.bf16.msra.mxu0 %v7073_v41 }
 0x28b   :  { %5794 = vmatpush3.bf16.msra.mxu1 %v7081_v43  ;;  %5771 = vmatprep.subr.bf16.mxu0 %v6768_v19 }
 0x28c   :  { %5795 = vmatprep.subr.bf16.mxu1 %v6768_v19 }
 0x28e   :  { %5773 = vmatpush3.bf16.msra.mxu0 %v7097_v49 }
 0x28f   :  { %5797 = vmatpush3.bf16.msra.mxu1 %v7102_v50  ;;  %5774 = vmatprep.subr.bf16.mxu0 %v6768_v19 }
 0x290   :  { %5798 = vmatprep.subr.bf16.mxu1 %v6768_v19 }
 0x292   :  { %5776 = vmatpush3.bf16.msra.mxu0 %v7117_v56 }
 0x293   :  { %5800 = vmatpush3.bf16.msra.mxu1 %v7121_v57  ;;  %5777 = vmatprep.subr.bf16.mxu0 %v6768_v19 }
 0x294   :  { %5801 = vmatprep.subr.bf16.mxu1 %v6768_v19 }
 0x296   :  { %5779 = vmatpush3.bf16.msra.mxu0 %v7131_v62 }
 0x297   :  { %5803 = vmatpush3.bf16.msra.mxu1 %v7135_v63  ;;  %5780 = vmatprep.subr.bf16.mxu0 %v6768_v19 }
 0x298   :  { %5804 = vmatprep.subr.bf16.mxu1 %v6768_v19 }
 0x29a   :  { %5782 = vmatpush3.bf16.msra.mxu0 %v7145_v4 }
 0x29b   :  { %5806 = vmatpush3.bf16.msra.mxu1 %v7149_v5  ;;  %5807 = vmatprep.subr.bf16.mxu0 %v6768_v19 }
 0x29c   :  { %5831 = vmatprep.subr.bf16.mxu1 %v6768_v19 }
 0x350   :  { %v911_v10 = vpop.f32.mrb[12].mxu0 }
 0x351   :  { %v915_v11 = vadd.f32 %v911_v10, %v7212_v28  ;;  %v1000_v13 = vpop.f32.mrb[12].mxu1  ;;  %v4583_v15 = vpop.f32.mrb[13].mxu0  ;;  %v7470_v10 = vpack.c.bf16 %v1558_v3, %v1557_v2  ;;  %v2110_v2 = vld [vmem:[#allocation9 + $0x90] sm:$0xff]  ;;  %v2111_v3 = vld [vmem:[#allocation9 + $0x98] sm:$0xff] }
 0x352   :  { %v1004_v17 = vadd.f32 %v1000_v13, %v7214_v29  ;;  %v4618_v22 = vpop.f32.mrb[13].mxu1  ;;  %v1559_v13 = vld [vmem:[%s8067_s2 + $0x50] sm:$0xff]  ;;  %v1560_v15 = vld [vmem:[%s8067_s2 + $0x58] sm:$0xff] }
 0x353   :  { %6516 = vtanh.f32 %v915_v11  ;;  %v7474_v11 = vpack.c.bf16 %v1647_v7, %v1646_v6  ;;  %v5919_v22 = vpack.c.bf16 %v1560_v15, %v1559_v13  ;;  %v6001_v6 = vpack.c.bf16 %v1925_v59, %v1924_v58  ;;  %v1927_v13 = vld [vmem:[%s8072_s7 + $0x18] sm:$0xff]  ;;  %v2094_v15 = vld [vmem:[#allocation9 + $0x10] sm:$0xff] }
 0x354   :  { %6518 = vtanh.f32 %v1004_v17  ;;  %v1648_v17 = vld [vmem:[#allocation6 + $0x50] sm:$0xff] }
 0x35d   :  { %v7313_v24 = vpop.eup %6516 }
 0x35e   :  { %v7315_v25 = vpop.eup %6518  ;;  %4652 = vmatmul.mubr.f32.vlgmr.msra.gmra.mrb[14].mxu0 %v7313_v24 }
 0x35f   :  { %4687 = vmatmul.mubr.f32.vlgmr.msra.gmra.mrb[14].mxu1 %v7315_v25  ;;  %5809 = vmatpush3.bf16.msra.mxu0 %v7012_v18 }
 0x360   :  { %5833 = vmatpush3.bf16.msra.mxu1 %v7015_v20  ;;  %5810 = vmatprep.subr.bf16.mxu0 %v6768_v19 }
 0x361   :  { %5834 = vmatprep.subr.bf16.mxu1 %v6768_v19  ;;  %4721 = vmatprep.mubr.msk.f32.mxu0 %vm6769_vm1, %v6770_v55 }
 0x362   :  { %4756 = vmatprep.mubr.msk.f32.mxu1 %vm6769_vm1, %v6770_v55 }
 0x363   :  { %5812 = vmatpush3.bf16.msra.mxu0 %v7030_v26 }
 0x364   :  { %5836 = vmatpush3.bf16.msra.mxu1 %v7034_v27  ;;  %5813 = vmatprep.subr.bf16.mxu0 %v6768_v19 }
 0x365   :  { %5837 = vmatprep.subr.bf16.mxu1 %v6768_v19 }
 0x367   :  { %5815 = vmatpush3.bf16.msra.mxu0 %v7049_v33 }
 0x368   :  { %5839 = vmatpush3.bf16.msra.mxu1 %v7057_v35  ;;  %5816 = vmatprep.subr.bf16.mxu0 %v6768_v19 }
 0x369   :  { %5840 = vmatprep.subr.bf16.mxu1 %v6768_v19 }
 0x36b   :  { %5818 = vmatpush3.bf16.msra.mxu0 %v7073_v41 }
 0x36c   :  { %5842 = vmatpush3.bf16.msra.mxu1 %v7081_v43  ;;  %5819 = vmatprep.subr.bf16.mxu0 %v6768_v19 }
 0x36d   :  { %5843 = vmatprep.subr.bf16.mxu1 %v6768_v19 }
 0x36f   :  { %5821 = vmatpush3.bf16.msra.mxu0 %v7097_v49 }
 0x370   :  { %5845 = vmatpush3.bf16.msra.mxu1 %v7102_v50  ;;  %5822 = vmatprep.subr.bf16.mxu0 %v6768_v19 }
 0x371   :  { %5846 = vmatprep.subr.bf16.mxu1 %v6768_v19 }
 0x373   :  { %5824 = vmatpush3.bf16.msra.mxu0 %v7117_v56 }
 0x374   :  { %5848 = vmatpush3.bf16.msra.mxu1 %v7121_v57  ;;  %5825 = vmatprep.subr.bf16.mxu0 %v6768_v19 }
 0x375   :  { %5849 = vmatprep.subr.bf16.mxu1 %v6768_v19 }
 0x377   :  { %5827 = vmatpush3.bf16.msra.mxu0 %v7131_v62 }
 0x378   :  { %5851 = vmatpush3.bf16.msra.mxu1 %v7135_v63  ;;  %5828 = vmatprep.subr.bf16.mxu0 %v6768_v19 }
 0x379   :  { %5852 = vmatprep.subr.bf16.mxu1 %v6768_v19 }
 0x37b   :  { %5830 = vmatpush3.bf16.msra.mxu0 %v7145_v4 }
 0x37c   :  { %5854 = vmatpush3.bf16.msra.mxu1 %v7149_v5  ;;  %5855 = vmatprep.subr.bf16.mxu0 %v6768_v19 }
 0x37d   :  { %5879 = vmatprep.subr.bf16.mxu1 %v6768_v19 }
 0x431   :  { %v1091_v28 = vpop.f32.mrb[14].mxu0 }
 0x432   :  { %v1095_v29 = vadd.f32 %v1091_v28, %v7210_v23  ;;  %v1180_v30 = vpop.f32.mrb[14].mxu1  ;;  %v4653_v32 = vpop.f32.mrb[15].mxu0  ;;  %v1649_v28 = vld [vmem:[#allocation6 + $0x58] sm:$0xff] }
 0x433   :  { %v1184_v36 = vadd.f32 %v1180_v30, %v7216_v31  ;;  %v4688_v37 = vpop.f32.mrb[15].mxu1  ;;  %v1561_v30 = vld [vmem:[%s8067_s2 + $0x60] sm:$0xff]  ;;  %v1562_v32 = vld [vmem:[%s8067_s2 + $0x68] sm:$0xff] }
 0x434   :  { %6520 = vtanh.f32 %v1095_v29  ;;  %v5943_v29 = vpack.c.bf16 %v1649_v28, %v1648_v17  ;;  %v5922_v37 = vpack.c.bf16 %v1562_v32, %v1561_v30  ;;  %v2095_v28 = vld [vmem:[#allocation9 + $0x18] sm:$0xff]  ;;  %v1945_v30 = vld [vmem:[%s8072_s7 + $0xa8] sm:$0xff] }
 0x435   :  { %6522 = vtanh.f32 %v1184_v36  ;;  %v1650_v36 = vld [vmem:[#allocation6 + $0x60] sm:$0xff] }
 0x43e   :  { %v7357_v39 = vpop.eup %6520 }
 0x43f   :  { %v7359_v40 = vpop.eup %6522  ;;  %4722 = vmatmul.mubr.f32.vlgmr.msra.gmra.mrb[16].mxu0 %v7357_v39 }
 0x440   :  { %4757 = vmatmul.mubr.f32.vlgmr.msra.gmra.mrb[16].mxu1 %v7359_v40  ;;  %5857 = vmatpush3.bf16.msra.mxu0 %v7012_v18 }
 0x441   :  { %5881 = vmatpush3.bf16.msra.mxu1 %v7015_v20  ;;  %5858 = vmatprep.subr.bf16.mxu0 %v6768_v19 }
 0x442   :  { %5882 = vmatprep.subr.bf16.mxu1 %v6768_v19  ;;  %4791 = vmatprep.mubr.msk.f32.mxu0 %vm6769_vm1, %v6770_v55 }
 0x443   :  { %4826 = vmatprep.mubr.msk.f32.mxu1 %vm6769_vm1, %v6770_v55 }
 0x444   :  { %5860 = vmatpush3.bf16.msra.mxu0 %v7030_v26 }
 0x445   :  { %5884 = vmatpush3.bf16.msra.mxu1 %v7034_v27  ;;  %5861 = vmatprep.subr.bf16.mxu0 %v6768_v19 }
 0x446   :  { %5885 = vmatprep.subr.bf16.mxu1 %v6768_v19 }
 0x448   :  { %5863 = vmatpush3.bf16.msra.mxu0 %v7049_v33 }
 0x449   :  { %5887 = vmatpush3.bf16.msra.mxu1 %v7057_v35  ;;  %5864 = vmatprep.subr.bf16.mxu0 %v6768_v19 }
 0x44a   :  { %5888 = vmatprep.subr.bf16.mxu1 %v6768_v19 }
 0x44c   :  { %5866 = vmatpush3.bf16.msra.mxu0 %v7073_v41  ;;  %v1549_v41 = vld [vmem:[%s8067_s2] sm:$0xff] }
 0x44d   :  { %5890 = vmatpush3.bf16.msra.mxu1 %v7081_v43  ;;  %5867 = vmatprep.subr.bf16.mxu0 %v6768_v19  ;;  %v1550_v43 = vld [vmem:[%s8067_s2 + $0x8] sm:$0xff] }
 0x44e   :  { %5891 = vmatprep.subr.bf16.mxu1 %v6768_v19 }
 0x450   :  { %5869 = vmatpush3.bf16.msra.mxu0 %v7097_v49  ;;  %v1638_v49 = vld [vmem:[#allocation6] sm:$0xff] }
 0x451   :  { %5893 = vmatpush3.bf16.msra.mxu1 %v7102_v50  ;;  %5870 = vmatprep.subr.bf16.mxu0 %v6768_v19  ;;  %v1639_v50 = vld [vmem:[#allocation6 + $0x8] sm:$0xff] }
 0x452   :  { %5894 = vmatprep.subr.bf16.mxu1 %v6768_v19 }
 0x454   :  { %5872 = vmatpush3.bf16.msra.mxu0 %v7117_v56  ;;  %v7407_v56 = vpack.c.bf16 %v1550_v43, %v1549_v41 }
 0x455   :  { %5896 = vmatpush3.bf16.msra.mxu1 %v7121_v57  ;;  %5873 = vmatprep.subr.bf16.mxu0 %v6768_v19  ;;  %v7409_v57 = vpack.c.bf16 %v1639_v50, %v1638_v49 }
 0x456   :  { %5897 = vmatprep.subr.bf16.mxu1 %v6768_v19 }
 0x458   :  { %5875 = vmatpush3.bf16.msra.mxu0 %v7131_v62  ;;  %v1551_v62 = vld [vmem:[%s8067_s2 + $0x10] sm:$0xff] }
 0x459   :  { %5899 = vmatpush3.bf16.msra.mxu1 %v7135_v63  ;;  %5876 = vmatprep.subr.bf16.mxu0 %v6768_v19  ;;  %v1552_v63 = vld [vmem:[%s8067_s2 + $0x18] sm:$0xff] }
 0x45a   :  { %5900 = vmatprep.subr.bf16.mxu1 %v6768_v19  ;;  %v7424_v31 = vpack.c.bf16 %v1552_v63, %v1551_v62 }
 0x45c   :  { %5878 = vmatpush3.bf16.msra.mxu0 %v7145_v4 }
 0x45d   :  { %5902 = vmatpush3.bf16.msra.mxu1 %v7149_v5  ;;  %5903 = vmatprep.subr.bf16.mxu0 %v6768_v19  ;;  %v1640_v5 = vld [vmem:[#allocation6 + $0x10] sm:$0xff] }
 0x45e   :  { %5927 = vmatprep.subr.bf16.mxu1 %v6768_v19 }
 0x512   :  { %v1271_v18 = vpop.f32.mrb[16].mxu0 }
 0x513   :  { %v1275_v20 = vadd.f32 %v1271_v18, %v7220_v38  ;;  %v1360_v26 = vpop.f32.mrb[16].mxu1  ;;  %v4723_v27 = vpop.f32.mrb[17].mxu0  ;;  %v1651_v18 = vld [vmem:[#allocation6 + $0x68] sm:$0xff] }
 0x514   :  { %v1364_v33 = vadd.f32 %v1360_v26, %v7206_v16  ;;  %v4758_v35 = vpop.f32.mrb[17].mxu1  ;;  %v1641_v16 = vld [vmem:[#allocation6 + $0x18] sm:$0xff]  ;;  %v5946_v27 = vpack.c.bf16 %v1651_v18, %v1650_v36  ;;  %v2112_v36 = vld [vmem:[#allocation9 + $0xa0] sm:$0xff] }
 0x515   :  { %6524 = vtanh.f32 %v1275_v20  ;;  %v7428_v38 = vpack.c.bf16 %v1641_v16, %v1640_v5  ;;  %v1563_v20 = vld [vmem:[%s8067_s2 + $0x70] sm:$0xff]  ;;  %v1564_v26 = vld [vmem:[%s8067_s2 + $0x78] sm:$0xff] }
 0x516   :  { %6526 = vtanh.f32 %v1364_v33  ;;  %v1652_v33 = vld [vmem:[#allocation6 + $0x70] sm:$0xff]  ;;  %v1653_v35 = vld [vmem:[#allocation6 + $0x78] sm:$0xff]  ;;  %v5925_v41 = vpack.c.bf16 %v1564_v26, %v1563_v20  ;;  %v6037_v20 = vpack.c.bf16 %v2095_v28, %v2094_v15 }
 0x517   :  { %v5949_v43 = vpack.c.bf16 %v1653_v35, %v1652_v33  ;;  %v1929_v33 = vld [vmem:[%s8072_s7 + $0x28] sm:$0xff]  ;;  %v2096_v35 = vld [vmem:[#allocation9 + $0x20] sm:$0xff]  ;;  %v1934_v15 = vld [vmem:[%s8072_s7 + $0x50] sm:$0xff] }
 0x51f   :  { %v7417_v4 = vpop.eup %6524 }
 0x520   :  { %v7419_v23 = vpop.eup %6526  ;;  %4792 = vmatmul.mubr.f32.vlgmr.msra.gmra.mrb[18].mxu0 %v7417_v4 }
 0x521   :  { %4827 = vmatmul.mubr.f32.vlgmr.msra.gmra.mrb[18].mxu1 %v7419_v23  ;;  %5905 = vmatpush3.bf16.msra.mxu0 %v7407_v56 }
 0x522   :  { %5929 = vmatpush3.bf16.msra.mxu1 %v7409_v57  ;;  %5906 = vmatprep.subr.bf16.mxu0 %v6768_v19 }
 0x523   :  { %5930 = vmatprep.subr.bf16.mxu1 %v6768_v19  ;;  %4861 = vmatprep.mubr.msk.f32.mxu0 %vm6769_vm1, %v6770_v55 }
 0x524   :  { %4896 = vmatprep.mubr.msk.f32.mxu1 %vm6769_vm1, %v6770_v55 }
 0x525   :  { %5908 = vmatpush3.bf16.msra.mxu0 %v7424_v31 }
 0x526   :  { %5932 = vmatpush3.bf16.msra.mxu1 %v7428_v38  ;;  %5909 = vmatprep.subr.bf16.mxu0 %v6768_v19 }
 0x527   :  { %5933 = vmatprep.subr.bf16.mxu1 %v6768_v19 }
 0x529   :  { %5911 = vmatpush3.bf16.msra.mxu0 %v7442_v51 }
 0x52a   :  { %5935 = vmatpush3.bf16.msra.mxu1 %v7446_v52  ;;  %5912 = vmatprep.subr.bf16.mxu0 %v6768_v19 }
 0x52b   :  { %5936 = vmatprep.subr.bf16.mxu1 %v6768_v19 }
 0x52d   :  { %5914 = vmatpush3.bf16.msra.mxu0 %v7456_v0 }
 0x52e   :  { %5938 = vmatpush3.bf16.msra.mxu1 %v7460_v1  ;;  %5915 = vmatprep.subr.bf16.mxu0 %v6768_v19 }
 0x52f   :  { %5939 = vmatprep.subr.bf16.mxu1 %v6768_v19 }
 0x531   :  { %5917 = vmatpush3.bf16.msra.mxu0 %v7470_v10 }
 0x532   :  { %5941 = vmatpush3.bf16.msra.mxu1 %v7474_v11  ;;  %5918 = vmatprep.subr.bf16.mxu0 %v6768_v19 }
 0x533   :  { %5942 = vmatprep.subr.bf16.mxu1 %v6768_v19 }
 0x535   :  { %5920 = vmatpush3.bf16.msra.mxu0 %v5919_v22 }
 0x536   :  { %5944 = vmatpush3.bf16.msra.mxu1 %v5943_v29  ;;  %5921 = vmatprep.subr.bf16.mxu0 %v6768_v19 }
 0x537   :  { %5945 = vmatprep.subr.bf16.mxu1 %v6768_v19 }
 0x539   :  { %5923 = vmatpush3.bf16.msra.mxu0 %v5922_v37 }
 0x53a   :  { %5947 = vmatpush3.bf16.msra.mxu1 %v5946_v27  ;;  %5924 = vmatprep.subr.bf16.mxu0 %v6768_v19 }
 0x53b   :  { %5948 = vmatprep.subr.bf16.mxu1 %v6768_v19 }
 0x53d   :  { %5926 = vmatpush3.bf16.msra.mxu0 %v5925_v41 }
 0x53e   :  { %5950 = vmatpush3.bf16.msra.mxu1 %v5949_v43  ;;  %5951 = vmatprep.subr.bf16.mxu0 %v6768_v19 }
 0x53f   :  { %5975 = vmatprep.subr.bf16.mxu1 %v6768_v19 }
 0x5f3   :  { %v1451_v49 = vpop.f32.mrb[18].mxu0 }
 0x5f4   :  { %v1455_v50 = vadd.f32 %v1451_v49, %v7218_v34  ;;  %v1540_v62 = vpop.f32.mrb[18].mxu1  ;;  %v4793_v63 = vpop.f32.mrb[19].mxu0  ;;  %v1941_v34 = vld [vmem:[%s8072_s7 + $0x88] sm:$0xff]  ;;  %v1946_v49 = vld [vmem:[%s8072_s7 + $0xb0] sm:$0xff] }
 0x5f5   :  { %v1544_v5 = vadd.f32 %v1540_v62, %v7208_v21  ;;  %v4828_v16 = vpop.f32.mrb[19].mxu1  ;;  %v1940_v21 = vld [vmem:[%s8072_s7 + $0x80] sm:$0xff]  ;;  %v2114_v62 = vld [vmem:[#allocation9 + $0xb0] sm:$0xff]  ;;  %v2115_v63 = vld [vmem:[#allocation9 + $0xb8] sm:$0xff] }
 0x5f6   :  { %6528 = vtanh.f32 %v1455_v50  ;;  %v1947_v50 = vld [vmem:[%s8072_s7 + $0xb8] sm:$0xff] }
 0x5f7   :  { %6530 = vtanh.f32 %v1544_v5 }
 0x600   :  { %v7507_v42 = vpop.eup %6528 }
 0x601   :  { %v7509_v45 = vpop.eup %6530  ;;  %4862 = vmatmul.mubr.f32.vlgmr.msra.gmra.mrb[20].mxu0 %v7507_v42 }
 0x602   :  { %4897 = vmatmul.mubr.f32.vlgmr.msra.gmra.mrb[20].mxu1 %v7509_v45  ;;  %5953 = vmatpush3.bf16.msra.mxu0 %v7407_v56  ;;  %v2108_v56 = vld [vmem:[#allocation9 + $0x80] sm:$0xff] }
 0x603   :  { %5977 = vmatpush3.bf16.msra.mxu1 %v7409_v57  ;;  %5954 = vmatprep.subr.bf16.mxu0 %v6768_v19  ;;  %v5999_v57 = vpack.c.bf16 %v1941_v34, %v1940_v21  ;;  %v6011_v21 = vpack.c.bf16 %v1947_v50, %v1946_v49  ;;  %v1930_v34 = vld [vmem:[%s8072_s7 + $0x30] sm:$0xff]  ;;  %v2104_v50 = vld [vmem:[#allocation9 + $0x60] sm:$0xff] }
 0x604   :  { %5978 = vmatprep.subr.bf16.mxu1 %v6768_v19  ;;  %4931 = vmatprep.mubr.msk.f32.mxu0 %vm6769_vm1, %v6770_v55 }
 0x605   :  { %4966 = vmatprep.mubr.msk.f32.mxu1 %vm6769_vm1, %v6770_v55 }
 0x606   :  { %5956 = vmatpush3.bf16.msra.mxu0 %v7424_v31  ;;  %v2109_v31 = vld [vmem:[#allocation9 + $0x88] sm:$0xff] }
 0x607   :  { %5980 = vmatpush3.bf16.msra.mxu1 %v7428_v38  ;;  %5957 = vmatprep.subr.bf16.mxu0 %v6768_v19  ;;  %v6031_v38 = vpack.c.bf16 %v2109_v31, %v2108_v56  ;;  %v1931_v56 = vld [vmem:[%s8072_s7 + $0x38] sm:$0xff]  ;;  %v6043_v31 = vpack.c.bf16 %v2115_v63, %v2114_v62  ;;  %v2105_v62 = vld [vmem:[#allocation9 + $0x68] sm:$0xff]  ;;  %v1954_v63 = vld [vmem:[%s8072_s7 + $0xf0] sm:$0xff] }
 0x608   :  { %5981 = vmatprep.subr.bf16.mxu1 %v6768_v19 }
 0x60a   :  { %5959 = vmatpush3.bf16.msra.mxu0 %v7442_v51 }
 0x60b   :  { %5983 = vmatpush3.bf16.msra.mxu1 %v7446_v52  ;;  %5960 = vmatprep.subr.bf16.mxu0 %v6768_v19 }
 0x60c   :  { %5984 = vmatprep.subr.bf16.mxu1 %v6768_v19 }
 0x60e   :  { %5962 = vmatpush3.bf16.msra.mxu0 %v7456_v0  ;;  %v2092_v0 = vld [vmem:[#allocation9] sm:$0xff] }
 0x60f   :  { %5986 = vmatpush3.bf16.msra.mxu1 %v7460_v1  ;;  %5963 = vmatprep.subr.bf16.mxu0 %v6768_v19  ;;  %v2093_v1 = vld [vmem:[#allocation9 + $0x8] sm:$0xff] }
 0x610   :  { %5987 = vmatprep.subr.bf16.mxu1 %v6768_v19  ;;  %v6033_v7 = vpack.c.bf16 %v2093_v1, %v2092_v0  ;;  %v1932_v0 = vld [vmem:[%s8072_s7 + $0x40] sm:$0xff]  ;;  %v1933_v1 = vld [vmem:[%s8072_s7 + $0x48] sm:$0xff] }
 0x612   :  { %5965 = vmatpush3.bf16.msra.mxu0 %v7470_v10 }
 0x613   :  { %5989 = vmatpush3.bf16.msra.mxu1 %v7474_v11  ;;  %5966 = vmatprep.subr.bf16.mxu0 %v6768_v19  ;;  %v1926_v11 = vld [vmem:[%s8072_s7 + $0x10] sm:$0xff] }
 0x614   :  { %5990 = vmatprep.subr.bf16.mxu1 %v6768_v19  ;;  %v6005_v18 = vpack.c.bf16 %v1927_v13, %v1926_v11  ;;  %v2119_v13 = vld [vmem:[#allocation9 + $0xd8] sm:$0xff] }
 0x616   :  { %5968 = vmatpush3.bf16.msra.mxu0 %v5919_v22  ;;  %v6035_v22 = vpack.c.bf16 %v2111_v3, %v2110_v2  ;;  %v2101_v2 = vld [vmem:[#allocation9 + $0x48] sm:$0xff] }
 0x617   :  { %5992 = vmatpush3.bf16.msra.mxu1 %v5943_v29  ;;  %5969 = vmatprep.subr.bf16.mxu0 %v6768_v19  ;;  %v1944_v29 = vld [vmem:[%s8072_s7 + $0xa0] sm:$0xff] }
 0x618   :  { %5993 = vmatprep.subr.bf16.mxu1 %v6768_v19  ;;  %v6007_v26 = vpack.c.bf16 %v1945_v30, %v1944_v29  ;;  %v2102_v30 = vld [vmem:[#allocation9 + $0x50] sm:$0xff] }
 0x61a   :  { %5971 = vmatpush3.bf16.msra.mxu0 %v5922_v37  ;;  %v2113_v37 = vld [vmem:[#allocation9 + $0xa8] sm:$0xff] }
 0x61b   :  { %5995 = vmatpush3.bf16.msra.mxu1 %v5946_v27  ;;  %5972 = vmatprep.subr.bf16.mxu0 %v6768_v19  ;;  %v1928_v27 = vld [vmem:[%s8072_s7 + $0x20] sm:$0xff] }
 0x61c   :  { %5996 = vmatprep.subr.bf16.mxu1 %v6768_v19  ;;  %v6009_v5 = vpack.c.bf16 %v1929_v33, %v1928_v27  ;;  %v2121_v33 = vld [vmem:[#allocation9 + $0xe8] sm:$0xff] }
 0x61e   :  { %5974 = vmatpush3.bf16.msra.mxu0 %v5925_v41  ;;  %v6039_v41 = vpack.c.bf16 %v2113_v37, %v2112_v36  ;;  %v2103_v36 = vld [vmem:[#allocation9 + $0x58] sm:$0xff] }
 0x61f   :  { %5998 = vmatpush3.bf16.msra.mxu1 %v5949_v43  ;;  %6000 = vmatprep.subr.bf16.mxu0 %v5999_v57  ;;  %v2097_v43 = vld [vmem:[#allocation9 + $0x28] sm:$0xff]  ;;  %v2098_v57 = vld [vmem:[#allocation9 + $0x30] sm:$0xff]  ;;  %v6053_v37 = vpack.c.bf16 %v2103_v36, %v2102_v30  ;;  %v2338_v30 = vld [vmem:[#allocation11 + $0x20] sm:$0xff] }
 0x620   :  { %6032 = vmatprep.subr.bf16.mxu1 %v6031_v38  ;;  %v6041_v16 = vpack.c.bf16 %v2097_v43, %v2096_v35  ;;  %v2099_v38 = vld [vmem:[#allocation9 + $0x38] sm:$0xff]  ;;  %v1936_v35 = vld [vmem:[%s8072_s7 + $0x60] sm:$0xff] }
 0x6d4   :  { %v1631_v47 = vpop.f32.mrb[20].mxu0 }
 0x6d5   :  { %v1635_v48 = vadd.f32 %v1631_v47, %v7224_v46  ;;  %v1720_v51 = vpop.f32.mrb[20].mxu1  ;;  %v4863_v52 = vpop.f32.mrb[21].mxu0  ;;  %v1942_v46 = vld [vmem:[%s8072_s7 + $0x90] sm:$0xff]  ;;  %v1948_v47 = vld [vmem:[%s8072_s7 + $0xc0] sm:$0xff] }
 0x6d6   :  { %v1724_v53 = vadd.f32 %v1720_v51, %v7202_v12  ;;  %v4898_v54 = vpop.f32.mrb[21].mxu1  ;;  %v1943_v12 = vld [vmem:[%s8072_s7 + $0x98] sm:$0xff]  ;;  %v2116_v51 = vld [vmem:[#allocation9 + $0xc0] sm:$0xff]  ;;  %v2117_v52 = vld [vmem:[#allocation9 + $0xc8] sm:$0xff] }
 0x6d7   :  { %6532 = vtanh.f32 %v1635_v48  ;;  %v6003_v10 = vpack.c.bf16 %v1943_v12, %v1942_v46  ;;  %v1949_v48 = vld [vmem:[%s8072_s7 + $0xc8] sm:$0xff]  ;;  %v6045_v54 = vpack.c.bf16 %v2099_v38, %v2098_v57  ;;  %v6047_v59 = vpack.c.bf16 %v2117_v52, %v2116_v51  ;;  %v2100_v46 = vld [vmem:[#allocation9 + $0x40] sm:$0xff]  ;;  %v1939_v38 = vld [vmem:[%s8072_s7 + $0x78] sm:$0xff] }
 0x6d8   :  { %6534 = vtanh.f32 %v1724_v53  ;;  %v6013_v53 = vpack.c.bf16 %v1931_v56, %v1930_v34  ;;  %v6015_v58 = vpack.c.bf16 %v1949_v48, %v1948_v47  ;;  %v6017_v12 = vpack.c.bf16 %v1933_v1, %v1932_v0  ;;  %v2123_v34 = vld [vmem:[#allocation9 + $0xf8] sm:$0xff]  ;;  %v2106_v47 = vld [vmem:[#allocation9 + $0x70] sm:$0xff] }
 0x6d9   :  { %v6049_v3 = vpack.c.bf16 %v2101_v2, %v2100_v46  ;;  %v2107_v51 = vld [vmem:[#allocation9 + $0x78] sm:$0xff]  ;;  %v2245_v46 = vld [vmem:[#allocation8] sm:$0xff] }
 0x6da   :  { %v6061_v52 = vpack.c.bf16 %v2107_v51, %v2106_v47  ;;  %v2334_v2 = vld [vmem:[#allocation11] sm:$0xff] }
 0x6db   :  { %v3653_v51 = vld [vmem:[#allocation12] ss:$0 sm:$0xff] }
 0x6e1   :  { %v7567_v17 = vpop.eup %6532 }
 0x6e2   :  { %v7575_v32 = vpop.eup %6534  ;;  %4932 = vmatmul.mubr.f32.vlgmr.msra.gmra.mrb[22].mxu0 %v7567_v17 }
 0x6e3   :  { %4967 = vmatmul.mubr.f32.vlgmr.msra.gmra.mrb[22].mxu1 %v7575_v32  ;;  %6002 = vmatpush3.bf16.msra.mxu0 %v6001_v6  ;;  %v1950_v6 = vld [vmem:[%s8072_s7 + $0xd0] sm:$0xff] }
 0x6e4   :  { %6034 = vmatpush3.bf16.msra.mxu1 %v6033_v7  ;;  %6004 = vmatprep.subr.bf16.mxu0 %v6003_v10  ;;  %v1951_v7 = vld [vmem:[%s8072_s7 + $0xd8] sm:$0xff]  ;;  %v2118_v10 = vld [vmem:[#allocation9 + $0xd0] sm:$0xff] }
 0x6e5   :  { %6036 = vmatprep.subr.bf16.mxu1 %v6035_v22  ;;  %v6019_v11 = vpack.c.bf16 %v1951_v7, %v1950_v6  ;;  %v1935_v22 = vld [vmem:[%s8072_s7 + $0x58] sm:$0xff]  ;;  %v6051_v28 = vpack.c.bf16 %v2119_v13, %v2118_v10  ;;  %v2336_v13 = vld [vmem:[#allocation11 + $0x10] sm:$0xff] }
 0x6e6   :  { %v6021_v29 = vpack.c.bf16 %v1935_v22, %v1934_v15  ;;  %v2337_v15 = vld [vmem:[#allocation11 + $0x18] sm:$0xff] }
 0x6e7   :  { %6006 = vmatpush3.bf16.msra.mxu0 %v6005_v18  ;;  %v1952_v18 = vld [vmem:[%s8072_s7 + $0xe0] sm:$0xff]  ;;  %v7663_v22 = vpack.c.bf16 %v2337_v15, %v2336_v13 }
 0x6e8   :  { %6038 = vmatpush3.bf16.msra.mxu1 %v6037_v20  ;;  %6008 = vmatprep.subr.bf16.mxu0 %v6007_v26  ;;  %v1953_v20 = vld [vmem:[%s8072_s7 + $0xe8] sm:$0xff]  ;;  %v2120_v26 = vld [vmem:[#allocation9 + $0xe0] sm:$0xff] }
 0x6e9   :  { %6040 = vmatprep.subr.bf16.mxu1 %v6039_v41  ;;  %v6023_v27 = vpack.c.bf16 %v1953_v20, %v1952_v18  ;;  %v1937_v41 = vld [vmem:[%s8072_s7 + $0x68] sm:$0xff]  ;;  %v6055_v43 = vpack.c.bf16 %v2121_v33, %v2120_v26  ;;  %v2252_v18 = vld [vmem:[#allocation8 + $0x38] sm:$0xff]  ;;  %v2340_v20 = vld [vmem:[#allocation11 + $0x30] sm:$0xff] }
 0x6ea   :  { %v6025_v49 = vpack.c.bf16 %v1937_v41, %v1936_v35  ;;  %v2254_v33 = vld [vmem:[#allocation8 + $0x48] sm:$0xff]  ;;  %v2342_v35 = vld [vmem:[#allocation11 + $0x40] sm:$0xff] }
 0x6eb   :  { %6010 = vmatpush3.bf16.msra.mxu0 %v6009_v5  ;;  %v6057_v5 = vpack.c.bf16 %v2105_v62, %v2104_v50  ;;  %v2344_v50 = vld [vmem:[#allocation11 + $0x50] sm:$0xff] }
 0x6ec   :  { %6042 = vmatpush3.bf16.msra.mxu1 %v6041_v16  ;;  %6012 = vmatprep.subr.bf16.mxu0 %v6011_v21  ;;  %v1955_v16 = vld [vmem:[%s8072_s7 + $0xf8] sm:$0xff]  ;;  %v2122_v21 = vld [vmem:[#allocation9 + $0xf0] sm:$0xff] }
 0x6ed   :  { %6044 = vmatprep.subr.bf16.mxu1 %v6043_v31  ;;  %v6027_v56 = vpack.c.bf16 %v1955_v16, %v1954_v63  ;;  %v6059_v57 = vpack.c.bf16 %v2123_v34, %v2122_v21  ;;  %v1938_v31 = vld [vmem:[%s8072_s7 + $0x70] sm:$0xff]  ;;  %v2257_v63 = vld [vmem:[#allocation8 + $0x60] sm:$0xff]  ;;  %v2347_v16 = vld [vmem:[#allocation11 + $0x68] sm:$0xff] }
 0x6ee   :  { %v6029_v48 = vpack.c.bf16 %v1939_v38, %v1938_v31  ;;  %v2259_v34 = vld [vmem:[#allocation8 + $0x70] sm:$0xff] }
 0x6ef   :  { %6014 = vmatpush3.bf16.msra.mxu0 %v6013_v53 }
 0x6f0   :  { %6046 = vmatpush3.bf16.msra.mxu1 %v6045_v54  ;;  %6016 = vmatprep.subr.bf16.mxu0 %v6015_v58 }
 0x6f1   :  { %6048 = vmatprep.subr.bf16.mxu1 %v6047_v59 }
 0x6f3   :  { %6018 = vmatpush3.bf16.msra.mxu0 %v6017_v12  ;;  %v2246_v12 = vld [vmem:[#allocation8 + $0x8] sm:$0xff] }
 0x6f4   :  { %6050 = vmatpush3.bf16.msra.mxu1 %v6049_v3  ;;  %6020 = vmatprep.subr.bf16.mxu0 %v6019_v11  ;;  %v2335_v3 = vld [vmem:[#allocation11 + $0x8] sm:$0xff]  ;;  %v7651_v7 = vpack.c.bf16 %v2246_v12, %v2245_v46  ;;  %v2247_v11 = vld [vmem:[#allocation8 + $0x10] sm:$0xff] }
 0x6f5   :  { %6052 = vmatprep.subr.bf16.mxu1 %v6051_v28  ;;  %v7653_v10 = vpack.c.bf16 %v2335_v3, %v2334_v2  ;;  %v2249_v28 = vld [vmem:[#allocation8 + $0x20] sm:$0xff] }
 0x6f6   :  { %v3652_v2 = vld [vmem:[%s8074_s9] ss:$0 sm:$0xff] }
 0x6f7   :  { %6022 = vmatpush3.bf16.msra.mxu0 %v6021_v29  ;;  %v2250_v29 = vld [vmem:[#allocation8 + $0x28] sm:$0xff] }
 0x6f8   :  { %6054 = vmatpush3.bf16.msra.mxu1 %v6053_v37  ;;  %6024 = vmatprep.subr.bf16.mxu0 %v6023_v27  ;;  %v2251_v37 = vld [vmem:[#allocation8 + $0x30] sm:$0xff]  ;;  %v2253_v27 = vld [vmem:[#allocation8 + $0x40] sm:$0xff] }
 0x6f9   :  { %6056 = vmatprep.subr.bf16.mxu1 %v6055_v43  ;;  %v2255_v43 = vld [vmem:[#allocation8 + $0x50] sm:$0xff] }
 0x6fb   :  { %6026 = vmatpush3.bf16.msra.mxu0 %v6025_v49  ;;  %v2256_v49 = vld [vmem:[#allocation8 + $0x58] sm:$0xff] }
 0x6fc   :  { %6058 = vmatpush3.bf16.msra.mxu1 %v6057_v5  ;;  %6028 = vmatprep.subr.bf16.mxu0 %v6027_v56  ;;  %v2346_v5 = vld [vmem:[#allocation11 + $0x60] sm:$0xff]  ;;  %v2260_v56 = vld [vmem:[#allocation8 + $0x78] sm:$0xff] }
 0x6fd   :  { %6060 = vmatprep.subr.bf16.mxu1 %v6059_v57  ;;  %v7724_v21 = vpack.c.bf16 %v2347_v16, %v2346_v5  ;;  %v2348_v57 = vld [vmem:[#allocation11 + $0x70] sm:$0xff] }
 0x6ff   :  { %6030 = vmatpush3.bf16.msra.mxu0 %v6029_v48 }
 0x700   :  { %6062 = vmatpush3.bf16.msra.mxu1 %v6061_v52  ;;  %6063 = vmatprep.subr.bf16.mxu0 %v6768_v19 }
 0x701   :  { %6087 = vmatprep.subr.bf16.mxu1 %v6768_v19 }
 0x7b5   :  { %v1811_v53 = vpop.f32.mrb[22].mxu0 }
 0x7b6   :  { %v7648_v54 = vadd.f32 %v1811_v53, %v7222_v44  ;;  %v1900_v58 = vpop.f32.mrb[22].mxu1  ;;  %v4933_v59 = vpop.f32.mrb[23].mxu0  ;;  %v2248_v44 = vld [vmem:[#allocation8 + $0x18] sm:$0xff] }
 0x7b7   :  { %v1904_v0 = vadd.f32 %v1900_v58, %v7204_v14  ;;  %v4968_v1 = vpop.f32.mrb[23].mxu1  ;;  %v7661_v14 = vpack.c.bf16 %v2248_v44, %v2247_v11 }
 0x7b9   :  { %6536 = vtanh.f32 %v1904_v0 }
 0x7ba   :  { %6538 = vtanh.f32 %v7648_v54 }
 0x7c3   :  { %v6537_v6 = vpop.eup %6536 }
 0x7c4   :  { %2027 = vmatprep.mubr.f32.mxu0 %v6537_v6  ;;  %2195 = vmatprep.mubr.f32.mxu1 %v6537_v6  ;;  %v6539_v38 = vpop.eup %6538 }
 0x7c5   :  { %2028 = vmatmul.mubr.f32.vlgmr.msra.gmra.mrb[24].mxu0 %v7226_v60  ;;  %2196 = vmatmul.mubr.f32.vlgmr.msra.gmra.mrb[24].mxu1 %v7226_v60  ;;  %v2339_v60 = vld [vmem:[#allocation11 + $0x28] sm:$0xff] }
 0x7c6   :  { %2032 = vmatprep.mubr.f32.mxu0 %v7575_v32  ;;  %2200 = vmatprep.mubr.f32.mxu1 %v7575_v32  ;;  %v7673_v32 = vpack.c.bf16 %v2250_v29, %v2249_v28  ;;  %v7675_v36 = vpack.c.bf16 %v2339_v60, %v2338_v30 }
 0x7c7   :  { %6065 = vmatpush3.bf16.msra.mxu0 %v7651_v7  ;;  %6089 = vmatpush3.bf16.msra.mxu1 %v7653_v10 }
 0x7c8   :  { %6066 = vmatprep.subr.bf16.mxu0 %v6768_v19  ;;  %6090 = vmatprep.subr.bf16.mxu1 %v6768_v19 }
 0x7c9   :  { %2033 = vmatmul.mubr.f32.gmra.mrb[26].mxu0 %v7269_v8  ;;  %2201 = vmatmul.mubr.f32.gmra.mrb[26].mxu1 %v7269_v8  ;;  %v2341_v8 = vld [vmem:[#allocation11 + $0x38] sm:$0xff] }
 0x7ca   :  { %2037 = vmatprep.mubr.f32.mxu0 %v7509_v45  ;;  %2205 = vmatprep.mubr.f32.mxu1 %v7509_v45  ;;  %v7685_v45 = vpack.c.bf16 %v2252_v18, %v2251_v37  ;;  %v7687_v26 = vpack.c.bf16 %v2341_v8, %v2340_v20 }
 0x7cb   :  { %6068 = vmatpush3.bf16.msra.mxu0 %v7661_v14  ;;  %6092 = vmatpush3.bf16.msra.mxu1 %v7663_v22 }
 0x7cc   :  { %6069 = vmatprep.subr.bf16.mxu0 %v6768_v19  ;;  %6093 = vmatprep.subr.bf16.mxu1 %v6768_v19 }
 0x7cd   :  { %2038 = vmatmul.mubr.f32.gmra.mrb[28].mxu0 %v7313_v24  ;;  %2206 = vmatmul.mubr.f32.gmra.mrb[28].mxu1 %v7313_v24  ;;  %v2343_v24 = vld [vmem:[#allocation11 + $0x48] sm:$0xff] }
 0x7ce   :  { %2042 = vmatprep.mubr.f32.mxu0 %v7419_v23  ;;  %2210 = vmatprep.mubr.f32.mxu1 %v7419_v23  ;;  %v7697_v23 = vpack.c.bf16 %v2254_v33, %v2253_v27  ;;  %v7699_v41 = vpack.c.bf16 %v2343_v24, %v2342_v35 }
 0x7cf   :  { %6071 = vmatpush3.bf16.msra.mxu0 %v7673_v32  ;;  %6095 = vmatpush3.bf16.msra.mxu1 %v7675_v36 }
 0x7d0   :  { %6072 = vmatprep.subr.bf16.mxu0 %v6768_v19  ;;  %6096 = vmatprep.subr.bf16.mxu1 %v6768_v19 }
 0x7d1   :  { %2043 = vmatmul.mubr.f32.gmra.mrb[30].mxu0 %v7357_v39  ;;  %2211 = vmatmul.mubr.f32.gmra.mrb[30].mxu1 %v7357_v39  ;;  %v2345_v39 = vld [vmem:[#allocation11 + $0x58] sm:$0xff] }
 0x7d2   :  { %2047 = vmatprep.mubr.f32.mxu0 %v7359_v40  ;;  %2215 = vmatprep.mubr.f32.mxu1 %v7359_v40  ;;  %v7710_v40 = vpack.c.bf16 %v2256_v49, %v2255_v43  ;;  %v7712_v62 = vpack.c.bf16 %v2345_v39, %v2344_v50 }
 0x7d3   :  { %6074 = vmatpush3.bf16.msra.mxu0 %v7685_v45  ;;  %6098 = vmatpush3.bf16.msra.mxu1 %v7687_v26 }
 0x7d4   :  { %6075 = vmatprep.subr.bf16.mxu0 %v6768_v19  ;;  %6099 = vmatprep.subr.bf16.mxu1 %v6768_v19 }
 0x7d5   :  { %2048 = vmatmul.mubr.f32.gmra.mrb[32].mxu0 %v7417_v4  ;;  %2216 = vmatmul.mubr.f32.gmra.mrb[32].mxu1 %v7417_v4  ;;  %v2258_v4 = vld [vmem:[#allocation8 + $0x68] sm:$0xff] }
 0x7d6   :  { %2052 = vmatprep.mubr.f32.mxu0 %v7315_v25  ;;  %2220 = vmatprep.mubr.f32.mxu1 %v7315_v25  ;;  %v7722_v25 = vpack.c.bf16 %v2258_v4, %v2257_v63 }
 0x7d7   :  { %6077 = vmatpush3.bf16.msra.mxu0 %v7697_v23  ;;  %6101 = vmatpush3.bf16.msra.mxu1 %v7699_v41 }
 0x7d8   :  { %6078 = vmatprep.subr.bf16.mxu0 %v6768_v19  ;;  %6102 = vmatprep.subr.bf16.mxu1 %v6768_v19 }
 0x7d9   :  { %2053 = vmatmul.mubr.f32.gmra.mrb[34].mxu0 %v7507_v42  ;;  %2221 = vmatmul.mubr.f32.gmra.mrb[34].mxu1 %v7507_v42  ;;  %v2349_v42 = vld [vmem:[#allocation11 + $0x78] sm:$0xff] }
 0x7da   :  { %2057 = vmatprep.mubr.f32.mxu0 %v7271_v9  ;;  %2225 = vmatprep.mubr.f32.mxu1 %v7271_v9  ;;  %v7734_v9 = vpack.c.bf16 %v2260_v56, %v2259_v34  ;;  %v7736_v31 = vpack.c.bf16 %v2349_v42, %v2348_v57 }
 0x7db   :  { %6080 = vmatpush3.bf16.msra.mxu0 %v7710_v40  ;;  %6104 = vmatpush3.bf16.msra.mxu1 %v7712_v62 }
 0x7dc   :  { %6081 = vmatprep.subr.bf16.mxu0 %v6768_v19  ;;  %6105 = vmatprep.subr.bf16.mxu1 %v6768_v19 }
 0x7dd   :  { %2058 = vmatmul.mubr.f32.gmra.mrb[36].mxu0 %v7567_v17  ;;  %2226 = vmatmul.mubr.f32.gmra.mrb[36].mxu1 %v7567_v17 }
 0x7de   :  { %2062 = vmatprep.mubr.f32.mxu0 %v7228_v61  ;;  %2230 = vmatprep.mubr.f32.mxu1 %v7228_v61 }
 0x7df   :  { %6083 = vmatpush3.bf16.msra.mxu0 %v7722_v25  ;;  %6107 = vmatpush3.bf16.msra.mxu1 %v7724_v21 }
 0x7e0   :  { %6084 = vmatprep.subr.bf16.mxu0 %v6768_v19  ;;  %6108 = vmatprep.subr.bf16.mxu1 %v6768_v19 }
 0x7e1   :  { %2063 = vmatmul.mubr.f32.gmra.mrb[38].mxu0 %v6539_v38  ;;  %2231 = vmatmul.mubr.f32.gmra.mrb[38].mxu1 %v6539_v38 }
 0x7e2   :  { %5001 = vmatprep.mubr.msk.f32.mxu0 %vm6769_vm1, %v6770_v55  ;;  %5036 = vmatprep.mubr.msk.f32.mxu1 %vm6769_vm1, %v6770_v55 }
 0x7e3   :  { %6086 = vmatpush3.bf16.msra.mxu0 %v7734_v9  ;;  %6110 = vmatpush3.bf16.msra.mxu1 %v7736_v31 }
 0x7e4   :  { %6111 = vmatprep.subr.bf16.mxu0 %v6768_v19  ;;  %6135 = vmatprep.subr.bf16.mxu1 %v6768_v19 }
 0x7e6   :  { %5002 = vmatmul.mubr.f32.vlgmr.msra.gmra.mrb[40].mxu0 %v6770_v55  ;;  %5037 = vmatmul.mubr.f32.vlgmr.msra.gmra.mrb[40].mxu1 %v6770_v55 }
 0x7e7   :  { %6113 = vmatpush3.bf16.msra.mxu0 %v7651_v7  ;;  %6137 = vmatpush3.bf16.msra.mxu1 %v7653_v10 }
 0x7e8   :  { %6114 = vmatprep.subr.bf16.mxu0 %v6768_v19  ;;  %6138 = vmatprep.subr.bf16.mxu1 %v6768_v19 }
 0x7e9   :  { %5071 = vmatprep.mubr.msk.f32.mxu0 %vm6769_vm1, %v6770_v55  ;;  %5106 = vmatprep.mubr.msk.f32.mxu1 %vm6769_vm1, %v6770_v55 }
 0x7eb   :  { %6116 = vmatpush3.bf16.msra.mxu0 %v7661_v14  ;;  %6140 = vmatpush3.bf16.msra.mxu1 %v7663_v22 }
 0x7ec   :  { %6117 = vmatprep.subr.bf16.mxu0 %v6768_v19  ;;  %6141 = vmatprep.subr.bf16.mxu1 %v6768_v19 }
 0x7ef   :  { %6119 = vmatpush3.bf16.msra.mxu0 %v7673_v32  ;;  %6143 = vmatpush3.bf16.msra.mxu1 %v7675_v36 }
 0x7f0   :  { %6120 = vmatprep.subr.bf16.mxu0 %v6768_v19  ;;  %6144 = vmatprep.subr.bf16.mxu1 %v6768_v19 }
 0x7f3   :  { %6122 = vmatpush3.bf16.msra.mxu0 %v7685_v45  ;;  %6146 = vmatpush3.bf16.msra.mxu1 %v7687_v26 }
 0x7f4   :  { %6123 = vmatprep.subr.bf16.mxu0 %v6768_v19  ;;  %6147 = vmatprep.subr.bf16.mxu1 %v6768_v19 }
 0x7f7   :  { %6125 = vmatpush3.bf16.msra.mxu0 %v7697_v23  ;;  %6149 = vmatpush3.bf16.msra.mxu1 %v7699_v41 }
 0x7f8   :  { %6126 = vmatprep.subr.bf16.mxu0 %v6768_v19  ;;  %6150 = vmatprep.subr.bf16.mxu1 %v6768_v19 }
 0x7fb   :  { %6128 = vmatpush3.bf16.msra.mxu0 %v7710_v40  ;;  %6152 = vmatpush3.bf16.msra.mxu1 %v7712_v62 }
 0x7fc   :  { %6129 = vmatprep.subr.bf16.mxu0 %v6768_v19  ;;  %6153 = vmatprep.subr.bf16.mxu1 %v6768_v19 }
 0x7ff   :  { %6131 = vmatpush3.bf16.msra.mxu0 %v7722_v25  ;;  %6155 = vmatpush3.bf16.msra.mxu1 %v7724_v21 }
 0x800   :  { %6132 = vmatprep.subr.bf16.mxu0 %v6768_v19  ;;  %6156 = vmatprep.subr.bf16.mxu1 %v6768_v19 }
 0x803   :  { %6134 = vmatpush3.bf16.msra.mxu0 %v7734_v9  ;;  %6158 = vmatpush3.bf16.msra.mxu1 %v7736_v31 }
 0x804   :  { %6159 = vmatprep.subr.bf16.mxu0 %v6768_v19  ;;  %6183 = vmatprep.subr.bf16.mxu1 %v6768_v19 }
 0x898   :  { %v3983_v61 = vpop.f32.mrb[24].mxu0  ;;  %v4039_v17 = vpop.f32.mrb[24].mxu1 }
 0x899   :  { %v3984_v47 = vpop.f32.mrb[25].mxu0  ;;  %v4040_v48 = vpop.f32.mrb[25].mxu1 }
 0x89a   :  { %v3985_v52 = vadd.f32 %v3984_v47, %v3983_v61  ;;  %v4041_v53 = vadd.f32 %v4040_v48, %v4039_v17 }
 0x89c   :  { %v3986_v54 = vpop.f32.mrb[26].mxu0  ;;  %v4042_v58 = vpop.f32.mrb[26].mxu1  ;;  %v7786_v59 = vadd.f32 %v4041_v53, %v3653_v51 }
 0x89d   :  { %v3987_v0 = vpop.f32.mrb[27].mxu0  ;;  %v4043_v1 = vpop.f32.mrb[27].mxu1 }
 0x89e   :  { %v3988_v46 = vadd.f32 %v3987_v0, %v3986_v54  ;;  %v4044_v12 = vadd.f32 %v4043_v1, %v4042_v58 }
 0x8a0   :  { %v3989_v3 = vpop.f32.mrb[28].mxu0  ;;  %v4045_v6 = vpop.f32.mrb[28].mxu1  ;;  %v7791_v11 = vadd.f32 %v3988_v46, %v3652_v2  ;;  %v7793_v44 = vadd.f32 %v4044_v12, %v3653_v51 }
 0x8a1   :  { %v3990_v13 = vpop.f32.mrb[29].mxu0  ;;  %v4046_v15 = vpop.f32.mrb[29].mxu1 }
 0x8a2   :  { %v3991_v28 = vadd.f32 %v3990_v13, %v3989_v3  ;;  %v4047_v29 = vadd.f32 %v4046_v15, %v4045_v6 }
 0x8a4   :  { %v3992_v30 = vpop.f32.mrb[30].mxu0  ;;  %v4048_v60 = vpop.f32.mrb[30].mxu1  ;;  %v7795_v37 = vadd.f32 %v3991_v28, %v3652_v2  ;;  %v7797_v18 = vadd.f32 %v4047_v29, %v3653_v51 }
 0x8a5   :  { %v3993_v20 = vpop.f32.mrb[31].mxu0  ;;  %v4049_v8 = vpop.f32.mrb[31].mxu1 }
 0x8a6   :  { %v3994_v27 = vadd.f32 %v3993_v20, %v3992_v30  ;;  %v4050_v33 = vadd.f32 %v4049_v8, %v4048_v60  ;;  %v2030_v30 = vadd.f32 %v3985_v52, %v3652_v2 }
 0x8a8   :  { %v3995_v35 = vpop.f32.mrb[32].mxu0  ;;  %v4051_v24 = vpop.f32.mrb[32].mxu1  ;;  %v7799_v43 = vadd.f32 %v3994_v27, %v3652_v2  ;;  %v7801_v49 = vadd.f32 %v4050_v33, %v3653_v51 }
 0x8a9   :  { %v3996_v50 = vpop.f32.mrb[33].mxu0  ;;  %v4052_v39 = vpop.f32.mrb[33].mxu1 }
 0x8aa   :  { %v3997_v63 = vadd.f32 %v3996_v50, %v3995_v35  ;;  %v4053_v4 = vadd.f32 %v4052_v39, %v4051_v24 }
 0x8ac   :  { %v3998_v5 = vpop.f32.mrb[34].mxu0  ;;  %v4054_v16 = vpop.f32.mrb[34].mxu1  ;;  %v7803_v34 = vadd.f32 %v4053_v4, %v3653_v51  ;;  %v7805_v56 = vadd.f32 %v3997_v63, %v3652_v2 }
 0x8ad   :  { %v3999_v57 = vpop.f32.mrb[35].mxu0  ;;  %v4055_v42 = vpop.f32.mrb[35].mxu1 }
 0x8ae   :  { %v4000_v38 = vadd.f32 %v3999_v57, %v3998_v5  ;;  %v4056_v61 = vadd.f32 %v4055_v42, %v4054_v16 }
 0x8b0   :  { %v4001_v17 = vpop.f32.mrb[36].mxu0  ;;  %v4057_v47 = vpop.f32.mrb[36].mxu1  ;;  %v7807_v48 = vadd.f32 %v4056_v61, %v3653_v51  ;;  %v7809_v53 = vadd.f32 %v4000_v38, %v3652_v2 }
 0x8b1   :  { %v4002_v54 = vpop.f32.mrb[37].mxu0  ;;  %v4058_v58 = vpop.f32.mrb[37].mxu1 }
 0x8b2   :  { %v4003_v0 = vadd.f32 %v4002_v54, %v4001_v17  ;;  %v4059_v1 = vadd.f32 %v4058_v58, %v4057_v47 }
 0x8b4   :  { %v4004_v46 = vpop.f32.mrb[38].mxu0  ;;  %v4060_v12 = vpop.f32.mrb[38].mxu1  ;;  %v2228_v3 = vadd.f32 %v4059_v1, %v3653_v51  ;;  %v7811_v6 = vadd.f32 %v4003_v0, %v3652_v2 }
 0x8b5   :  { %v4005_v13 = vpop.f32.mrb[39].mxu0  ;;  %v4061_v15 = vpop.f32.mrb[39].mxu1 }
 0x8b6   :  { %v4006_v28 = vadd.f32 %v4005_v13, %v4004_v46  ;;  %v4062_v29 = vadd.f32 %v4061_v15, %v4060_v12 }
 0x8b8   :  { %v2233_v60 = vadd.f32 %v4062_v29, %v3653_v51  ;;  %v7813_v20 = vadd.f32 %v4006_v28, %v3652_v2 }
 0x8b9   :  { %v2327_v8 = vpop.f32.mrb[40].mxu0  ;;  %v2416_v27 = vpop.f32.mrb[40].mxu1 }
 0x8ba   :  { %v2331_v33 = vadd.f32 %v2327_v8, %v2030_v30  ;;  %v2420_v35 = vadd.f32 %v2416_v27, %v2233_v60  ;;  %v5003_v24 = vpop.f32.mrb[41].mxu0  ;;  %v5038_v50 = vpop.f32.mrb[41].mxu1 }
 0x8bc   :  { %6540 = vtanh.f32 %v2331_v33 }
 0x8bd   :  { %6542 = vtanh.f32 %v2420_v35 }
 0x8c6   :  { %v6541_v39 = vpop.eup %6540 }
 0x8c7   :  { %v6543_v63 = vpop.eup %6542  ;;  %5072 = vmatmul.mubr.f32.vlgmr.msra.gmra.mrb[42].mxu0 %v6541_v39 }
 0x8c8   :  { %5107 = vmatmul.mubr.f32.vlgmr.msra.gmra.mrb[42].mxu1 %v6543_v63  ;;  %6161 = vmatpush3.bf16.msra.mxu0 %v7651_v7 }
 0x8c9   :  { %6185 = vmatpush3.bf16.msra.mxu1 %v7653_v10  ;;  %6162 = vmatprep.subr.bf16.mxu0 %v6768_v19 }
 0x8ca   :  { %6186 = vmatprep.subr.bf16.mxu1 %v6768_v19  ;;  %5141 = vmatprep.mubr.msk.f32.mxu0 %vm6769_vm1, %v6770_v55 }
 0x8cb   :  { %5176 = vmatprep.mubr.msk.f32.mxu1 %vm6769_vm1, %v6770_v55 }
 0x8cc   :  { %6164 = vmatpush3.bf16.msra.mxu0 %v7661_v14 }
 0x8cd   :  { %6188 = vmatpush3.bf16.msra.mxu1 %v7663_v22  ;;  %6165 = vmatprep.subr.bf16.mxu0 %v6768_v19 }
 0x8ce   :  { %6189 = vmatprep.subr.bf16.mxu1 %v6768_v19 }
 0x8d0   :  { %6167 = vmatpush3.bf16.msra.mxu0 %v7673_v32 }
 0x8d1   :  { %6191 = vmatpush3.bf16.msra.mxu1 %v7675_v36  ;;  %6168 = vmatprep.subr.bf16.mxu0 %v6768_v19 }
 0x8d2   :  { %6192 = vmatprep.subr.bf16.mxu1 %v6768_v19 }
 0x8d4   :  { %6170 = vmatpush3.bf16.msra.mxu0 %v7685_v45 }
 0x8d5   :  { %6194 = vmatpush3.bf16.msra.mxu1 %v7687_v26  ;;  %6171 = vmatprep.subr.bf16.mxu0 %v6768_v19 }
 0x8d6   :  { %6195 = vmatprep.subr.bf16.mxu1 %v6768_v19 }
 0x8d8   :  { %6173 = vmatpush3.bf16.msra.mxu0 %v7697_v23 }
 0x8d9   :  { %6197 = vmatpush3.bf16.msra.mxu1 %v7699_v41  ;;  %6174 = vmatprep.subr.bf16.mxu0 %v6768_v19 }
 0x8da   :  { %6198 = vmatprep.subr.bf16.mxu1 %v6768_v19 }
 0x8dc   :  { %6176 = vmatpush3.bf16.msra.mxu0 %v7710_v40 }
 0x8dd   :  { %6200 = vmatpush3.bf16.msra.mxu1 %v7712_v62  ;;  %6177 = vmatprep.subr.bf16.mxu0 %v6768_v19 }
 0x8de   :  { %6201 = vmatprep.subr.bf16.mxu1 %v6768_v19 }
 0x8e0   :  { %6179 = vmatpush3.bf16.msra.mxu0 %v7722_v25 }
 0x8e1   :  { %6203 = vmatpush3.bf16.msra.mxu1 %v7724_v21  ;;  %6180 = vmatprep.subr.bf16.mxu0 %v6768_v19 }
 0x8e2   :  { %6204 = vmatprep.subr.bf16.mxu1 %v6768_v19 }
 0x8e4   :  { %6182 = vmatpush3.bf16.msra.mxu0 %v7734_v9 }
 0x8e5   :  { %6206 = vmatpush3.bf16.msra.mxu1 %v7736_v31  ;;  %6207 = vmatprep.subr.bf16.mxu0 %v6768_v19 }
 0x8e6   :  { %6231 = vmatprep.subr.bf16.mxu1 %v6768_v19 }
 0x99a   :  { %v2489_v51 = vpop.f32.mrb[42].mxu0 }
 0x99b   :  { %v2493_v52 = vadd.f32 %v2489_v51, %v7791_v11  ;;  %v5073_v2 = vpop.f32.mrb[43].mxu0  ;;  %v2562_v4 = vpop.f32.mrb[42].mxu1  ;;  %v3464_v51 = vld [vmem:[#allocation14 + $0xa0] sm:$0xff] }
 0x99c   :  { %v2566_v5 = vadd.f32 %v2562_v4, %v2228_v3  ;;  %v5108_v16 = vpop.f32.mrb[43].mxu1  ;;  %v3448_v2 = vld [vmem:[#allocation14 + $0x20] sm:$0xff]  ;;  %v3449_v4 = vld [vmem:[#allocation14 + $0x28] sm:$0xff] }
 0x99d   :  { %6544 = vtanh.f32 %v2493_v52  ;;  %v3465_v52 = vld [vmem:[#allocation14 + $0xa8] sm:$0xff]  ;;  %v6478_v16 = vpack.c.bf16 %v3449_v4, %v3448_v2 }
 0x99e   :  { %6546 = vtanh.f32 %v2566_v5  ;;  %v6454_v5 = vpack.c.bf16 %v3465_v52, %v3464_v51 }
 0x9a7   :  { %v6545_v57 = vpop.eup %6544 }
 0x9a8   :  { %v6547_v42 = vpop.eup %6546  ;;  %5142 = vmatmul.mubr.f32.vlgmr.msra.gmra.mrb[44].mxu0 %v6545_v57  ;;  %v3466_v57 = vld [vmem:[#allocation14 + $0xb0] sm:$0xff] }
 0x9a9   :  { %5177 = vmatmul.mubr.f32.vlgmr.msra.gmra.mrb[44].mxu1 %v6547_v42  ;;  %6209 = vmatpush3.bf16.msra.mxu0 %v7651_v7  ;;  %v3467_v42 = vld [vmem:[#allocation14 + $0xb8] sm:$0xff] }
 0x9aa   :  { %6233 = vmatpush3.bf16.msra.mxu1 %v7653_v10  ;;  %6210 = vmatprep.subr.bf16.mxu0 %v6768_v19 }
 0x9ab   :  { %6234 = vmatprep.subr.bf16.mxu1 %v6768_v19  ;;  %5211 = vmatprep.mubr.msk.f32.mxu0 %vm6769_vm1, %v6770_v55 }
 0x9ac   :  { %5246 = vmatprep.mubr.msk.f32.mxu1 %vm6769_vm1, %v6770_v55 }
 0x9ad   :  { %6212 = vmatpush3.bf16.msra.mxu0 %v7661_v14 }
 0x9ae   :  { %6236 = vmatpush3.bf16.msra.mxu1 %v7663_v22  ;;  %6213 = vmatprep.subr.bf16.mxu0 %v6768_v19 }
 0x9af   :  { %6237 = vmatprep.subr.bf16.mxu1 %v6768_v19 }
 0x9b1   :  { %6215 = vmatpush3.bf16.msra.mxu0 %v7673_v32 }
 0x9b2   :  { %6239 = vmatpush3.bf16.msra.mxu1 %v7675_v36  ;;  %6216 = vmatprep.subr.bf16.mxu0 %v6768_v19 }
 0x9b3   :  { %6240 = vmatprep.subr.bf16.mxu1 %v6768_v19 }
 0x9b5   :  { %6218 = vmatpush3.bf16.msra.mxu0 %v7685_v45 }
 0x9b6   :  { %6242 = vmatpush3.bf16.msra.mxu1 %v7687_v26  ;;  %6219 = vmatprep.subr.bf16.mxu0 %v6768_v19 }
 0x9b7   :  { %6243 = vmatprep.subr.bf16.mxu1 %v6768_v19 }
 0x9b9   :  { %6221 = vmatpush3.bf16.msra.mxu0 %v7697_v23 }
 0x9ba   :  { %6245 = vmatpush3.bf16.msra.mxu1 %v7699_v41  ;;  %6222 = vmatprep.subr.bf16.mxu0 %v6768_v19 }
 0x9bb   :  { %6246 = vmatprep.subr.bf16.mxu1 %v6768_v19 }
 0x9bd   :  { %6224 = vmatpush3.bf16.msra.mxu0 %v7710_v40 }
 0x9be   :  { %6248 = vmatpush3.bf16.msra.mxu1 %v7712_v62  ;;  %6225 = vmatprep.subr.bf16.mxu0 %v6768_v19 }
 0x9bf   :  { %6249 = vmatprep.subr.bf16.mxu1 %v6768_v19 }
 0x9c1   :  { %6227 = vmatpush3.bf16.msra.mxu0 %v7722_v25 }
 0x9c2   :  { %6251 = vmatpush3.bf16.msra.mxu1 %v7724_v21  ;;  %6228 = vmatprep.subr.bf16.mxu0 %v6768_v19 }
 0x9c3   :  { %6252 = vmatprep.subr.bf16.mxu1 %v6768_v19 }
 0x9c5   :  { %6230 = vmatpush3.bf16.msra.mxu0 %v7734_v9 }
 0x9c6   :  { %6254 = vmatpush3.bf16.msra.mxu1 %v7736_v31  ;;  %6255 = vmatprep.subr.bf16.mxu0 %v6768_v19 }
 0x9c7   :  { %6279 = vmatprep.subr.bf16.mxu1 %v6768_v19 }
 0xa7b   :  { %v2635_v11 = vpop.f32.mrb[44].mxu0 }
 0xa7c   :  { %v2639_v38 = vadd.f32 %v2635_v11, %v7795_v37  ;;  %v5143_v61 = vpop.f32.mrb[45].mxu0  ;;  %v2708_v17 = vpop.f32.mrb[44].mxu1  ;;  %v3450_v11 = vld [vmem:[#allocation14 + $0x30] sm:$0xff] }
 0xa7d   :  { %v2712_v47 = vadd.f32 %v2708_v17, %v7807_v48  ;;  %v5178_v54 = vpop.f32.mrb[45].mxu1  ;;  %v6457_v61 = vpack.c.bf16 %v3467_v42, %v3466_v57 }
 0xa7e   :  { %6548 = vtanh.f32 %v2639_v38  ;;  %v3451_v38 = vld [vmem:[#allocation14 + $0x38] sm:$0xff] }
 0xa7f   :  { %6550 = vtanh.f32 %v2712_v47  ;;  %v6481_v17 = vpack.c.bf16 %v3451_v38, %v3450_v11  ;;  %v3453_v47 = vld [vmem:[#allocation14 + $0x48] sm:$0xff] }
 0xa88   :  { %v6549_v58 = vpop.eup %6548 }
 0xa89   :  { %v6551_v0 = vpop.eup %6550  ;;  %5212 = vmatmul.mubr.f32.vlgmr.msra.gmra.mrb[46].mxu0 %v6549_v58  ;;  %v3468_v58 = vld [vmem:[#allocation14 + $0xc0] sm:$0xff] }
 0xa8a   :  { %5247 = vmatmul.mubr.f32.vlgmr.msra.gmra.mrb[46].mxu1 %v6551_v0  ;;  %6257 = vmatpush3.bf16.msra.mxu0 %v7651_v7  ;;  %v3469_v0 = vld [vmem:[#allocation14 + $0xc8] sm:$0xff] }
 0xa8b   :  { %6281 = vmatpush3.bf16.msra.mxu1 %v7653_v10  ;;  %6258 = vmatprep.subr.bf16.mxu0 %v6768_v19 }
 0xa8c   :  { %6282 = vmatprep.subr.bf16.mxu1 %v6768_v19  ;;  %5281 = vmatprep.mubr.msk.f32.mxu0 %vm6769_vm1, %v6770_v55 }
 0xa8d   :  { %5316 = vmatprep.mubr.msk.f32.mxu1 %vm6769_vm1, %v6770_v55 }
 0xa8e   :  { %6260 = vmatpush3.bf16.msra.mxu0 %v7661_v14 }
 0xa8f   :  { %6284 = vmatpush3.bf16.msra.mxu1 %v7663_v22  ;;  %6261 = vmatprep.subr.bf16.mxu0 %v6768_v19 }
 0xa90   :  { %6285 = vmatprep.subr.bf16.mxu1 %v6768_v19 }
 0xa92   :  { %6263 = vmatpush3.bf16.msra.mxu0 %v7673_v32 }
 0xa93   :  { %6287 = vmatpush3.bf16.msra.mxu1 %v7675_v36  ;;  %6264 = vmatprep.subr.bf16.mxu0 %v6768_v19 }
 0xa94   :  { %6288 = vmatprep.subr.bf16.mxu1 %v6768_v19 }
 0xa96   :  { %6266 = vmatpush3.bf16.msra.mxu0 %v7685_v45 }
 0xa97   :  { %6290 = vmatpush3.bf16.msra.mxu1 %v7687_v26  ;;  %6267 = vmatprep.subr.bf16.mxu0 %v6768_v19 }
 0xa98   :  { %6291 = vmatprep.subr.bf16.mxu1 %v6768_v19 }
 0xa9a   :  { %6269 = vmatpush3.bf16.msra.mxu0 %v7697_v23 }
 0xa9b   :  { %6293 = vmatpush3.bf16.msra.mxu1 %v7699_v41  ;;  %6270 = vmatprep.subr.bf16.mxu0 %v6768_v19 }
 0xa9c   :  { %6294 = vmatprep.subr.bf16.mxu1 %v6768_v19 }
 0xa9e   :  { %6272 = vmatpush3.bf16.msra.mxu0 %v7710_v40 }
 0xa9f   :  { %6296 = vmatpush3.bf16.msra.mxu1 %v7712_v62  ;;  %6273 = vmatprep.subr.bf16.mxu0 %v6768_v19 }
 0xaa0   :  { %6297 = vmatprep.subr.bf16.mxu1 %v6768_v19 }
 0xaa2   :  { %6275 = vmatpush3.bf16.msra.mxu0 %v7722_v25 }
 0xaa3   :  { %6299 = vmatpush3.bf16.msra.mxu1 %v7724_v21  ;;  %6276 = vmatprep.subr.bf16.mxu0 %v6768_v19 }
 0xaa4   :  { %6300 = vmatprep.subr.bf16.mxu1 %v6768_v19 }
 0xaa6   :  { %6278 = vmatpush3.bf16.msra.mxu0 %v7734_v9 }
 0xaa7   :  { %6302 = vmatpush3.bf16.msra.mxu1 %v7736_v31  ;;  %6303 = vmatprep.subr.bf16.mxu0 %v6768_v19 }
 0xaa8   :  { %6327 = vmatprep.subr.bf16.mxu1 %v6768_v19 }
 0xb5c   :  { %v2781_v37 = vpop.f32.mrb[46].mxu0 }
 0xb5d   :  { %v2785_v48 = vadd.f32 %v2781_v37, %v7799_v43  ;;  %v5213_v1 = vpop.f32.mrb[47].mxu0  ;;  %v2854_v46 = vpop.f32.mrb[46].mxu1  ;;  %v6460_v37 = vpack.c.bf16 %v3469_v0, %v3468_v58 }
 0xb5e   :  { %v2858_v12 = vadd.f32 %v2854_v46, %v7803_v34  ;;  %v5248_v3 = vpop.f32.mrb[47].mxu1  ;;  %v3455_v1 = vld [vmem:[#allocation14 + $0x58] sm:$0xff] }
 0xb5f   :  { %6552 = vtanh.f32 %v2785_v48  ;;  %v3454_v48 = vld [vmem:[#allocation14 + $0x50] sm:$0xff]  ;;  %v3471_v3 = vld [vmem:[#allocation14 + $0xd8] sm:$0xff] }
 0xb60   :  { %6554 = vtanh.f32 %v2858_v12  ;;  %v6487_v46 = vpack.c.bf16 %v3455_v1, %v3454_v48  ;;  %v3470_v12 = vld [vmem:[#allocation14 + $0xd0] sm:$0xff] }
 0xb69   :  { %v6553_v13 = vpop.eup %6552 }
 0xb6a   :  { %v6555_v15 = vpop.eup %6554  ;;  %5282 = vmatmul.mubr.f32.vlgmr.msra.gmra.mrb[48].mxu0 %v6553_v13  ;;  %v6463_v13 = vpack.c.bf16 %v3471_v3, %v3470_v12 }
 0xb6b   :  { %5317 = vmatmul.mubr.f32.vlgmr.msra.gmra.mrb[48].mxu1 %v6555_v15  ;;  %6305 = vmatpush3.bf16.msra.mxu0 %v7651_v7  ;;  %v3456_v15 = vld [vmem:[#allocation14 + $0x60] sm:$0xff] }
 0xb6c   :  { %6329 = vmatpush3.bf16.msra.mxu1 %v7653_v10  ;;  %6306 = vmatprep.subr.bf16.mxu0 %v6768_v19 }
 0xb6d   :  { %6330 = vmatprep.subr.bf16.mxu1 %v6768_v19  ;;  %5351 = vmatprep.mubr.msk.f32.mxu0 %vm6769_vm1, %v6770_v55 }
 0xb6e   :  { %5386 = vmatprep.mubr.msk.f32.mxu1 %vm6769_vm1, %v6770_v55 }
 0xb6f   :  { %6308 = vmatpush3.bf16.msra.mxu0 %v7661_v14 }
 0xb70   :  { %6332 = vmatpush3.bf16.msra.mxu1 %v7663_v22  ;;  %6309 = vmatprep.subr.bf16.mxu0 %v6768_v19 }
 0xb71   :  { %6333 = vmatprep.subr.bf16.mxu1 %v6768_v19 }
 0xb73   :  { %6311 = vmatpush3.bf16.msra.mxu0 %v7673_v32 }
 0xb74   :  { %6335 = vmatpush3.bf16.msra.mxu1 %v7675_v36  ;;  %6312 = vmatprep.subr.bf16.mxu0 %v6768_v19 }
 0xb75   :  { %6336 = vmatprep.subr.bf16.mxu1 %v6768_v19 }
 0xb77   :  { %6314 = vmatpush3.bf16.msra.mxu0 %v7685_v45 }
 0xb78   :  { %6338 = vmatpush3.bf16.msra.mxu1 %v7687_v26  ;;  %6315 = vmatprep.subr.bf16.mxu0 %v6768_v19 }
 0xb79   :  { %6339 = vmatprep.subr.bf16.mxu1 %v6768_v19 }
 0xb7b   :  { %6317 = vmatpush3.bf16.msra.mxu0 %v7697_v23 }
 0xb7c   :  { %6341 = vmatpush3.bf16.msra.mxu1 %v7699_v41  ;;  %6318 = vmatprep.subr.bf16.mxu0 %v6768_v19 }
 0xb7d   :  { %6342 = vmatprep.subr.bf16.mxu1 %v6768_v19 }
 0xb7f   :  { %6320 = vmatpush3.bf16.msra.mxu0 %v7710_v40 }
 0xb80   :  { %6344 = vmatpush3.bf16.msra.mxu1 %v7712_v62  ;;  %6321 = vmatprep.subr.bf16.mxu0 %v6768_v19 }
 0xb81   :  { %6345 = vmatprep.subr.bf16.mxu1 %v6768_v19 }
 0xb83   :  { %6323 = vmatpush3.bf16.msra.mxu0 %v7722_v25 }
 0xb84   :  { %6347 = vmatpush3.bf16.msra.mxu1 %v7724_v21  ;;  %6324 = vmatprep.subr.bf16.mxu0 %v6768_v19 }
 0xb85   :  { %6348 = vmatprep.subr.bf16.mxu1 %v6768_v19 }
 0xb87   :  { %6326 = vmatpush3.bf16.msra.mxu0 %v7734_v9 }
 0xb88   :  { %6350 = vmatpush3.bf16.msra.mxu1 %v7736_v31  ;;  %6351 = vmatprep.subr.bf16.mxu0 %v6768_v19 }
 0xb89   :  { %6375 = vmatprep.subr.bf16.mxu1 %v6768_v19 }
 0xc3d   :  { %v2927_v43 = vpop.f32.mrb[48].mxu0 }
 0xc3e   :  { %v2931_v34 = vadd.f32 %v2927_v43, %v7805_v56  ;;  %v5283_v28 = vpop.f32.mrb[49].mxu0  ;;  %v3000_v29 = vpop.f32.mrb[48].mxu1  ;;  %v3457_v43 = vld [vmem:[#allocation14 + $0x68] sm:$0xff] }
 0xc3f   :  { %v3004_v30 = vadd.f32 %v3000_v29, %v7801_v49  ;;  %v5318_v60 = vpop.f32.mrb[49].mxu1  ;;  %v6490_v28 = vpack.c.bf16 %v3457_v43, %v3456_v15  ;;  %v3473_v29 = vld [vmem:[#allocation14 + $0xe8] sm:$0xff] }
 0xc40   :  { %6556 = vtanh.f32 %v2931_v34  ;;  %v3472_v34 = vld [vmem:[#allocation14 + $0xe0] sm:$0xff]  ;;  %v3459_v60 = vld [vmem:[#allocation14 + $0x78] sm:$0xff] }
 0xc41   :  { %6558 = vtanh.f32 %v3004_v30  ;;  %v3458_v30 = vld [vmem:[#allocation14 + $0x70] sm:$0xff] }
 0xc4a   :  { %v6557_v8 = vpop.eup %6556 }
 0xc4b   :  { %v6559_v27 = vpop.eup %6558  ;;  %5352 = vmatmul.mubr.f32.vlgmr.msra.gmra.mrb[50].mxu0 %v6557_v8  ;;  %v6466_v8 = vpack.c.bf16 %v3473_v29, %v3472_v34 }
 0xc4c   :  { %5387 = vmatmul.mubr.f32.vlgmr.msra.gmra.mrb[50].mxu1 %v6559_v27  ;;  %6353 = vmatpush3.bf16.msra.mxu0 %v7651_v7  ;;  %v3474_v27 = vld [vmem:[#allocation14 + $0xf0] sm:$0xff] }
 0xc4d   :  { %6377 = vmatpush3.bf16.msra.mxu1 %v7653_v10  ;;  %6354 = vmatprep.subr.bf16.mxu0 %v6768_v19 }
 0xc4e   :  { %6378 = vmatprep.subr.bf16.mxu1 %v6768_v19  ;;  %5421 = vmatprep.mubr.msk.f32.mxu0 %vm6769_vm1, %v6770_v55 }
 0xc4f   :  { %5456 = vmatprep.mubr.msk.f32.mxu1 %vm6769_vm1, %v6770_v55 }
 0xc50   :  { %6356 = vmatpush3.bf16.msra.mxu0 %v7661_v14 }
 0xc51   :  { %6380 = vmatpush3.bf16.msra.mxu1 %v7663_v22  ;;  %6357 = vmatprep.subr.bf16.mxu0 %v6768_v19 }
 0xc52   :  { %6381 = vmatprep.subr.bf16.mxu1 %v6768_v19 }
 0xc54   :  { %6359 = vmatpush3.bf16.msra.mxu0 %v7673_v32 }
 0xc55   :  { %6383 = vmatpush3.bf16.msra.mxu1 %v7675_v36  ;;  %6360 = vmatprep.subr.bf16.mxu0 %v6768_v19 }
 0xc56   :  { %6384 = vmatprep.subr.bf16.mxu1 %v6768_v19 }
 0xc58   :  { %6362 = vmatpush3.bf16.msra.mxu0 %v7685_v45 }
 0xc59   :  { %6386 = vmatpush3.bf16.msra.mxu1 %v7687_v26  ;;  %6363 = vmatprep.subr.bf16.mxu0 %v6768_v19 }
 0xc5a   :  { %6387 = vmatprep.subr.bf16.mxu1 %v6768_v19 }
 0xc5c   :  { %6365 = vmatpush3.bf16.msra.mxu0 %v7697_v23 }
 0xc5d   :  { %6389 = vmatpush3.bf16.msra.mxu1 %v7699_v41  ;;  %6366 = vmatprep.subr.bf16.mxu0 %v6768_v19 }
 0xc5e   :  { %6390 = vmatprep.subr.bf16.mxu1 %v6768_v19 }
 0xc60   :  { %6368 = vmatpush3.bf16.msra.mxu0 %v7710_v40 }
 0xc61   :  { %6392 = vmatpush3.bf16.msra.mxu1 %v7712_v62  ;;  %6369 = vmatprep.subr.bf16.mxu0 %v6768_v19 }
 0xc62   :  { %6393 = vmatprep.subr.bf16.mxu1 %v6768_v19 }
 0xc64   :  { %6371 = vmatpush3.bf16.msra.mxu0 %v7722_v25 }
 0xc65   :  { %6395 = vmatpush3.bf16.msra.mxu1 %v7724_v21  ;;  %6372 = vmatprep.subr.bf16.mxu0 %v6768_v19 }
 0xc66   :  { %6396 = vmatprep.subr.bf16.mxu1 %v6768_v19 }
 0xc68   :  { %6374 = vmatpush3.bf16.msra.mxu0 %v7734_v9 }
 0xc69   :  { %6398 = vmatpush3.bf16.msra.mxu1 %v7736_v31  ;;  %6399 = vmatprep.subr.bf16.mxu0 %v6768_v19 }
 0xc6a   :  { %6423 = vmatprep.subr.bf16.mxu1 %v6768_v19 }
 0xd1e   :  { %v3073_v49 = vpop.f32.mrb[50].mxu0 }
 0xd1f   :  { %v3077_v56 = vadd.f32 %v3073_v49, %v7809_v53  ;;  %v5353_v33 = vpop.f32.mrb[51].mxu0  ;;  %v3146_v35 = vpop.f32.mrb[50].mxu1  ;;  %v3475_v49 = vld [vmem:[#allocation14 + $0xf8] sm:$0xff] }
 0xd20   :  { %v3150_v24 = vadd.f32 %v3146_v35, %v7797_v18  ;;  %v5388_v50 = vpop.f32.mrb[51].mxu1  ;;  %v3447_v18 = vld [vmem:[#allocation14 + $0x18] sm:$0xff]  ;;  %v6469_v33 = vpack.c.bf16 %v3475_v49, %v3474_v27 }
 0xd21   :  { %6560 = vtanh.f32 %v3077_v56  ;;  %v6493_v56 = vpack.c.bf16 %v3459_v60, %v3458_v30 }
 0xd22   :  { %6562 = vtanh.f32 %v3150_v24 }
 0xd2b   :  { %v6561_v39 = vpop.eup %6560 }
 0xd2c   :  { %v6563_v63 = vpop.eup %6562  ;;  %5422 = vmatmul.mubr.f32.vlgmr.msra.gmra.mrb[52].mxu0 %v6561_v39 }
 0xd2d   :  { %5457 = vmatmul.mubr.f32.vlgmr.msra.gmra.mrb[52].mxu1 %v6563_v63  ;;  %6401 = vmatpush3.bf16.msra.mxu0 %v7651_v7 }
 0xd2e   :  { %6425 = vmatpush3.bf16.msra.mxu1 %v7653_v10  ;;  %6402 = vmatprep.subr.bf16.mxu0 %v6768_v19 }
 0xd2f   :  { %6426 = vmatprep.subr.bf16.mxu1 %v6768_v19  ;;  %5491 = vmatprep.mubr.msk.f32.mxu0 %vm6769_vm1, %v6770_v55 }
 0xd30   :  { %5526 = vmatprep.mubr.msk.f32.mxu1 %vm6769_vm1, %v6770_v55 }
 0xd31   :  { %6404 = vmatpush3.bf16.msra.mxu0 %v7661_v14 }
 0xd32   :  { %6428 = vmatpush3.bf16.msra.mxu1 %v7663_v22  ;;  %6405 = vmatprep.subr.bf16.mxu0 %v6768_v19 }
 0xd33   :  { %6429 = vmatprep.subr.bf16.mxu1 %v6768_v19 }
 0xd35   :  { %6407 = vmatpush3.bf16.msra.mxu0 %v7673_v32 }
 0xd36   :  { %6431 = vmatpush3.bf16.msra.mxu1 %v7675_v36  ;;  %6408 = vmatprep.subr.bf16.mxu0 %v6768_v19 }
 0xd37   :  { %6432 = vmatprep.subr.bf16.mxu1 %v6768_v19 }
 0xd39   :  { %6410 = vmatpush3.bf16.msra.mxu0 %v7685_v45  ;;  %v3460_v45 = vld [vmem:[#allocation14 + $0x80] sm:$0xff] }
 0xd3a   :  { %6434 = vmatpush3.bf16.msra.mxu1 %v7687_v26  ;;  %6411 = vmatprep.subr.bf16.mxu0 %v6768_v19  ;;  %v3461_v26 = vld [vmem:[#allocation14 + $0x88] sm:$0xff] }
 0xd3b   :  { %6435 = vmatprep.subr.bf16.mxu1 %v6768_v19 }
 0xd3d   :  { %6413 = vmatpush3.bf16.msra.mxu0 %v7697_v23  ;;  %v3444_v23 = vld [vmem:[#allocation14] sm:$0xff] }
 0xd3e   :  { %6437 = vmatpush3.bf16.msra.mxu1 %v7699_v41  ;;  %6414 = vmatprep.subr.bf16.mxu0 %v6768_v19  ;;  %v3445_v41 = vld [vmem:[#allocation14 + $0x8] sm:$0xff] }
 0xd3f   :  { %6438 = vmatprep.subr.bf16.mxu1 %v6768_v19 }
 0xd41   :  { %6416 = vmatpush3.bf16.msra.mxu0 %v7710_v40  ;;  %v6448_v40 = vpack.c.bf16 %v3461_v26, %v3460_v45 }
 0xd42   :  { %6440 = vmatpush3.bf16.msra.mxu1 %v7712_v62  ;;  %6417 = vmatprep.subr.bf16.mxu0 %v6768_v19  ;;  %v6472_v62 = vpack.c.bf16 %v3445_v41, %v3444_v23 }
 0xd43   :  { %6441 = vmatprep.subr.bf16.mxu1 %v6768_v19 }
 0xd45   :  { %6419 = vmatpush3.bf16.msra.mxu0 %v7722_v25  ;;  %v3462_v25 = vld [vmem:[#allocation14 + $0x90] sm:$0xff] }
 0xd46   :  { %6443 = vmatpush3.bf16.msra.mxu1 %v7724_v21  ;;  %6420 = vmatprep.subr.bf16.mxu0 %v6768_v19  ;;  %v3463_v21 = vld [vmem:[#allocation14 + $0x98] sm:$0xff] }
 0xd47   :  { %6444 = vmatprep.subr.bf16.mxu1 %v6768_v19 }
 0xd49   :  { %6422 = vmatpush3.bf16.msra.mxu0 %v7734_v9 }
 0xd4a   :  { %6446 = vmatpush3.bf16.msra.mxu1 %v7736_v31  ;;  %6447 = vmatprep.subr.bf16.mxu0 %v6768_v19  ;;  %v3446_v31 = vld [vmem:[#allocation14 + $0x10] sm:$0xff] }
 0xd4b   :  { %6471 = vmatprep.subr.bf16.mxu1 %v6768_v19 }
 0xdff   :  { %v3219_v7 = vpop.f32.mrb[52].mxu0 }
 0xe00   :  { %v3223_v10 = vadd.f32 %v3219_v7, %v7811_v6  ;;  %v5423_v14 = vpop.f32.mrb[53].mxu0  ;;  %v3292_v22 = vpop.f32.mrb[52].mxu1  ;;  %v6451_v6 = vpack.c.bf16 %v3463_v21, %v3462_v25 }
 0xe01   :  { %v3296_v32 = vadd.f32 %v3292_v22, %v7793_v44  ;;  %v5458_v36 = vpop.f32.mrb[53].mxu1  ;;  %v6475_v44 = vpack.c.bf16 %v3447_v18, %v3446_v31 }
 0xe02   :  { %6564 = vtanh.f32 %v3223_v10  ;;  %v3654_v36 = vld [vmem:[#allocation15] ss:$0 sm:$0xff] }
 0xe03   :  { %6566 = vtanh.f32 %v3296_v32 }
 0xe0c   :  { %v6565_v9 = vpop.eup %6564 }
 0xe0d   :  { %v6567_v53 = vpop.eup %6566  ;;  %5492 = vmatmul.mubr.f32.vlgmr.msra.gmra.mrb[54].mxu0 %v6565_v9 }
 0xe0e   :  { %5527 = vmatmul.mubr.f32.vlgmr.msra.gmra.mrb[54].mxu1 %v6567_v53  ;;  %6449 = vmatpush3.bf16.msra.mxu0 %v6448_v40 }
 0xe0f   :  { %6473 = vmatpush3.bf16.msra.mxu1 %v6472_v62  ;;  %6450 = vmatprep.subr.bf16.mxu0 %v6768_v19 }
 0xe10   :  { %6474 = vmatprep.subr.bf16.mxu1 %v6768_v19  ;;  %5596 = vmatprep.mubr.msk.f32.mxu1 %vm6769_vm1, %v6770_v55 }
 0xe11   :  { %5561 = vmatprep.mubr.msk.f32.mxu0 %vm6769_vm1, %v6770_v55  ;;  %v3452_v55 = vld [vmem:[#allocation14 + $0x40] sm:$0xff] }
 0xe12   :  { %6452 = vmatpush3.bf16.msra.mxu0 %v6451_v6  ;;  %v6484_v54 = vpack.c.bf16 %v3453_v47, %v3452_v55 }
 0xe13   :  { %6476 = vmatpush3.bf16.msra.mxu1 %v6475_v44  ;;  %6453 = vmatprep.subr.bf16.mxu0 %v6768_v19 }
 0xe14   :  { %6477 = vmatprep.subr.bf16.mxu1 %v6768_v19 }
 0xe16   :  { %6455 = vmatpush3.bf16.msra.mxu0 %v6454_v5 }
 0xe17   :  { %6479 = vmatpush3.bf16.msra.mxu1 %v6478_v16  ;;  %6456 = vmatprep.subr.bf16.mxu0 %v6768_v19 }
 0xe18   :  { %6480 = vmatprep.subr.bf16.mxu1 %v6768_v19 }
 0xe1a   :  { %6458 = vmatpush3.bf16.msra.mxu0 %v6457_v61 }
 0xe1b   :  { %6482 = vmatpush3.bf16.msra.mxu1 %v6481_v17  ;;  %6459 = vmatprep.subr.bf16.mxu0 %v6768_v19 }
 0xe1c   :  { %6483 = vmatprep.subr.bf16.mxu1 %v6768_v19 }
 0xe1e   :  { %6461 = vmatpush3.bf16.msra.mxu0 %v6460_v37 }
 0xe1f   :  { %6485 = vmatpush3.bf16.msra.mxu1 %v6484_v54  ;;  %6462 = vmatprep.subr.bf16.mxu0 %v6768_v19 }
 0xe20   :  { %6486 = vmatprep.subr.bf16.mxu1 %v6768_v19 }
 0xe22   :  { %6464 = vmatpush3.bf16.msra.mxu0 %v6463_v13 }
 0xe23   :  { %6488 = vmatpush3.bf16.msra.mxu1 %v6487_v46  ;;  %6465 = vmatprep.subr.bf16.mxu0 %v6768_v19 }
 0xe24   :  { %6489 = vmatprep.subr.bf16.mxu1 %v6768_v19 }
 0xe26   :  { %6467 = vmatpush3.bf16.msra.mxu0 %v6466_v8 }
 0xe27   :  { %6491 = vmatpush3.bf16.msra.mxu1 %v6490_v28  ;;  %6468 = vmatprep.subr.bf16.mxu0 %v6768_v19 }
 0xe28   :  { %6492 = vmatprep.subr.bf16.mxu1 %v6768_v19 }
 0xe2a   :  { %6470 = vmatpush3.bf16.msra.mxu0 %v6469_v33 }
 0xe2b   :  { %6494 = vmatpush3.bf16.msra.mxu1 %v6493_v56 }
 0xee0   :  { %v3365_v35 = vpop.f32.mrb[54].mxu0 }
 0xee1   :  { %v3369_v24 = vadd.f32 %v3365_v35, %v7813_v20  ;;  %v5493_v50 = vpop.f32.mrb[55].mxu0  ;;  %v3438_v39 = vpop.f32.mrb[54].mxu1 }
 0xee2   :  { %v3442_v63 = vadd.f32 %v3438_v39, %v7786_v59  ;;  %v5528_v7 = vpop.f32.mrb[55].mxu1 }
 0xee3   :  { %6568 = vtanh.f32 %v3369_v24 }
 0xee4   :  { %6570 = vtanh.f32 %v3442_v63 }
 0xeed   :  { %v6569_v10 = vpop.eup %6568 }
 0xeee   :  { %v6571_v14 = vpop.eup %6570  ;;  %5597 = vmatmul.mubr.f32.vlgmr.msra.gmra.mrb[56].mxu1 %v6569_v10 }
 0xeef   :  { %5562 = vmatmul.mubr.f32.vlgmr.msra.gmra.mrb[56].mxu0 %v6571_v14 }
 0xfc1   :  { %v3612_v22 = vpop.f32.mrb[56].mxu1 }
 0xfc2   :  { %v3542_v32 = vpop.f32.mrb[56].mxu0  ;;  %v5598_v19 = vpop.f32.mrb[57].mxu1 }
 0xfc3   :  { %v3613_v45 = vadd.f32 %v3612_v22, %v3542_v32  ;;  %v5563_v26 = vpop.f32.mrb[57].mxu0 }
 0xfc5   :  { %v3623_v23 = vadd.f32 %v3654_v36, %v3613_v45 }
 0xfc7   :  { %3624 = vst [vmem:[%s8080_s15] sm:$0xff] %v3623_v23 }
 0xfc8   :  { %3629 = vsyncpa [#allocation5], 1 }
 0xfc9   :  { %3630 = vsyncpa [#allocation7], 1 }
 0xfca   :  { %3631 = vsyncpa [#allocation10], 1 }
 0xfcb   :  { %3632 = vsyncpa [#allocation13], 1 }
 0xfcc   :  { %3633 = vsyncpa [#allocation16], 1 }

</bundles_post_ra>
